<compile_context>
chip_gen: v7x
topology: tpu7x:2x2x1
jax: 0.10.0
libtpu: 0.0.40
codegen_flags: <defaults>
</compile_context>

<pallas_src>
import numpy as np
import jax
import jax.numpy as jnp
from jax.experimental import pallas as pl
from jax.experimental.pallas import tpu as pltpu


# ---------------------------------------------------------------------------
# helpers
# ---------------------------------------------------------------------------
def _round_up(v, m):
    return (v + m - 1) // m * m


# (Cin, Cout, kernel, stride) for the 6 conv layers of `Net.base`
_CONV_CFG = [
    (4, 8, 4, 2), (8, 16, 3, 2), (16, 32, 3, 2),
    (32, 64, 3, 2), (64, 128, 3, 1), (128, 256, 3, 1),
]


# ---------------------------------------------------------------------------
# Tiled fused matmul + bias + ReLU kernel (conv1..conv4 hot path)
# ---------------------------------------------------------------------------
def _mm_bias_relu_kernel(x_ref, w_ref, b_ref, o_ref):
    # bf16 x bf16 -> f32 accumulation on the MXU; bias/ReLU in f32.
    y = jnp.dot(x_ref[...], w_ref[...], preferred_element_type=jnp.float32)
    y = jnp.maximum(y + b_ref[...], 0.0)
    o_ref[...] = y.astype(o_ref.dtype)


def _fused_matmul_bias_relu(cols, w2, b2, tm_max=512):
    """cols: (M, K) bf16, w2: (K, NP) bf16 (NP lane-dense), b2: (1, NP) f32."""
    M, K = cols.shape
    NP = w2.shape[1]
    TM = min(tm_max, _round_up(M, 16))
    MP = _round_up(M, TM)
    if MP != M:
        cols = jnp.pad(cols, ((0, MP - M), (0, 0)))

    out = pl.pallas_call(
        _mm_bias_relu_kernel,
        out_shape=jax.ShapeDtypeStruct((MP, NP), jnp.bfloat16),
        grid=(MP // TM,),
        in_specs=[
            pl.BlockSpec((TM, K), lambda i: (i, 0)),
            pl.BlockSpec((K, NP), lambda i: (0, 0)),
            pl.BlockSpec((1, NP), lambda i: (0, 0)),
        ],
        out_specs=pl.BlockSpec((TM, NP), lambda i: (i, 0)),
        compiler_params=pltpu.CompilerParams(
            dimension_semantics=("parallel",)),
        cost_estimate=pl.CostEstimate(
            flops=2 * MP * K * NP,
            transcendentals=0,
            bytes_accessed=MP * K * 2 + K * NP * 2 + NP * 4 + MP * NP * 2),
    )(cols, w2, b2)
    return out[:M] if MP != M else out


def conv2d_relu_nhwc(x, w, b, stride):
    """x: (B, H, W, Cin) bf16 NHWC; w: (OC, Cin, kh, kw) f32; b: (OC,) f32.
    Returns NHWC (B, OH, OW, OC) bf16 with ReLU fused in the Pallas kernel."""
    OC, Cin, kh, kw = w.shape
    B, H, W, _ = x.shape
    OH = (H - kh) // stride + 1
    OW = (W - kw) // stride + 1
    K = Cin * kh * kw

    # NHWC im2col: columns in (kh, kw, Cin) order; no activation transposes.
    cols = jnp.concatenate(
        [x[:, i:i + stride * OH:stride, j:j + stride * OW:stride, :]
         for i in range(kh) for j in range(kw)],
        axis=-1).reshape(B * OH * OW, K)

    # weight (OC,Cin,kh,kw) -> (kh,kw,Cin,OC) -> (K,OC); pad OC to 128 lanes.
    NP = _round_up(OC, 128)
    w2 = jnp.transpose(w, (2, 3, 1, 0)).reshape(K, OC)
    w2 = jnp.pad(w2, ((0, 0), (0, NP - OC))).astype(jnp.bfloat16)
    b2 = jnp.pad(b, (0, NP - OC)).reshape(1, NP).astype(jnp.float32)

    y = _fused_matmul_bias_relu(cols, w2, b2)          # (M, NP) bf16
    return y[:, :OC].reshape(B, OH, OW, OC)


# ---------------------------------------------------------------------------
# Fused tail kernel: conv5 + conv6 + value/policy heads in ONE pallas_call
# ---------------------------------------------------------------------------
def _tail_kernel(x5_ref, w5_ref, b5_ref, w6_ref, b6_ref,
                 wh1_ref, bh1_ref, wh2_ref, bh2_ref, o_ref):
    nb = o_ref.shape[0]           # batch
    rows5 = x5_ref.shape[1]       # 9 * nb  (rows ordered (spatial_pos, batch))

    # conv5 (3x3, stride 1): accumulate over the 9 taps; rows = (pos, batch).
    acc5 = jnp.zeros((rows5, 128), jnp.float32)
    for t in range(9):
        acc5 = acc5 + jnp.dot(x5_ref[t], w5_ref[t],
                              preferred_element_type=jnp.float32)
    a5 = jnp.maximum(acc5 + b5_ref[...], 0.0).astype(jnp.bfloat16)  # (9B,128)

    # conv6 (3x3 -> 1x1): tap p uses rows [p*nb, (p+1)*nb) of a5.
    acc6 = jnp.zeros((nb, 256), jnp.float32)
    for p in range(9):
        acc6 = acc6 + jnp.dot(a5[p * nb:(p + 1) * nb, :], w6_ref[p],
                              preferred_element_type=jnp.float32)
    a6 = jnp.maximum(acc6 + b6_ref[...], 0.0).astype(jnp.bfloat16)  # (B,256)

    # heads: fused [v1 | fc] -> ReLU -> block-diag [v2 ; alpha|beta].
    h = jnp.dot(a6, wh1_ref[...], preferred_element_type=jnp.float32)
    h = jnp.maximum(h + bh1_ref[...], 0.0).astype(jnp.bfloat16)     # (B,200)
    y = jnp.dot(h, wh2_ref[...], preferred_element_type=jnp.float32)
    y = y + bh2_ref[...]                                            # (B,7) f32

    # col 0 = v (identity); cols 1..6 = Softplus(beta=1, thr=20) + 1.
    col = jax.lax.broadcasted_iota(jnp.int32, y.shape, 1)
    sp = jnp.where(y > 20.0, y, jnp.log1p(jnp.exp(jnp.minimum(y, 20.0)))) + 1.0
    o_ref[...] = jnp.where(col == 0, y, sp).astype(o_ref.dtype)


def _tail_forward(params, x4):
    """x4: conv4 output, NHWC (B, 5, 5, 64) bf16. Returns ((alpha, beta), v)."""
    B = x4.shape[0]
    w5, b5 = params["convs"][4]
    w6, b6 = params["convs"][5]

    # conv5 taps, rows ordered (spatial_pos, batch) so conv6 taps are
    # contiguous row slices inside the kernel (no in-kernel reshapes).
    x5taps = jnp.stack(
        [jnp.transpose(x4[:, i:i + 3, j:j + 3, :], (1, 2, 0, 3)).reshape(9 * B, 64)
         for i in range(3) for j in range(3)],
        axis=0).astype(jnp.bfloat16)                                  # (9, 9B, 64)

    w5t = jnp.transpose(w5, (2, 3, 1, 0)).reshape(9, 64, 128).astype(jnp.bfloat16)
    b5r = b5.reshape(1, 128).astype(jnp.float32)
    w6t = jnp.transpose(w6, (2, 3, 1, 0)).reshape(9, 128, 256).astype(jnp.bfloat16)
    b6r = b6.reshape(1, 256).astype(jnp.float32)

    wv1, bv1 = params["v1"]; wv2, bv2 = params["v2"]
    wfc, bfc = params["fc"]; wa, ba = params["alpha"]; wb, bb = params["beta"]
    wh1 = jnp.concatenate([wv1, wfc], axis=1).astype(jnp.bfloat16)    # (256,200)
    bh1 = jnp.concatenate([bv1, bfc]).reshape(1, 200).astype(jnp.float32)
    top = jnp.concatenate([wv2, jnp.zeros((100, 6), jnp.float32)], axis=1)
    bot = jnp.concatenate([jnp.zeros((100, 1), jnp.float32), wa, wb], axis=1)
    wh2 = jnp.concatenate([top, bot], axis=0).astype(jnp.bfloat16)    # (200,7)
    bh2 = jnp.concatenate([bv2, ba, bb]).reshape(1, 7).astype(jnp.float32)

    out = pl.pallas_call(
        _tail_kernel,
        out_shape=jax.ShapeDtypeStruct((B, 7), jnp.float32),
        grid=(1,),
        in_specs=[
            pl.BlockSpec((9, 9 * B, 64), lambda i: (0, 0, 0)),
            pl.BlockSpec((9, 64, 128), lambda i: (0, 0, 0)),
            pl.BlockSpec((1, 128), lambda i: (0, 0)),
            pl.BlockSpec((9, 128, 256), lambda i: (0, 0, 0)),
            pl.BlockSpec((1, 256), lambda i: (0, 0)),
            pl.BlockSpec((256, 200), lambda i: (0, 0)),
            pl.BlockSpec((1, 200), lambda i: (0, 0)),
            pl.BlockSpec((200, 7), lambda i: (0, 0)),
            pl.BlockSpec((1, 7), lambda i: (0, 0)),
        ],
        out_specs=pl.BlockSpec((B, 7), lambda i: (0, 0)),
        compiler_params=pltpu.CompilerParams(
            dimension_semantics=("arbitrary",)),
    )(x5taps, w5t, b5r, w6t, b6r, wh1, bh1, wh2, bh2)

    v = out[:, 0:1]
    alpha = out[:, 1:4]
    beta = out[:, 4:7]
    return (alpha, beta), v


# ---------------------------------------------------------------------------
# Deterministic parameter initialization (mirrors Net.__init__)
# ---------------------------------------------------------------------------
def init_params(key):
    keys = jax.random.split(key, 16 + 2 * len(_CONV_CFG))
    ki = 0
    params = {}

    # Convs: xavier_uniform with gain=sqrt(2) ('relu'), bias = 0.1
    gain = np.sqrt(2.0)
    convs = []
    for (cin, cout, k, _s) in _CONV_CFG:
        fan_in, fan_out = cin * k * k, cout * k * k
        bound = gain * np.sqrt(6.0 / (fan_in + fan_out))
        w = jax.random.uniform(keys[ki], (cout, cin, k, k), jnp.float32, -bound, bound)
        ki += 1
        b = jnp.full((cout,), 0.1, jnp.float32)
        convs.append((w, b))
    params["convs"] = convs

    # Linears: PyTorch default init, stored as (fan_in, fan_out)
    def linear_init(kw_, kb_, fin, fout):
        bound = np.sqrt(1.0 / fin)
        w = jax.random.uniform(kw_, (fin, fout), jnp.float32, -bound, bound)
        b = jax.random.uniform(kb_, (fout,), jnp.float32, -bound, bound)
        return w, b

    params["v1"] = linear_init(keys[ki], keys[ki + 1], 256, 100); ki += 2
    params["v2"] = linear_init(keys[ki], keys[ki + 1], 100, 1); ki += 2
    params["fc"] = linear_init(keys[ki], keys[ki + 1], 256, 100); ki += 2
    params["alpha"] = linear_init(keys[ki], keys[ki + 1], 100, 3); ki += 2
    params["beta"] = linear_init(keys[ki], keys[ki + 1], 100, 3); ki += 2
    return params


# ---------------------------------------------------------------------------
# Forward pass: ((alpha, beta), v)
# ---------------------------------------------------------------------------
def net_forward(params, x):
    # NCHW -> NHWC once; bf16 activations (f32 accumulation inside kernels).
    x = jnp.transpose(x, (0, 2, 3, 1)).astype(jnp.bfloat16)
    for (w, b), (_cin, _cout, _k, s) in zip(params["convs"][:4], _CONV_CFG[:4]):
        x = conv2d_relu_nhwc(x, w, b, s)
    # x is now (B, 5, 5, 64); conv5 + conv6 + heads run in one fused call.
    return _tail_forward(params, x)


if __name__ == "__main__":
    key = jax.random.PRNGKey(0)
    pkey, xkey = jax.random.split(key)
    params = init_params(pkey)

    # The conv stack requires 96x96 input for view(-1, 256) to be valid.
    x = jax.random.normal(xkey, (2, 4, 96, 96), jnp.float32)

    fwd = jax.jit(net_forward)
    (alpha, beta), v = fwd(params, x)
    jax.block_until_ready((alpha, beta, v))

    assert alpha.shape == (2, 3) and beta.shape == (2, 3) and v.shape == (2, 1)
    assert bool(jnp.all(alpha >= 1.0)) and bool(jnp.all(beta >= 1.0))
    print("KERNEL_OK")
</pallas_src>

<mosaic_0001>
module attributes {stable_mosaic.version = 11 : i64} {
  func.func @_mm_bias_relu_kernel(%arg0: i32, %arg1: memref<512x64xbf16, #tpu.memory_space<vmem>>, %arg2: memref<64x128xbf16, #tpu.memory_space<vmem>>, %arg3: memref<1x128xf32, #tpu.memory_space<vmem>>, %arg4: memref<512x128xbf16, #tpu.memory_space<vmem>>) attributes {dimension_semantics = [#tpu.dimension_semantics<parallel>], iteration_bounds = array<i64: 9>, scalar_prefetch = 0 : i64, scratch_operands = 0 : i64, tpu.core_type = #tpu.core_type<tc>, window_params = [{transform_indices = @transform_0, window_bounds = array<i64: 512, 64>}, {pipeline_mode = #tpu.pipeline_mode<synchronous>, transform_indices = @transform_1, window_bounds = array<i64: 64, 128>}, {pipeline_mode = #tpu.pipeline_mode<synchronous>, transform_indices = @transform_2, window_bounds = array<i64: 1, 128>}, {transform_indices = @transform_3, window_bounds = array<i64: 512, 128>}]} {
    %c0 = arith.constant 0 : index
    %c0_0 = arith.constant 0 : index
    %0 = vector.load %arg1[%c0, %c0_0] : memref<512x64xbf16, #tpu.memory_space<vmem>>, vector<512x64xbf16>
    %c0_1 = arith.constant 0 : index
    %c0_2 = arith.constant 0 : index
    %1 = vector.load %arg2[%c0_1, %c0_2] : memref<64x128xbf16, #tpu.memory_space<vmem>>, vector<64x128xbf16>
    %cst = arith.constant dense<0.000000e+00> : vector<512x128xf32>
    %2 = tpu.matmul %0, %1, %cst {dimension_numbers = #tpu.dot_dimension_numbers<[1], [0], [0], [1], [0, 0, 1, 1], [], []>} : vector<512x64xbf16>, vector<64x128xbf16>, vector<512x128xf32> -> vector<512x128xf32>
    %c0_3 = arith.constant 0 : index
    %c0_4 = arith.constant 0 : index
    %3 = vector.load %arg3[%c0_3, %c0_4] : memref<1x128xf32, #tpu.memory_space<vmem>>, vector<1x128xf32>
    %4 = vector.broadcast %3 : vector<1x128xf32> to vector<512x128xf32>
    %5 = arith.addf %2, %4 : vector<512x128xf32>
    %cst_5 = arith.constant 0.000000e+00 : f32
    %6 = vector.broadcast %cst_5 : f32 to vector<512x128xf32>
    %7 = arith.maximumf %5, %6 : vector<512x128xf32>
    %8 = arith.truncf %7 : vector<512x128xf32> to vector<512x128xbf16>
    %c0_6 = arith.constant 0 : index
    %c0_7 = arith.constant 0 : index
    %9 = vector.load %arg4[%c0_6, %c0_7] : memref<512x128xbf16, #tpu.memory_space<vmem>>, vector<512x128xbf16>
    tpu.vector_store %arg4[%c0_6, %c0_7], %8 {strides = array<i32>} : memref<512x128xbf16, #tpu.memory_space<vmem>>, vector<512x128xbf16>,
    return
  }
  func.func @transform_0(%arg0: i32) -> (i32, i32) {
    %c0_i32 = arith.constant 0 : i32
    %c0_i32_0 = arith.constant 0 : i32
    return %arg0, %c0_i32 : i32, i32
  }
  func.func @transform_1(%arg0: i32) -> (i32, i32) {
    %c0_i32 = arith.constant 0 : i32
    %c0_i32_0 = arith.constant 0 : i32
    %c0_i32_1 = arith.constant 0 : i32
    return %c0_i32, %c0_i32_0 : i32, i32
  }
  func.func @transform_2(%arg0: i32) -> (i32, i32) {
    %c0_i32 = arith.constant 0 : i32
    %c0_i32_0 = arith.constant 0 : i32
    %c0_i32_1 = arith.constant 0 : i32
    return %c0_i32, %c0_i32_0 : i32, i32
  }
  func.func @transform_3(%arg0: i32) -> (i32, i32) {
    %c0_i32 = arith.constant 0 : i32
    %c0_i32_0 = arith.constant 0 : i32
    return %arg0, %c0_i32 : i32, i32
  }
}

module attributes {stable_mosaic.version = 11 : i64} {
  func.func @_mm_bias_relu_kernel(%arg0: i32, %arg1: memref<512x72xbf16, #tpu.memory_space<vmem>>, %arg2: memref<72x128xbf16, #tpu.memory_space<vmem>>, %arg3: memref<1x128xf32, #tpu.memory_space<vmem>>, %arg4: memref<512x128xbf16, #tpu.memory_space<vmem>>) attributes {dimension_semantics = [#tpu.dimension_semantics<parallel>], iteration_bounds = array<i64: 3>, scalar_prefetch = 0 : i64, scratch_operands = 0 : i64, tpu.core_type = #tpu.core_type<tc>, window_params = [{transform_indices = @transform_0, window_bounds = array<i64: 512, 72>}, {pipeline_mode = #tpu.pipeline_mode<synchronous>, transform_indices = @transform_1, window_bounds = array<i64: 72, 128>}, {pipeline_mode = #tpu.pipeline_mode<synchronous>, transform_indices = @transform_2, window_bounds = array<i64: 1, 128>}, {transform_indices = @transform_3, window_bounds = array<i64: 512, 128>}]} {
    %c0 = arith.constant 0 : index
    %c0_0 = arith.constant 0 : index
    %0 = vector.load %arg1[%c0, %c0_0] : memref<512x72xbf16, #tpu.memory_space<vmem>>, vector<512x72xbf16>
    %c0_1 = arith.constant 0 : index
    %c0_2 = arith.constant 0 : index
    %1 = vector.load %arg2[%c0_1, %c0_2] : memref<72x128xbf16, #tpu.memory_space<vmem>>, vector<72x128xbf16>
    %cst = arith.constant dense<0.000000e+00> : vector<512x128xf32>
    %2 = tpu.matmul %0, %1, %cst {dimension_numbers = #tpu.dot_dimension_numbers<[1], [0], [0], [1], [0, 0, 1, 1], [], []>} : vector<512x72xbf16>, vector<72x128xbf16>, vector<512x128xf32> -> vector<512x128xf32>
    %c0_3 = arith.constant 0 : index
    %c0_4 = arith.constant 0 : index
    %3 = vector.load %arg3[%c0_3, %c0_4] : memref<1x128xf32, #tpu.memory_space<vmem>>, vector<1x128xf32>
    %4 = vector.broadcast %3 : vector<1x128xf32> to vector<512x128xf32>
    %5 = arith.addf %2, %4 : vector<512x128xf32>
    %cst_5 = arith.constant 0.000000e+00 : f32
    %6 = vector.broadcast %cst_5 : f32 to vector<512x128xf32>
    %7 = arith.maximumf %5, %6 : vector<512x128xf32>
    %8 = arith.truncf %7 : vector<512x128xf32> to vector<512x128xbf16>
    %c0_6 = arith.constant 0 : index
    %c0_7 = arith.constant 0 : index
    %9 = vector.load %arg4[%c0_6, %c0_7] : memref<512x128xbf16, #tpu.memory_space<vmem>>, vector<512x128xbf16>
    tpu.vector_store %arg4[%c0_6, %c0_7], %8 {strides = array<i32>} : memref<512x128xbf16, #tpu.memory_space<vmem>>, vector<512x128xbf16>,
    return
  }
  func.func @transform_0(%arg0: i32) -> (i32, i32) {
    %c0_i32 = arith.constant 0 : i32
    %c0_i32_0 = arith.constant 0 : i32
    return %arg0, %c0_i32 : i32, i32
  }
  func.func @transform_1(%arg0: i32) -> (i32, i32) {
    %c0_i32 = arith.constant 0 : i32
    %c0_i32_0 = arith.constant 0 : i32
    %c0_i32_1 = arith.constant 0 : i32
    return %c0_i32, %c0_i32_0 : i32, i32
  }
  func.func @transform_2(%arg0: i32) -> (i32, i32) {
    %c0_i32 = arith.constant 0 : i32
    %c0_i32_0 = arith.constant 0 : i32
    %c0_i32_1 = arith.constant 0 : i32
    return %c0_i32, %c0_i32_0 : i32, i32
  }
  func.func @transform_3(%arg0: i32) -> (i32, i32) {
    %c0_i32 = arith.constant 0 : i32
    %c0_i32_0 = arith.constant 0 : i32
    return %arg0, %c0_i32 : i32, i32
  }
}

module attributes {stable_mosaic.version = 11 : i64} {
  func.func @_mm_bias_relu_kernel(%arg0: i32, %arg1: memref<256x144xbf16, #tpu.memory_space<vmem>>, %arg2: memref<144x128xbf16, #tpu.memory_space<vmem>>, %arg3: memref<1x128xf32, #tpu.memory_space<vmem>>, %arg4: memref<256x128xbf16, #tpu.memory_space<vmem>>) attributes {dimension_semantics = [#tpu.dimension_semantics<parallel>], iteration_bounds = array<i64: 1>, scalar_prefetch = 0 : i64, scratch_operands = 0 : i64, tpu.core_type = #tpu.core_type<tc>, window_params = [{transform_indices = @transform_0, window_bounds = array<i64: 256, 144>}, {pipeline_mode = #tpu.pipeline_mode<synchronous>, transform_indices = @transform_1, window_bounds = array<i64: 144, 128>}, {pipeline_mode = #tpu.pipeline_mode<synchronous>, transform_indices = @transform_2, window_bounds = array<i64: 1, 128>}, {transform_indices = @transform_3, window_bounds = array<i64: 256, 128>}]} {
    %c0 = arith.constant 0 : index
    %c0_0 = arith.constant 0 : index
    %0 = vector.load %arg1[%c0, %c0_0] : memref<256x144xbf16, #tpu.memory_space<vmem>>, vector<256x144xbf16>
    %c0_1 = arith.constant 0 : index
    %c0_2 = arith.constant 0 : index
    %1 = vector.load %arg2[%c0_1, %c0_2] : memref<144x128xbf16, #tpu.memory_space<vmem>>, vector<144x128xbf16>
    %cst = arith.constant dense<0.000000e+00> : vector<256x128xf32>
    %2 = tpu.matmul %0, %1, %cst {dimension_numbers = #tpu.dot_dimension_numbers<[1], [0], [0], [1], [0, 0, 1, 1], [], []>} : vector<256x144xbf16>, vector<144x128xbf16>, vector<256x128xf32> -> vector<256x128xf32>
    %c0_3 = arith.constant 0 : index
    %c0_4 = arith.constant 0 : index
    %3 = vector.load %arg3[%c0_3, %c0_4] : memref<1x128xf32, #tpu.memory_space<vmem>>, vector<1x128xf32>
    %4 = vector.broadcast %3 : vector<1x128xf32> to vector<256x128xf32>
    %5 = arith.addf %2, %4 : vector<256x128xf32>
    %cst_5 = arith.constant 0.000000e+00 : f32
    %6 = vector.broadcast %cst_5 : f32 to vector<256x128xf32>
    %7 = arith.maximumf %5, %6 : vector<256x128xf32>
    %8 = arith.truncf %7 : vector<256x128xf32> to vector<256x128xbf16>
    %c0_6 = arith.constant 0 : index
    %c0_7 = arith.constant 0 : index
    %9 = vector.load %arg4[%c0_6, %c0_7] : memref<256x128xbf16, #tpu.memory_space<vmem>>, vector<256x128xbf16>
    tpu.vector_store %arg4[%c0_6, %c0_7], %8 {strides = array<i32>} : memref<256x128xbf16, #tpu.memory_space<vmem>>, vector<256x128xbf16>,
    return
  }
  func.func @transform_0(%arg0: i32) -> (i32, i32) {
    %c0_i32 = arith.constant 0 : i32
    %c0_i32_0 = arith.constant 0 : i32
    return %arg0, %c0_i32 : i32, i32
  }
  func.func @transform_1(%arg0: i32) -> (i32, i32) {
    %c0_i32 = arith.constant 0 : i32
    %c0_i32_0 = arith.constant 0 : i32
    %c0_i32_1 = arith.constant 0 : i32
    return %c0_i32, %c0_i32_0 : i32, i32
  }
  func.func @transform_2(%arg0: i32) -> (i32, i32) {
    %c0_i32 = arith.constant 0 : i32
    %c0_i32_0 = arith.constant 0 : i32
    %c0_i32_1 = arith.constant 0 : i32
    return %c0_i32, %c0_i32_0 : i32, i32
  }
  func.func @transform_3(%arg0: i32) -> (i32, i32) {
    %c0_i32 = arith.constant 0 : i32
    %c0_i32_0 = arith.constant 0 : i32
    return %arg0, %c0_i32 : i32, i32
  }
}

module attributes {stable_mosaic.version = 11 : i64} {
  func.func @_mm_bias_relu_kernel(%arg0: i32, %arg1: memref<64x288xbf16, #tpu.memory_space<vmem>>, %arg2: memref<288x128xbf16, #tpu.memory_space<vmem>>, %arg3: memref<1x128xf32, #tpu.memory_space<vmem>>, %arg4: memref<64x128xbf16, #tpu.memory_space<vmem>>) attributes {dimension_semantics = [#tpu.dimension_semantics<parallel>], iteration_bounds = array<i64: 1>, scalar_prefetch = 0 : i64, scratch_operands = 0 : i64, tpu.core_type = #tpu.core_type<tc>, window_params = [{transform_indices = @transform_0, window_bounds = array<i64: 64, 288>}, {pipeline_mode = #tpu.pipeline_mode<synchronous>, transform_indices = @transform_1, window_bounds = array<i64: 288, 128>}, {pipeline_mode = #tpu.pipeline_mode<synchronous>, transform_indices = @transform_2, window_bounds = array<i64: 1, 128>}, {transform_indices = @transform_3, window_bounds = array<i64: 64, 128>}]} {
    %c0 = arith.constant 0 : index
    %c0_0 = arith.constant 0 : index
    %0 = vector.load %arg1[%c0, %c0_0] : memref<64x288xbf16, #tpu.memory_space<vmem>>, vector<64x288xbf16>
    %c0_1 = arith.constant 0 : index
    %c0_2 = arith.constant 0 : index
    %1 = vector.load %arg2[%c0_1, %c0_2] : memref<288x128xbf16, #tpu.memory_space<vmem>>, vector<288x128xbf16>
    %cst = arith.constant dense<0.000000e+00> : vector<64x128xf32>
    %2 = tpu.matmul %0, %1, %cst {dimension_numbers = #tpu.dot_dimension_numbers<[1], [0], [0], [1], [0, 0, 1, 1], [], []>} : vector<64x288xbf16>, vector<288x128xbf16>, vector<64x128xf32> -> vector<64x128xf32>
    %c0_3 = arith.constant 0 : index
    %c0_4 = arith.constant 0 : index
    %3 = vector.load %arg3[%c0_3, %c0_4] : memref<1x128xf32, #tpu.memory_space<vmem>>, vector<1x128xf32>
    %4 = vector.broadcast %3 : vector<1x128xf32> to vector<64x128xf32>
    %5 = arith.addf %2, %4 : vector<64x128xf32>
    %cst_5 = arith.constant 0.000000e+00 : f32
    %6 = vector.broadcast %cst_5 : f32 to vector<64x128xf32>
    %7 = arith.maximumf %5, %6 : vector<64x128xf32>
    %8 = arith.truncf %7 : vector<64x128xf32> to vector<64x128xbf16>
    %c0_6 = arith.constant 0 : index
    %c0_7 = arith.constant 0 : index
    %9 = vector.load %arg4[%c0_6, %c0_7] : memref<64x128xbf16, #tpu.memory_space<vmem>>, vector<64x128xbf16>
    tpu.vector_store %arg4[%c0_6, %c0_7], %8 {strides = array<i32>} : memref<64x128xbf16, #tpu.memory_space<vmem>>, vector<64x128xbf16>,
    return
  }
  func.func @transform_0(%arg0: i32) -> (i32, i32) {
    %c0_i32 = arith.constant 0 : i32
    %c0_i32_0 = arith.constant 0 : i32
    return %arg0, %c0_i32 : i32, i32
  }
  func.func @transform_1(%arg0: i32) -> (i32, i32) {
    %c0_i32 = arith.constant 0 : i32
    %c0_i32_0 = arith.constant 0 : i32
    %c0_i32_1 = arith.constant 0 : i32
    return %c0_i32, %c0_i32_0 : i32, i32
  }
  func.func @transform_2(%arg0: i32) -> (i32, i32) {
    %c0_i32 = arith.constant 0 : i32
    %c0_i32_0 = arith.constant 0 : i32
    %c0_i32_1 = arith.constant 0 : i32
    return %c0_i32, %c0_i32_0 : i32, i32
  }
  func.func @transform_3(%arg0: i32) -> (i32, i32) {
    %c0_i32 = arith.constant 0 : i32
    %c0_i32_0 = arith.constant 0 : i32
    return %arg0, %c0_i32 : i32, i32
  }
}

module attributes {stable_mosaic.version = 11 : i64} {
  func.func @_tail_kernel(%arg0: i32, %arg1: memref<9x18x64xbf16, #tpu.memory_space<vmem>>, %arg2: memref<9x64x128xbf16, #tpu.memory_space<vmem>>, %arg3: memref<1x128xf32, #tpu.memory_space<vmem>>, %arg4: memref<9x128x256xbf16, #tpu.memory_space<vmem>>, %arg5: memref<1x256xf32, #tpu.memory_space<vmem>>, %arg6: memref<256x200xbf16, #tpu.memory_space<vmem>>, %arg7: memref<1x200xf32, #tpu.memory_space<vmem>>, %arg8: memref<200x7xbf16, #tpu.memory_space<vmem>>, %arg9: memref<1x7xf32, #tpu.memory_space<vmem>>, %arg10: memref<2x7xf32, #tpu.memory_space<vmem>>) attributes {dimension_semantics = [#tpu.dimension_semantics<arbitrary>], iteration_bounds = array<i64: 1>, scalar_prefetch = 0 : i64, scratch_operands = 0 : i64, tpu.core_type = #tpu.core_type<tc>, window_params = [{pipeline_mode = #tpu.pipeline_mode<synchronous>, transform_indices = @transform_0, window_bounds = array<i64: 9, 18, 64>}, {pipeline_mode = #tpu.pipeline_mode<synchronous>, transform_indices = @transform_1, window_bounds = array<i64: 9, 64, 128>}, {pipeline_mode = #tpu.pipeline_mode<synchronous>, transform_indices = @transform_2, window_bounds = array<i64: 1, 128>}, {pipeline_mode = #tpu.pipeline_mode<synchronous>, transform_indices = @transform_3, window_bounds = array<i64: 9, 128, 256>}, {pipeline_mode = #tpu.pipeline_mode<synchronous>, transform_indices = @transform_4, window_bounds = array<i64: 1, 256>}, {pipeline_mode = #tpu.pipeline_mode<synchronous>, transform_indices = @transform_5, window_bounds = array<i64: 256, 200>}, {pipeline_mode = #tpu.pipeline_mode<synchronous>, transform_indices = @transform_6, window_bounds = array<i64: 1, 200>}, {pipeline_mode = #tpu.pipeline_mode<synchronous>, transform_indices = @transform_7, window_bounds = array<i64: 200, 7>}, {pipeline_mode = #tpu.pipeline_mode<synchronous>, transform_indices = @transform_8, window_bounds = array<i64: 1, 7>}, {pipeline_mode = #tpu.pipeline_mode<synchronous>, transform_indices = @transform_9, window_bounds = array<i64: 2, 7>}]} {
    %cst = arith.constant 0.000000e+00 : f32
    %0 = vector.broadcast %cst : f32 to vector<18x128xf32>
    %c0 = arith.constant 0 : index
    %c0_0 = arith.constant 0 : index
    %c0_1 = arith.constant 0 : index
    %1 = vector.load %arg1[%c0, %c0_0, %c0_1] : memref<9x18x64xbf16, #tpu.memory_space<vmem>>, vector<1x18x64xbf16>
    %2 = vector.shape_cast %1 : vector<1x18x64xbf16> to vector<18x64xbf16>
    %c0_2 = arith.constant 0 : index
    %c0_3 = arith.constant 0 : index
    %c0_4 = arith.constant 0 : index
    %3 = vector.load %arg2[%c0_2, %c0_3, %c0_4] : memref<9x64x128xbf16, #tpu.memory_space<vmem>>, vector<1x64x128xbf16>
    %4 = vector.shape_cast %3 : vector<1x64x128xbf16> to vector<64x128xbf16>
    %cst_5 = arith.constant dense<0.000000e+00> : vector<18x128xf32>
    %5 = tpu.matmul %2, %4, %cst_5 {dimension_numbers = #tpu.dot_dimension_numbers<[1], [0], [0], [1], [0, 0, 1, 1], [], []>} : vector<18x64xbf16>, vector<64x128xbf16>, vector<18x128xf32> -> vector<18x128xf32>
    %6 = arith.addf %0, %5 : vector<18x128xf32>
    %c1 = arith.constant 1 : index
    %c0_6 = arith.constant 0 : index
    %c0_7 = arith.constant 0 : index
    %7 = vector.load %arg1[%c1, %c0_6, %c0_7] : memref<9x18x64xbf16, #tpu.memory_space<vmem>>, vector<1x18x64xbf16>
    %8 = vector.shape_cast %7 : vector<1x18x64xbf16> to vector<18x64xbf16>
    %c1_8 = arith.constant 1 : index
    %c0_9 = arith.constant 0 : index
    %c0_10 = arith.constant 0 : index
    %9 = vector.load %arg2[%c1_8, %c0_9, %c0_10] : memref<9x64x128xbf16, #tpu.memory_space<vmem>>, vector<1x64x128xbf16>
    %10 = vector.shape_cast %9 : vector<1x64x128xbf16> to vector<64x128xbf16>
    %cst_11 = arith.constant dense<0.000000e+00> : vector<18x128xf32>
    %11 = tpu.matmul %8, %10, %cst_11 {dimension_numbers = #tpu.dot_dimension_numbers<[1], [0], [0], [1], [0, 0, 1, 1], [], []>} : vector<18x64xbf16>, vector<64x128xbf16>, vector<18x128xf32> -> vector<18x128xf32>
    %12 = arith.addf %6, %11 : vector<18x128xf32>
    %c2 = arith.constant 2 : index
    %c0_12 = arith.constant 0 : index
    %c0_13 = arith.constant 0 : index
    %13 = vector.load %arg1[%c2, %c0_12, %c0_13] : memref<9x18x64xbf16, #tpu.memory_space<vmem>>, vector<1x18x64xbf16>
    %14 = vector.shape_cast %13 : vector<1x18x64xbf16> to vector<18x64xbf16>
    %c2_14 = arith.constant 2 : index
    %c0_15 = arith.constant 0 : index
    %c0_16 = arith.constant 0 : index
    %15 = vector.load %arg2[%c2_14, %c0_15, %c0_16] : memref<9x64x128xbf16, #tpu.memory_space<vmem>>, vector<1x64x128xbf16>
    %16 = vector.shape_cast %15 : vector<1x64x128xbf16> to vector<64x128xbf16>
    %cst_17 = arith.constant dense<0.000000e+00> : vector<18x128xf32>
    %17 = tpu.matmul %14, %16, %cst_17 {dimension_numbers = #tpu.dot_dimension_numbers<[1], [0], [0], [1], [0, 0, 1, 1], [], []>} : vector<18x64xbf16>, vector<64x128xbf16>, vector<18x128xf32> -> vector<18x128xf32>
    %18 = arith.addf %12, %17 : vector<18x128xf32>
    %c3 = arith.constant 3 : index
    %c0_18 = arith.constant 0 : index
    %c0_19 = arith.constant 0 : index
    %19 = vector.load %arg1[%c3, %c0_18, %c0_19] : memref<9x18x64xbf16, #tpu.memory_space<vmem>>, vector<1x18x64xbf16>
    %20 = vector.shape_cast %19 : vector<1x18x64xbf16> to vector<18x64xbf16>
    %c3_20 = arith.constant 3 : index
    %c0_21 = arith.constant 0 : index
    %c0_22 = arith.constant 0 : index
    %21 = vector.load %arg2[%c3_20, %c0_21, %c0_22] : memref<9x64x128xbf16, #tpu.memory_space<vmem>>, vector<1x64x128xbf16>
    %22 = vector.shape_cast %21 : vector<1x64x128xbf16> to vector<64x128xbf16>
    %cst_23 = arith.constant dense<0.000000e+00> : vector<18x128xf32>
    %23 = tpu.matmul %20, %22, %cst_23 {dimension_numbers = #tpu.dot_dimension_numbers<[1], [0], [0], [1], [0, 0, 1, 1], [], []>} : vector<18x64xbf16>, vector<64x128xbf16>, vector<18x128xf32> -> vector<18x128xf32>
    %24 = arith.addf %18, %23 : vector<18x128xf32>
    %c4 = arith.constant 4 : index
    %c0_24 = arith.constant 0 : index
    %c0_25 = arith.constant 0 : index
    %25 = vector.load %arg1[%c4, %c0_24, %c0_25] : memref<9x18x64xbf16, #tpu.memory_space<vmem>>, vector<1x18x64xbf16>
    %26 = vector.shape_cast %25 : vector<1x18x64xbf16> to vector<18x64xbf16>
    %c4_26 = arith.constant 4 : index
    %c0_27 = arith.constant 0 : index
    %c0_28 = arith.constant 0 : index
    %27 = vector.load %arg2[%c4_26, %c0_27, %c0_28] : memref<9x64x128xbf16, #tpu.memory_space<vmem>>, vector<1x64x128xbf16>
    %28 = vector.shape_cast %27 : vector<1x64x128xbf16> to vector<64x128xbf16>
    %cst_29 = arith.constant dense<0.000000e+00> : vector<18x128xf32>
    %29 = tpu.matmul %26, %28, %cst_29 {dimension_numbers = #tpu.dot_dimension_numbers<[1], [0], [0], [1], [0, 0, 1, 1], [], []>} : vector<18x64xbf16>, vector<64x128xbf16>, vector<18x128xf32> -> vector<18x128xf32>
    %30 = arith.addf %24, %29 : vector<18x128xf32>
    %c5 = arith.constant 5 : index
    %c0_30 = arith.constant 0 : index
    %c0_31 = arith.constant 0 : index
    %31 = vector.load %arg1[%c5, %c0_30, %c0_31] : memref<9x18x64xbf16, #tpu.memory_space<vmem>>, vector<1x18x64xbf16>
    %32 = vector.shape_cast %31 : vector<1x18x64xbf16> to vector<18x64xbf16>
    %c5_32 = arith.constant 5 : index
    %c0_33 = arith.constant 0 : index
    %c0_34 = arith.constant 0 : index
    %33 = vector.load %arg2[%c5_32, %c0_33, %c0_34] : memref<9x64x128xbf16, #tpu.memory_space<vmem>>, vector<1x64x128xbf16>
    %34 = vector.shape_cast %33 : vector<1x64x128xbf16> to vector<64x128xbf16>
    %cst_35 = arith.constant dense<0.000000e+00> : vector<18x128xf32>
    %35 = tpu.matmul %32, %34, %cst_35 {dimension_numbers = #tpu.dot_dimension_numbers<[1], [0], [0], [1], [0, 0, 1, 1], [], []>} : vector<18x64xbf16>, vector<64x128xbf16>, vector<18x128xf32> -> vector<18x128xf32>
    %36 = arith.addf %30, %35 : vector<18x128xf32>
    %c6 = arith.constant 6 : index
    %c0_36 = arith.constant 0 : index
    %c0_37 = arith.constant 0 : index
    %37 = vector.load %arg1[%c6, %c0_36, %c0_37] : memref<9x18x64xbf16, #tpu.memory_space<vmem>>, vector<1x18x64xbf16>
    %38 = vector.shape_cast %37 : vector<1x18x64xbf16> to vector<18x64xbf16>
    %c6_38 = arith.constant 6 : index
    %c0_39 = arith.constant 0 : index
    %c0_40 = arith.constant 0 : index
    %39 = vector.load %arg2[%c6_38, %c0_39, %c0_40] : memref<9x64x128xbf16, #tpu.memory_space<vmem>>, vector<1x64x128xbf16>
    %40 = vector.shape_cast %39 : vector<1x64x128xbf16> to vector<64x128xbf16>
    %cst_41 = arith.constant dense<0.000000e+00> : vector<18x128xf32>
    %41 = tpu.matmul %38, %40, %cst_41 {dimension_numbers = #tpu.dot_dimension_numbers<[1], [0], [0], [1], [0, 0, 1, 1], [], []>} : vector<18x64xbf16>, vector<64x128xbf16>, vector<18x128xf32> -> vector<18x128xf32>
    %42 = arith.addf %36, %41 : vector<18x128xf32>
    %c7 = arith.constant 7 : index
    %c0_42 = arith.constant 0 : index
    %c0_43 = arith.constant 0 : index
    %43 = vector.load %arg1[%c7, %c0_42, %c0_43] : memref<9x18x64xbf16, #tpu.memory_space<vmem>>, vector<1x18x64xbf16>
    %44 = vector.shape_cast %43 : vector<1x18x64xbf16> to vector<18x64xbf16>
    %c7_44 = arith.constant 7 : index
    %c0_45 = arith.constant 0 : index
    %c0_46 = arith.constant 0 : index
    %45 = vector.load %arg2[%c7_44, %c0_45, %c0_46] : memref<9x64x128xbf16, #tpu.memory_space<vmem>>, vector<1x64x128xbf16>
    %46 = vector.shape_cast %45 : vector<1x64x128xbf16> to vector<64x128xbf16>
    %cst_47 = arith.constant dense<0.000000e+00> : vector<18x128xf32>
    %47 = tpu.matmul %44, %46, %cst_47 {dimension_numbers = #tpu.dot_dimension_numbers<[1], [0], [0], [1], [0, 0, 1, 1], [], []>} : vector<18x64xbf16>, vector<64x128xbf16>, vector<18x128xf32> -> vector<18x128xf32>
    %48 = arith.addf %42, %47 : vector<18x128xf32>
    %c8 = arith.constant 8 : index
    %c0_48 = arith.constant 0 : index
    %c0_49 = arith.constant 0 : index
    %49 = vector.load %arg1[%c8, %c0_48, %c0_49] : memref<9x18x64xbf16, #tpu.memory_space<vmem>>, vector<1x18x64xbf16>
    %50 = vector.shape_cast %49 : vector<1x18x64xbf16> to vector<18x64xbf16>
    %c8_50 = arith.constant 8 : index
    %c0_51 = arith.constant 0 : index
    %c0_52 = arith.constant 0 : index
    %51 = vector.load %arg2[%c8_50, %c0_51, %c0_52] : memref<9x64x128xbf16, #tpu.memory_space<vmem>>, vector<1x64x128xbf16>
    %52 = vector.shape_cast %51 : vector<1x64x128xbf16> to vector<64x128xbf16>
    %cst_53 = arith.constant dense<0.000000e+00> : vector<18x128xf32>
    %53 = tpu.matmul %50, %52, %cst_53 {dimension_numbers = #tpu.dot_dimension_numbers<[1], [0], [0], [1], [0, 0, 1, 1], [], []>} : vector<18x64xbf16>, vector<64x128xbf16>, vector<18x128xf32> -> vector<18x128xf32>
    %54 = arith.addf %48, %53 : vector<18x128xf32>
    %c0_54 = arith.constant 0 : index
    %c0_55 = arith.constant 0 : index
    %55 = vector.load %arg3[%c0_54, %c0_55] : memref<1x128xf32, #tpu.memory_space<vmem>>, vector<1x128xf32>
    %56 = vector.broadcast %55 : vector<1x128xf32> to vector<18x128xf32>
    %57 = arith.addf %54, %56 : vector<18x128xf32>
    %cst_56 = arith.constant 0.000000e+00 : f32
    %58 = vector.broadcast %cst_56 : f32 to vector<18x128xf32>
    %59 = arith.maximumf %57, %58 : vector<18x128xf32>
    %60 = arith.truncf %59 : vector<18x128xf32> to vector<18x128xbf16>
    %cst_57 = arith.constant 0.000000e+00 : f32
    %61 = vector.broadcast %cst_57 : f32 to vector<2x256xf32>
    %62 = vector.extract_strided_slice %60 {offsets = [0, 0], sizes = [2, 128], strides = [1, 1]} : vector<18x128xbf16> to vector<2x128xbf16>
    %c0_58 = arith.constant 0 : index
    %c0_59 = arith.constant 0 : index
    %c0_60 = arith.constant 0 : index
    %63 = vector.load %arg4[%c0_58, %c0_59, %c0_60] : memref<9x128x256xbf16, #tpu.memory_space<vmem>>, vector<1x128x256xbf16>
    %64 = vector.shape_cast %63 : vector<1x128x256xbf16> to vector<128x256xbf16>
    %cst_61 = arith.constant dense<0.000000e+00> : vector<2x256xf32>
    %65 = tpu.matmul %62, %64, %cst_61 {dimension_numbers = #tpu.dot_dimension_numbers<[1], [0], [0], [1], [0, 0, 1, 1], [], []>} : vector<2x128xbf16>, vector<128x256xbf16>, vector<2x256xf32> -> vector<2x256xf32>
    %66 = arith.addf %61, %65 : vector<2x256xf32>
    %67 = vector.extract_strided_slice %60 {offsets = [2, 0], sizes = [2, 128], strides = [1, 1]} : vector<18x128xbf16> to vector<2x128xbf16>
    %c1_62 = arith.constant 1 : index
    %c0_63 = arith.constant 0 : index
    %c0_64 = arith.constant 0 : index
    %68 = vector.load %arg4[%c1_62, %c0_63, %c0_64] : memref<9x128x256xbf16, #tpu.memory_space<vmem>>, vector<1x128x256xbf16>
    %69 = vector.shape_cast %68 : vector<1x128x256xbf16> to vector<128x256xbf16>
    %cst_65 = arith.constant dense<0.000000e+00> : vector<2x256xf32>
    %70 = tpu.matmul %67, %69, %cst_65 {dimension_numbers = #tpu.dot_dimension_numbers<[1], [0], [0], [1], [0, 0, 1, 1], [], []>} : vector<2x128xbf16>, vector<128x256xbf16>, vector<2x256xf32> -> vector<2x256xf32>
    %71 = arith.addf %66, %70 : vector<2x256xf32>
    %72 = vector.extract_strided_slice %60 {offsets = [4, 0], sizes = [2, 128], strides = [1, 1]} : vector<18x128xbf16> to vector<2x128xbf16>
    %c2_66 = arith.constant 2 : index
    %c0_67 = arith.constant 0 : index
    %c0_68 = arith.constant 0 : index
    %73 = vector.load %arg4[%c2_66, %c0_67, %c0_68] : memref<9x128x256xbf16, #tpu.memory_space<vmem>>, vector<1x128x256xbf16>
    %74 = vector.shape_cast %73 : vector<1x128x256xbf16> to vector<128x256xbf16>
    %cst_69 = arith.constant dense<0.000000e+00> : vector<2x256xf32>
    %75 = tpu.matmul %72, %74, %cst_69 {dimension_numbers = #tpu.dot_dimension_numbers<[1], [0], [0], [1], [0, 0, 1, 1], [], []>} : vector<2x128xbf16>, vector<128x256xbf16>, vector<2x256xf32> -> vector<2x256xf32>
    %76 = arith.addf %71, %75 : vector<2x256xf32>
    %77 = vector.extract_strided_slice %60 {offsets = [6, 0], sizes = [2, 128], strides = [1, 1]} : vector<18x128xbf16> to vector<2x128xbf16>
    %c3_70 = arith.constant 3 : index
    %c0_71 = arith.constant 0 : index
    %c0_72 = arith.constant 0 : index
    %78 = vector.load %arg4[%c3_70, %c0_71, %c0_72] : memref<9x128x256xbf16, #tpu.memory_space<vmem>>, vector<1x128x256xbf16>
    %79 = vector.shape_cast %78 : vector<1x128x256xbf16> to vector<128x256xbf16>
    %cst_73 = arith.constant dense<0.000000e+00> : vector<2x256xf32>
    %80 = tpu.matmul %77, %79, %cst_73 {dimension_numbers = #tpu.dot_dimension_numbers<[1], [0], [0], [1], [0, 0, 1, 1], [], []>} : vector<2x128xbf16>, vector<128x256xbf16>, vector<2x256xf32> -> vector<2x256xf32>
    %81 = arith.addf %76, %80 : vector<2x256xf32>
    %82 = vector.extract_strided_slice %60 {offsets = [8, 0], sizes = [2, 128], strides = [1, 1]} : vector<18x128xbf16> to vector<2x128xbf16>
    %c4_74 = arith.constant 4 : index
    %c0_75 = arith.constant 0 : index
    %c0_76 = arith.constant 0 : index
    %83 = vector.load %arg4[%c4_74, %c0_75, %c0_76] : memref<9x128x256xbf16, #tpu.memory_space<vmem>>, vector<1x128x256xbf16>
    %84 = vector.shape_cast %83 : vector<1x128x256xbf16> to vector<128x256xbf16>
    %cst_77 = arith.constant dense<0.000000e+00> : vector<2x256xf32>
    %85 = tpu.matmul %82, %84, %cst_77 {dimension_numbers = #tpu.dot_dimension_numbers<[1], [0], [0], [1], [0, 0, 1, 1], [], []>} : vector<2x128xbf16>, vector<128x256xbf16>, vector<2x256xf32> -> vector<2x256xf32>
    %86 = arith.addf %81, %85 : vector<2x256xf32>
    %87 = vector.extract_strided_slice %60 {offsets = [10, 0], sizes = [2, 128], strides = [1, 1]} : vector<18x128xbf16> to vector<2x128xbf16>
    %c5_78 = arith.constant 5 : index
    %c0_79 = arith.constant 0 : index
    %c0_80 = arith.constant 0 : index
    %88 = vector.load %arg4[%c5_78, %c0_79, %c0_80] : memref<9x128x256xbf16, #tpu.memory_space<vmem>>, vector<1x128x256xbf16>
    %89 = vector.shape_cast %88 : vector<1x128x256xbf16> to vector<128x256xbf16>
    %cst_81 = arith.constant dense<0.000000e+00> : vector<2x256xf32>
    %90 = tpu.matmul %87, %89, %cst_81 {dimension_numbers = #tpu.dot_dimension_numbers<[1], [0], [0], [1], [0, 0, 1, 1], [], []>} : vector<2x128xbf16>, vector<128x256xbf16>, vector<2x256xf32> -> vector<2x256xf32>
    %91 = arith.addf %86, %90 : vector<2x256xf32>
    %92 = vector.extract_strided_slice %60 {offsets = [12, 0], sizes = [2, 128], strides = [1, 1]} : vector<18x128xbf16> to vector<2x128xbf16>
    %c6_82 = arith.constant 6 : index
    %c0_83 = arith.constant 0 : index
    %c0_84 = arith.constant 0 : index
    %93 = vector.load %arg4[%c6_82, %c0_83, %c0_84] : memref<9x128x256xbf16, #tpu.memory_space<vmem>>, vector<1x128x256xbf16>
    %94 = vector.shape_cast %93 : vector<1x128x256xbf16> to vector<128x256xbf16>
    %cst_85 = arith.constant dense<0.000000e+00> : vector<2x256xf32>
    %95 = tpu.matmul %92, %94, %cst_85 {dimension_numbers = #tpu.dot_dimension_numbers<[1], [0], [0], [1], [0, 0, 1, 1], [], []>} : vector<2x128xbf16>, vector<128x256xbf16>, vector<2x256xf32> -> vector<2x256xf32>
    %96 = arith.addf %91, %95 : vector<2x256xf32>
    %97 = vector.extract_strided_slice %60 {offsets = [14, 0], sizes = [2, 128], strides = [1, 1]} : vector<18x128xbf16> to vector<2x128xbf16>
    %c7_86 = arith.constant 7 : index
    %c0_87 = arith.constant 0 : index
    %c0_88 = arith.constant 0 : index
    %98 = vector.load %arg4[%c7_86, %c0_87, %c0_88] : memref<9x128x256xbf16, #tpu.memory_space<vmem>>, vector<1x128x256xbf16>
    %99 = vector.shape_cast %98 : vector<1x128x256xbf16> to vector<128x256xbf16>
    %cst_89 = arith.constant dense<0.000000e+00> : vector<2x256xf32>
    %100 = tpu.matmul %97, %99, %cst_89 {dimension_numbers = #tpu.dot_dimension_numbers<[1], [0], [0], [1], [0, 0, 1, 1], [], []>} : vector<2x128xbf16>, vector<128x256xbf16>, vector<2x256xf32> -> vector<2x256xf32>
    %101 = arith.addf %96, %100 : vector<2x256xf32>
    %102 = vector.extract_strided_slice %60 {offsets = [16, 0], sizes = [2, 128], strides = [1, 1]} : vector<18x128xbf16> to vector<2x128xbf16>
    %c8_90 = arith.constant 8 : index
    %c0_91 = arith.constant 0 : index
    %c0_92 = arith.constant 0 : index
    %103 = vector.load %arg4[%c8_90, %c0_91, %c0_92] : memref<9x128x256xbf16, #tpu.memory_space<vmem>>, vector<1x128x256xbf16>
    %104 = vector.shape_cast %103 : vector<1x128x256xbf16> to vector<128x256xbf16>
    %cst_93 = arith.constant dense<0.000000e+00> : vector<2x256xf32>
    %105 = tpu.matmul %102, %104, %cst_93 {dimension_numbers = #tpu.dot_dimension_numbers<[1], [0], [0], [1], [0, 0, 1, 1], [], []>} : vector<2x128xbf16>, vector<128x256xbf16>, vector<2x256xf32> -> vector<2x256xf32>
    %106 = arith.addf %101, %105 : vector<2x256xf32>
    %c0_94 = arith.constant 0 : index
    %c0_95 = arith.constant 0 : index
    %107 = vector.load %arg5[%c0_94, %c0_95] : memref<1x256xf32, #tpu.memory_space<vmem>>, vector<1x256xf32>
    %108 = vector.broadcast %107 : vector<1x256xf32> to vector<2x256xf32>
    %109 = arith.addf %106, %108 : vector<2x256xf32>
    %cst_96 = arith.constant 0.000000e+00 : f32
    %110 = vector.broadcast %cst_96 : f32 to vector<2x256xf32>
    %111 = arith.maximumf %109, %110 : vector<2x256xf32>
    %112 = arith.truncf %111 : vector<2x256xf32> to vector<2x256xbf16>
    %c0_97 = arith.constant 0 : index
    %c0_98 = arith.constant 0 : index
    %113 = vector.load %arg6[%c0_97, %c0_98] : memref<256x200xbf16, #tpu.memory_space<vmem>>, vector<256x200xbf16>
    %cst_99 = arith.constant dense<0.000000e+00> : vector<2x200xf32>
    %114 = tpu.matmul %112, %113, %cst_99 {dimension_numbers = #tpu.dot_dimension_numbers<[1], [0], [0], [1], [0, 0, 1, 1], [], []>} : vector<2x256xbf16>, vector<256x200xbf16>, vector<2x200xf32> -> vector<2x200xf32>
    %c0_100 = arith.constant 0 : index
    %c0_101 = arith.constant 0 : index
    %115 = vector.load %arg7[%c0_100, %c0_101] : memref<1x200xf32, #tpu.memory_space<vmem>>, vector<1x200xf32>
    %116 = vector.broadcast %115 : vector<1x200xf32> to vector<2x200xf32>
    %117 = arith.addf %114, %116 : vector<2x200xf32>
    %cst_102 = arith.constant 0.000000e+00 : f32
    %118 = vector.broadcast %cst_102 : f32 to vector<2x200xf32>
    %119 = arith.maximumf %117, %118 : vector<2x200xf32>
    %120 = arith.truncf %119 : vector<2x200xf32> to vector<2x200xbf16>
    %c0_103 = arith.constant 0 : index
    %c0_104 = arith.constant 0 : index
    %121 = vector.load %arg8[%c0_103, %c0_104] : memref<200x7xbf16, #tpu.memory_space<vmem>>, vector<200x7xbf16>
    %cst_105 = arith.constant dense<0.000000e+00> : vector<2x7xf32>
    %122 = tpu.matmul %120, %121, %cst_105 {dimension_numbers = #tpu.dot_dimension_numbers<[1], [0], [0], [1], [0, 0, 1, 1], [], []>} : vector<2x200xbf16>, vector<200x7xbf16>, vector<2x7xf32> -> vector<2x7xf32>
    %c0_106 = arith.constant 0 : index
    %c0_107 = arith.constant 0 : index
    %123 = vector.load %arg9[%c0_106, %c0_107] : memref<1x7xf32, #tpu.memory_space<vmem>>, vector<1x7xf32>
    %124 = vector.broadcast %123 : vector<1x7xf32> to vector<2x7xf32>
    %125 = arith.addf %122, %124 : vector<2x7xf32>
    %126 = tpu.iota {dimensions = array<i32: 1>} : vector<2x7xi32>
    %cst_108 = arith.constant 2.000000e+01 : f32
    %127 = vector.broadcast %cst_108 : f32 to vector<2x7xf32>
    %128 = arith.cmpf ogt, %125, %127 : vector<2x7xf32>
    %cst_109 = arith.constant 2.000000e+01 : f32
    %129 = vector.broadcast %cst_109 : f32 to vector<2x7xf32>
    %130 = arith.minimumf %125, %129 : vector<2x7xf32>
    %131 = math.exp %130 : vector<2x7xf32>
    %132 = math.log1p %131 : vector<2x7xf32>
    %133 = arith.select %128, %125, %132 : vector<2x7xi1>, vector<2x7xf32>
    %cst_110 = arith.constant 1.000000e+00 : f32
    %134 = vector.broadcast %cst_110 : f32 to vector<2x7xf32>
    %135 = arith.addf %133, %134 : vector<2x7xf32>
    %c0_i32 = arith.constant 0 : i32
    %136 = vector.broadcast %c0_i32 : i32 to vector<2x7xi32>
    %137 = arith.cmpi eq, %126, %136 : vector<2x7xi32>
    %138 = arith.select %137, %125, %135 : vector<2x7xi1>, vector<2x7xf32>
    %c0_111 = arith.constant 0 : index
    %c0_112 = arith.constant 0 : index
    %139 = vector.load %arg10[%c0_111, %c0_112] : memref<2x7xf32, #tpu.memory_space<vmem>>, vector<2x7xf32>
    tpu.vector_store %arg10[%c0_111, %c0_112], %138 {strides = array<i32>} : memref<2x7xf32, #tpu.memory_space<vmem>>, vector<2x7xf32>,
    return
  }
  func.func @transform_0(%arg0: i32) -> (i32, i32, i32) {
    %c0_i32 = arith.constant 0 : i32
    %c0_i32_0 = arith.constant 0 : i32
    %c0_i32_1 = arith.constant 0 : i32
    %c0_i32_2 = arith.constant 0 : i32
    return %c0_i32, %c0_i32_0, %c0_i32_1 : i32, i32, i32
  }
  func.func @transform_1(%arg0: i32) -> (i32, i32, i32) {
    %c0_i32 = arith.constant 0 : i32
    %c0_i32_0 = arith.constant 0 : i32
    %c0_i32_1 = arith.constant 0 : i32
    %c0_i32_2 = arith.constant 0 : i32
    return %c0_i32, %c0_i32_0, %c0_i32_1 : i32, i32, i32
  }
  func.func @transform_2(%arg0: i32) -> (i32, i32) {
    %c0_i32 = arith.constant 0 : i32
    %c0_i32_0 = arith.constant 0 : i32
    %c0_i32_1 = arith.constant 0 : i32
    return %c0_i32, %c0_i32_0 : i32, i32
  }
  func.func @transform_3(%arg0: i32) -> (i32, i32, i32) {
    %c0_i32 = arith.constant 0 : i32
    %c0_i32_0 = arith.constant 0 : i32
    %c0_i32_1 = arith.constant 0 : i32
    %c0_i32_2 = arith.constant 0 : i32
    return %c0_i32, %c0_i32_0, %c0_i32_1 : i32, i32, i32
  }
  func.func @transform_4(%arg0: i32) -> (i32, i32) {
    %c0_i32 = arith.constant 0 : i32
    %c0_i32_0 = arith.constant 0 : i32
    %c0_i32_1 = arith.constant 0 : i32
    return %c0_i32, %c0_i32_0 : i32, i32
  }
  func.func @transform_5(%arg0: i32) -> (i32, i32) {
    %c0_i32 = arith.constant 0 : i32
    %c0_i32_0 = arith.constant 0 : i32
    %c0_i32_1 = arith.constant 0 : i32
    return %c0_i32, %c0_i32_0 : i32, i32
  }
  func.func @transform_6(%arg0: i32) -> (i32, i32) {
    %c0_i32 = arith.constant 0 : i32
    %c0_i32_0 = arith.constant 0 : i32
    %c0_i32_1 = arith.constant 0 : i32
    return %c0_i32, %c0_i32_0 : i32, i32
  }
  func.func @transform_7(%arg0: i32) -> (i32, i32) {
    %c0_i32 = arith.constant 0 : i32
    %c0_i32_0 = arith.constant 0 : i32
    %c0_i32_1 = arith.constant 0 : i32
    return %c0_i32, %c0_i32_0 : i32, i32
  }
  func.func @transform_8(%arg0: i32) -> (i32, i32) {
    %c0_i32 = arith.constant 0 : i32
    %c0_i32_0 = arith.constant 0 : i32
    %c0_i32_1 = arith.constant 0 : i32
    return %c0_i32, %c0_i32_0 : i32, i32
  }
  func.func @transform_9(%arg0: i32) -> (i32, i32) {
    %c0_i32 = arith.constant 0 : i32
    %c0_i32_0 = arith.constant 0 : i32
    %c0_i32_1 = arith.constant 0 : i32
    return %c0_i32, %c0_i32_0 : i32, i32
  }
}

</mosaic_0001>

<bundles_post_ra>
// kernel: net_forward.5
= control target key start
LH: loop header
LB: loop body
LE: loop exit
PB: predicated region body
PF: predicated region fallthrough
CT: control target
= control target key end

     0   :  { %s1851_s12 = smov 0   ;;  %s2056_s0 = inlined_call_operand.vmem [shape: bf16[4608,64], index: 0, kind: input, shape index: {}]   ;;  %s2057_s1 = inlined_call_operand.vmem [shape: bf16[64,128], index: 1, kind: input, shape index: {}]   ;;  %s2058_s2 = inlined_call_operand.vmem [shape: f32[1,128], index: 2, kind: input, shape index: {}]   ;;  %s2059_s3 = inlined_call_operand.vmem [shape: bf16[4608,128], index: 3, kind: output, shape index: {}]  }
   0x1 LB: > { %s1264_s13 = sadd.s32 4294967295, %s1829_s12   ;;  %p1268_p0 = scmp.ge.s32.totalorder %s1829_s12, 1  ;;  %s1829_s12 = sphi %s1851_s12, %s13_s12  }
   0x2   : > { %p138_p1 = scmp.lt.s32.totalorder %s1829_s12, 10 }
   0x4   : > { %p139_p2 = pnand %p1268_p0, %p138_p1 }
   0x5   : > { %v1787_v0 = vld [vmem:[%s2057_s1] sm:$0xff] (!%p139_p2)   ;;  %s1269_s16 = sshll.u32 (!%p139_p2), %s1264_s13, 6  ;;  %v1788_v1 = vld [vmem:[%s2057_s1 + $0x8] sm:$0xff] (!%p139_p2)   ;;  %v1789_v2 = vld [vmem:[%s2057_s1 + $0x10] sm:$0xff] (!%p139_p2)   ;;  %vm438_vm0 = vcmask (!%p139_p2), 523264  }
   0x6   : > { %142 = sbr.rel (%p139_p2) target bundleno = 300 (0x12c), region = 32  ;;  %p163_p3 = scmp.lt.s32.totalorder (!%p139_p2), %s1269_s16, 575  ;;  %1699 = vmatprep.subr.bf16.mxu0 (!%p139_p2), %v1787_v0  ;;  %1771 = vmatprep.subr.bf16.mxu1 (!%p139_p2), %v1787_v0  ;;  %v1790_v3 = vld [vmem:[%s2057_s1 + $0x18] sm:$0xff] (!%p139_p2)   ;;  %v1948_v36 = vld [vmem:[%s2058_s2] ss:$0 sm:$0xff] (!%p139_p2) }
   0x7   : > { %1700 = vmatpush3.bf16.msra.mxu0 (!%p139_p2), %v1787_v0  ;;  %1775 = vmatpush3.bf16.msra.mxu1 (!%p139_p2), %v1787_v0 }
   0x8   : > { %1701 = vmatprep.subr.bf16.mxu0 (!%p139_p2), %v1788_v1  ;;  %1772 = vmatprep.subr.bf16.mxu1 (!%p139_p2), %v1788_v1 }
   0xb   : > { %1702 = vmatpush3.bf16.msra.mxu0 (!%p139_p2), %v1788_v1  ;;  %1776 = vmatpush3.bf16.msra.mxu1 (!%p139_p2), %v1788_v1 }
   0xc   : > { %1703 = vmatprep.subr.bf16.mxu0 (!%p139_p2), %v1789_v2  ;;  %1773 = vmatprep.subr.bf16.mxu1 (!%p139_p2), %v1789_v2 }
   0xd   : > { %s2061_s16 = smov (!%p163_p3, %s1269_s16), 575 }
   0xe   : > { %s1270_s21 = sshll.u32 %s2061_s16, 2 }
   0xf   : > { %s1879_s26 = scalar_lea.vmem %s2056_s0, %s1270_s21  ;;  %1704 = vmatpush3.bf16.msra.mxu0 %v1789_v2  ;;  %1777 = vmatpush3.bf16.msra.mxu1 %v1789_v2  ;;  %s1963_s4 = scalar_lea.vmem %s2059_s3, %s1270_s21 }
  0x10   : > { %v1791_v4 = vld [vmem:[%s1879_s26] sm:$0xff]   ;;  %1705 = vmatprep.subr.bf16.mxu0 %v1790_v3  ;;  %1774 = vmatprep.subr.bf16.mxu1 %v1790_v3  ;;  %v1793_v6 = vld [vmem:[%s1879_s26 + $0x8] sm:$0xff]   ;;  %v1795_v8 = vld [vmem:[%s1879_s26 + $0x10] sm:$0xff]  }
  0x11   : > { %v1792_v5 = vld [vmem:[%s1879_s26 + $0x80] sm:$0xff]   ;;  %1707 = vmatprep.mubr.msk.bf16.mxu0 %vm438_vm0, %v1791_v4  ;;  %v1794_v7 = vld [vmem:[%s1879_s26 + $0x88] sm:$0xff]   ;;  %v1796_v9 = vld [vmem:[%s1879_s26 + $0x90] sm:$0xff]  }
  0x12   : > { %1739 = vmatprep.mubr.msk.bf16.mxu1 %vm438_vm0, %v1792_v5  ;;  %v1797_v10 = vld [vmem:[%s1879_s26 + $0x18] sm:$0xff]   ;;  %v1799_v12 = vld [vmem:[%s1879_s26 + $0x20] sm:$0xff]   ;;  %v1801_v14 = vld [vmem:[%s1879_s26 + $0x28] sm:$0xff]  }
  0x13   : > { %1706 = vmatpush3.bf16.msra.mxu0 %v1790_v3  ;;  %1778 = vmatpush3.bf16.msra.mxu1 %v1790_v3  ;;  %v1798_v11 = vld [vmem:[%s1879_s26 + $0x98] sm:$0xff]   ;;  %v1800_v13 = vld [vmem:[%s1879_s26 + $0xa0] sm:$0xff]   ;;  %v1802_v15 = vld [vmem:[%s1879_s26 + $0xa8] sm:$0xff]  }
  0x14   : > { %v1803_v16 = vld [vmem:[%s1879_s26 + $0x30] sm:$0xff]   ;;  %v1805_v18 = vld [vmem:[%s1879_s26 + $0x38] sm:$0xff]   ;;  %v1807_v20 = vld [vmem:[%s1879_s26 + $0x40] sm:$0xff]  }
  0x15   : > { %v1804_v17 = vld [vmem:[%s1879_s26 + $0xb0] sm:$0xff]   ;;  %v1806_v19 = vld [vmem:[%s1879_s26 + $0xb8] sm:$0xff]   ;;  %v1808_v21 = vld [vmem:[%s1879_s26 + $0xc0] sm:$0xff]  }
  0x16   : > { %1708 = vmatmul.mubr.msk.bf16.vlgmr.msra.gmra.mrb[0].mxu0 %vm438_vm0, %v1793_v6  ;;  %1740 = vmatmul.mubr.msk.bf16.vlgmr.msra.gmra.mrb[0].mxu1 %vm438_vm0, %v1794_v7  ;;  %v1809_v22 = vld [vmem:[%s1879_s26 + $0x48] sm:$0xff]   ;;  %v1811_v24 = vld [vmem:[%s1879_s26 + $0x50] sm:$0xff]   ;;  %v1813_v26 = vld [vmem:[%s1879_s26 + $0x58] sm:$0xff]  }
  0x17   : > { %1711 = vmatprep.mubr.msk.bf16.mxu0 %vm438_vm0, %v1795_v8  ;;  %1743 = vmatprep.mubr.msk.bf16.mxu1 %vm438_vm0, %v1796_v9  ;;  %v1810_v23 = vld [vmem:[%s1879_s26 + $0xc8] sm:$0xff]   ;;  %v1812_v25 = vld [vmem:[%s1879_s26 + $0xd0] sm:$0xff]   ;;  %v1814_v27 = vld [vmem:[%s1879_s26 + $0xd8] sm:$0xff]  }
  0x18   : > { %v1815_v28 = vld [vmem:[%s1879_s26 + $0x60] sm:$0xff]   ;;  %v1817_v30 = vld [vmem:[%s1879_s26 + $0x68] sm:$0xff]   ;;  %v1819_v32 = vld [vmem:[%s1879_s26 + $0x70] sm:$0xff]  }
  0x19   : > { %v1816_v29 = vld [vmem:[%s1879_s26 + $0xe0] sm:$0xff]   ;;  %v1818_v31 = vld [vmem:[%s1879_s26 + $0xe8] sm:$0xff]   ;;  %v1820_v33 = vld [vmem:[%s1879_s26 + $0xf0] sm:$0xff]  }
  0x1a   : > { %v1821_v34 = vld [vmem:[%s1879_s26 + $0x78] sm:$0xff]  }
  0x1b   : > { %v1822_v35 = vld [vmem:[%s1879_s26 + $0xf8] sm:$0xff]  }
  0x1e   : > { %1712 = vmatmul.mubr.msk.bf16.gmra.mrb[4].mxu0 %vm438_vm0, %v1797_v10  ;;  %1744 = vmatmul.mubr.msk.bf16.gmra.mrb[4].mxu1 %vm438_vm0, %v1798_v11 }
  0x1f   : > { %1715 = vmatprep.mubr.msk.bf16.mxu0 %vm438_vm0, %v1799_v12  ;;  %1747 = vmatprep.mubr.msk.bf16.mxu1 %vm438_vm0, %v1800_v13 }
  0x26   : > { %1716 = vmatmul.mubr.msk.bf16.gmra.mrb[8].mxu0 %vm438_vm0, %v1801_v14  ;;  %1748 = vmatmul.mubr.msk.bf16.gmra.mrb[8].mxu1 %vm438_vm0, %v1802_v15 }
  0x27   : > { %1719 = vmatprep.mubr.msk.bf16.mxu0 %vm438_vm0, %v1803_v16  ;;  %1751 = vmatprep.mubr.msk.bf16.mxu1 %vm438_vm0, %v1804_v17 }
  0x2e   : > { %1720 = vmatmul.mubr.msk.bf16.gmra.mrb[12].mxu0 %vm438_vm0, %v1805_v18  ;;  %1752 = vmatmul.mubr.msk.bf16.gmra.mrb[12].mxu1 %vm438_vm0, %v1806_v19 }
  0x2f   : > { %1723 = vmatprep.mubr.msk.bf16.mxu0 %vm438_vm0, %v1807_v20  ;;  %1755 = vmatprep.mubr.msk.bf16.mxu1 %vm438_vm0, %v1808_v21 }
  0x36   : > { %1724 = vmatmul.mubr.msk.bf16.gmra.mrb[16].mxu0 %vm438_vm0, %v1809_v22  ;;  %1756 = vmatmul.mubr.msk.bf16.gmra.mrb[16].mxu1 %vm438_vm0, %v1810_v23 }
  0x37   : > { %1727 = vmatprep.mubr.msk.bf16.mxu0 %vm438_vm0, %v1811_v24  ;;  %1759 = vmatprep.mubr.msk.bf16.mxu1 %vm438_vm0, %v1812_v25 }
  0x3e   : > { %1728 = vmatmul.mubr.msk.bf16.gmra.mrb[20].mxu0 %vm438_vm0, %v1813_v26  ;;  %1760 = vmatmul.mubr.msk.bf16.gmra.mrb[20].mxu1 %vm438_vm0, %v1814_v27 }
  0x3f   : > { %1731 = vmatprep.mubr.msk.bf16.mxu0 %vm438_vm0, %v1815_v28  ;;  %1763 = vmatprep.mubr.msk.bf16.mxu1 %vm438_vm0, %v1816_v29 }
  0x46   : > { %1732 = vmatmul.mubr.msk.bf16.gmra.mrb[24].mxu0 %vm438_vm0, %v1817_v30  ;;  %1764 = vmatmul.mubr.msk.bf16.gmra.mrb[24].mxu1 %vm438_vm0, %v1818_v31 }
  0x47   : > { %1735 = vmatprep.mubr.msk.bf16.mxu0 %vm438_vm0, %v1819_v32  ;;  %1767 = vmatprep.mubr.msk.bf16.mxu1 %vm438_vm0, %v1820_v33 }
  0x4e   : > { %1736 = vmatmul.mubr.msk.bf16.gmra.mrb[28].mxu0 %vm438_vm0, %v1821_v34  ;;  %1768 = vmatmul.mubr.msk.bf16.gmra.mrb[28].mxu1 %vm438_vm0, %v1822_v35 }
  0xe9   : > { %v1709_v37 = vpop.f32.mrb[0].mxu0  ;;  %v1741_v38 = vpop.f32.mrb[0].mxu1 }
  0xea   : > { %v578_v39 = vadd.f32 %v1709_v37, %v1948_v36  ;;  %v706_v40 = vadd.f32 %v1741_v38, %v1948_v36  ;;  %v569_v41 = vpop.f32.mrb[1].mxu0  ;;  %v697_v42 = vpop.f32.mrb[1].mxu1 }
  0xeb   : > { %v570_v43 = vadd.f32 %v1948_v36, %v569_v41  ;;  %v698_v44 = vadd.f32 %v1948_v36, %v697_v42  ;;  %v1710_v45 = vpop.f32.mrb[2].mxu0  ;;  %v1742_v46 = vpop.f32.mrb[2].mxu1 }
  0xec   : > { %v581_v47 = vadd.f32 %v1710_v45, %v1948_v36  ;;  %v709_v48 = vadd.f32 %v1742_v46, %v1948_v36  ;;  %v572_v49 = vpop.f32.mrb[3].mxu0  ;;  %v700_v50 = vpop.f32.mrb[3].mxu1  ;;  %v826_v53 = vmax.f32 %v578_v39, 0.0  ;;  %v858_v54 = vmax.f32 %v706_v40, 0.0 }
  0xed   : > { %v573_v51 = vadd.f32 %v1948_v36, %v572_v49  ;;  %v701_v52 = vadd.f32 %v1948_v36, %v700_v50  ;;  %v824_v57 = vmax.f32 %v570_v43, 0.0  ;;  %v856_v58 = vmax.f32 %v698_v44, 0.0 }
  0xee   : > { %v827_v55 = vmax.f32 %v581_v47, 0.0  ;;  %v859_v56 = vmax.f32 %v709_v48, 0.0 }
  0xef   : > { %v825_v59 = vmax.f32 %v573_v51, 0.0  ;;  %v857_v60 = vmax.f32 %v701_v52, 0.0 }
  0xf0   : > { %v1480_v61 = vpack.c.bf16 %v827_v55, %v826_v53  ;;  %v1560_v62 = vpack.c.bf16 %v859_v56, %v858_v54 }
  0xf1   : > { %v1475_v63 = vpack.c.bf16 %v825_v59, %v824_v57  ;;  %v1555_v0 = vpack.c.bf16 %v857_v60, %v856_v58  ;;  %v1713_v1 = vpop.f32.mrb[4].mxu0  ;;  %v1745_v2 = vpop.f32.mrb[4].mxu1 }
  0xf2   : > { %1632 = vst [vmem:[%s1963_s4 + $0x8] sm:$0xff] %v1480_v61   ;;  %1648 = vst [vmem:[%s1963_s4 + $0x88] sm:$0xff] %v1560_v62   ;;  %v594_v3 = vadd.f32 %v1713_v1, %v1948_v36  ;;  %v722_v4 = vadd.f32 %v1745_v2, %v1948_v36  ;;  %v585_v5 = vpop.f32.mrb[5].mxu0  ;;  %v713_v6 = vpop.f32.mrb[5].mxu1 }
  0xf3   : > { %1476 = vst [vmem:[%s1963_s4] sm:$0xff] %v1475_v63   ;;  %1647 = vst [vmem:[%s1963_s4 + $0x80] sm:$0xff] %v1555_v0   ;;  %v586_v7 = vadd.f32 %v1948_v36, %v585_v5  ;;  %v714_v8 = vadd.f32 %v1948_v36, %v713_v6  ;;  %v1714_v9 = vpop.f32.mrb[6].mxu0  ;;  %v1746_v10 = vpop.f32.mrb[6].mxu1 }
  0xf4   : > { %v597_v11 = vadd.f32 %v1714_v9, %v1948_v36  ;;  %v725_v12 = vadd.f32 %v1746_v10, %v1948_v36  ;;  %v588_v13 = vpop.f32.mrb[7].mxu0  ;;  %v716_v14 = vpop.f32.mrb[7].mxu1  ;;  %v830_v17 = vmax.f32 %v594_v3, 0.0  ;;  %v862_v18 = vmax.f32 %v722_v4, 0.0 }
  0xf5   : > { %v589_v15 = vadd.f32 %v1948_v36, %v588_v13  ;;  %v717_v16 = vadd.f32 %v1948_v36, %v716_v14  ;;  %v828_v21 = vmax.f32 %v586_v7, 0.0  ;;  %v860_v22 = vmax.f32 %v714_v8, 0.0 }
  0xf6   : > { %v831_v19 = vmax.f32 %v597_v11, 0.0  ;;  %v863_v20 = vmax.f32 %v725_v12, 0.0 }
  0xf7   : > { %v829_v23 = vmax.f32 %v589_v15, 0.0  ;;  %v861_v24 = vmax.f32 %v717_v16, 0.0 }
  0xf8   : > { %v1490_v25 = vpack.c.bf16 %v831_v19, %v830_v17  ;;  %v1570_v26 = vpack.c.bf16 %v863_v20, %v862_v18 }
  0xf9   : > { %v1485_v27 = vpack.c.bf16 %v829_v23, %v828_v21  ;;  %v1565_v28 = vpack.c.bf16 %v861_v24, %v860_v22  ;;  %v1717_v29 = vpop.f32.mrb[8].mxu0  ;;  %v1749_v30 = vpop.f32.mrb[8].mxu1 }
  0xfa   : > { %1634 = vst [vmem:[%s1963_s4 + $0x18] sm:$0xff] %v1490_v25   ;;  %1650 = vst [vmem:[%s1963_s4 + $0x98] sm:$0xff] %v1570_v26   ;;  %v610_v31 = vadd.f32 %v1717_v29, %v1948_v36  ;;  %v738_v32 = vadd.f32 %v1749_v30, %v1948_v36  ;;  %v601_v33 = vpop.f32.mrb[9].mxu0  ;;  %v729_v34 = vpop.f32.mrb[9].mxu1 }
  0xfb   : > { %1633 = vst [vmem:[%s1963_s4 + $0x10] sm:$0xff] %v1485_v27   ;;  %1649 = vst [vmem:[%s1963_s4 + $0x90] sm:$0xff] %v1565_v28   ;;  %v602_v35 = vadd.f32 %v1948_v36, %v601_v33  ;;  %v730_v37 = vadd.f32 %v1948_v36, %v729_v34  ;;  %v1718_v38 = vpop.f32.mrb[10].mxu0  ;;  %v1750_v39 = vpop.f32.mrb[10].mxu1 }
  0xfc   : > { %v613_v40 = vadd.f32 %v1718_v38, %v1948_v36  ;;  %v741_v41 = vadd.f32 %v1750_v39, %v1948_v36  ;;  %v604_v42 = vpop.f32.mrb[11].mxu0  ;;  %v732_v43 = vpop.f32.mrb[11].mxu1  ;;  %v834_v46 = vmax.f32 %v610_v31, 0.0  ;;  %v866_v47 = vmax.f32 %v738_v32, 0.0 }
  0xfd   : > { %v605_v44 = vadd.f32 %v1948_v36, %v604_v42  ;;  %v733_v45 = vadd.f32 %v1948_v36, %v732_v43  ;;  %v832_v50 = vmax.f32 %v602_v35, 0.0  ;;  %v864_v51 = vmax.f32 %v730_v37, 0.0 }
  0xfe   : > { %v835_v48 = vmax.f32 %v613_v40, 0.0  ;;  %v867_v49 = vmax.f32 %v741_v41, 0.0 }
  0xff   : > { %v833_v52 = vmax.f32 %v605_v44, 0.0  ;;  %v865_v53 = vmax.f32 %v733_v45, 0.0 }
 0x100   : > { %v1500_v54 = vpack.c.bf16 %v835_v48, %v834_v46  ;;  %v1580_v55 = vpack.c.bf16 %v867_v49, %v866_v47 }
 0x101   : > { %v1495_v56 = vpack.c.bf16 %v833_v52, %v832_v50  ;;  %v1575_v57 = vpack.c.bf16 %v865_v53, %v864_v51  ;;  %v1721_v58 = vpop.f32.mrb[12].mxu0  ;;  %v1753_v59 = vpop.f32.mrb[12].mxu1 }
 0x102   : > { %1636 = vst [vmem:[%s1963_s4 + $0x28] sm:$0xff] %v1500_v54   ;;  %1652 = vst [vmem:[%s1963_s4 + $0xa8] sm:$0xff] %v1580_v55   ;;  %v626_v60 = vadd.f32 %v1721_v58, %v1948_v36  ;;  %v754_v61 = vadd.f32 %v1753_v59, %v1948_v36  ;;  %v617_v62 = vpop.f32.mrb[13].mxu0  ;;  %v745_v63 = vpop.f32.mrb[13].mxu1 }
 0x103   : > { %1635 = vst [vmem:[%s1963_s4 + $0x20] sm:$0xff] %v1495_v56   ;;  %1651 = vst [vmem:[%s1963_s4 + $0xa0] sm:$0xff] %v1575_v57   ;;  %v618_v0 = vadd.f32 %v1948_v36, %v617_v62  ;;  %v746_v1 = vadd.f32 %v1948_v36, %v745_v63  ;;  %v1722_v2 = vpop.f32.mrb[14].mxu0  ;;  %v1754_v3 = vpop.f32.mrb[14].mxu1 }
 0x104   : > { %v629_v4 = vadd.f32 %v1722_v2, %v1948_v36  ;;  %v757_v5 = vadd.f32 %v1754_v3, %v1948_v36  ;;  %v620_v6 = vpop.f32.mrb[15].mxu0  ;;  %v748_v7 = vpop.f32.mrb[15].mxu1  ;;  %v838_v10 = vmax.f32 %v626_v60, 0.0  ;;  %v870_v11 = vmax.f32 %v754_v61, 0.0 }
 0x105   : > { %v621_v8 = vadd.f32 %v1948_v36, %v620_v6  ;;  %v749_v9 = vadd.f32 %v1948_v36, %v748_v7  ;;  %v836_v14 = vmax.f32 %v618_v0, 0.0  ;;  %v868_v15 = vmax.f32 %v746_v1, 0.0 }
 0x106   : > { %v839_v12 = vmax.f32 %v629_v4, 0.0  ;;  %v871_v13 = vmax.f32 %v757_v5, 0.0 }
 0x107   : > { %v837_v16 = vmax.f32 %v621_v8, 0.0  ;;  %v869_v17 = vmax.f32 %v749_v9, 0.0 }
 0x108   : > { %v1510_v18 = vpack.c.bf16 %v839_v12, %v838_v10  ;;  %v1590_v19 = vpack.c.bf16 %v871_v13, %v870_v11 }
 0x109   : > { %v1505_v20 = vpack.c.bf16 %v837_v16, %v836_v14  ;;  %v1585_v21 = vpack.c.bf16 %v869_v17, %v868_v15  ;;  %v1725_v22 = vpop.f32.mrb[16].mxu0  ;;  %v1757_v23 = vpop.f32.mrb[16].mxu1 }
 0x10a   : > { %1638 = vst [vmem:[%s1963_s4 + $0x38] sm:$0xff] %v1510_v18   ;;  %1654 = vst [vmem:[%s1963_s4 + $0xb8] sm:$0xff] %v1590_v19   ;;  %v642_v24 = vadd.f32 %v1725_v22, %v1948_v36  ;;  %v770_v25 = vadd.f32 %v1757_v23, %v1948_v36  ;;  %v633_v26 = vpop.f32.mrb[17].mxu0  ;;  %v761_v27 = vpop.f32.mrb[17].mxu1 }
 0x10b   : > { %1637 = vst [vmem:[%s1963_s4 + $0x30] sm:$0xff] %v1505_v20   ;;  %1653 = vst [vmem:[%s1963_s4 + $0xb0] sm:$0xff] %v1585_v21   ;;  %v634_v28 = vadd.f32 %v1948_v36, %v633_v26  ;;  %v762_v29 = vadd.f32 %v1948_v36, %v761_v27  ;;  %v1726_v30 = vpop.f32.mrb[18].mxu0  ;;  %v1758_v31 = vpop.f32.mrb[18].mxu1 }
 0x10c   : > { %v645_v32 = vadd.f32 %v1726_v30, %v1948_v36  ;;  %v773_v33 = vadd.f32 %v1758_v31, %v1948_v36  ;;  %v636_v34 = vpop.f32.mrb[19].mxu0  ;;  %v764_v35 = vpop.f32.mrb[19].mxu1  ;;  %v842_v39 = vmax.f32 %v642_v24, 0.0  ;;  %v874_v40 = vmax.f32 %v770_v25, 0.0 }
 0x10d   : > { %v637_v37 = vadd.f32 %v1948_v36, %v636_v34  ;;  %v765_v38 = vadd.f32 %v1948_v36, %v764_v35  ;;  %v840_v43 = vmax.f32 %v634_v28, 0.0  ;;  %v872_v44 = vmax.f32 %v762_v29, 0.0 }
 0x10e   : > { %v843_v41 = vmax.f32 %v645_v32, 0.0  ;;  %v875_v42 = vmax.f32 %v773_v33, 0.0 }
 0x10f   : > { %v841_v45 = vmax.f32 %v637_v37, 0.0  ;;  %v873_v46 = vmax.f32 %v765_v38, 0.0 }
 0x110   : > { %v1520_v47 = vpack.c.bf16 %v843_v41, %v842_v39  ;;  %v1600_v48 = vpack.c.bf16 %v875_v42, %v874_v40 }
 0x111   : > { %v1515_v49 = vpack.c.bf16 %v841_v45, %v840_v43  ;;  %v1595_v50 = vpack.c.bf16 %v873_v46, %v872_v44  ;;  %v1729_v51 = vpop.f32.mrb[20].mxu0  ;;  %v1761_v52 = vpop.f32.mrb[20].mxu1 }
 0x112   : > { %1640 = vst [vmem:[%s1963_s4 + $0x48] sm:$0xff] %v1520_v47   ;;  %1656 = vst [vmem:[%s1963_s4 + $0xc8] sm:$0xff] %v1600_v48   ;;  %v658_v53 = vadd.f32 %v1729_v51, %v1948_v36  ;;  %v786_v54 = vadd.f32 %v1761_v52, %v1948_v36  ;;  %v649_v55 = vpop.f32.mrb[21].mxu0  ;;  %v777_v56 = vpop.f32.mrb[21].mxu1 }
 0x113   : > { %1639 = vst [vmem:[%s1963_s4 + $0x40] sm:$0xff] %v1515_v49   ;;  %1655 = vst [vmem:[%s1963_s4 + $0xc0] sm:$0xff] %v1595_v50   ;;  %v650_v57 = vadd.f32 %v1948_v36, %v649_v55  ;;  %v778_v58 = vadd.f32 %v1948_v36, %v777_v56  ;;  %v1730_v59 = vpop.f32.mrb[22].mxu0  ;;  %v1762_v60 = vpop.f32.mrb[22].mxu1 }
 0x114   : > { %v661_v61 = vadd.f32 %v1730_v59, %v1948_v36  ;;  %v789_v62 = vadd.f32 %v1762_v60, %v1948_v36  ;;  %v652_v63 = vpop.f32.mrb[23].mxu0  ;;  %v780_v0 = vpop.f32.mrb[23].mxu1  ;;  %v846_v3 = vmax.f32 %v658_v53, 0.0  ;;  %v878_v4 = vmax.f32 %v786_v54, 0.0 }
 0x115   : > { %v653_v1 = vadd.f32 %v1948_v36, %v652_v63  ;;  %v781_v2 = vadd.f32 %v1948_v36, %v780_v0  ;;  %v844_v7 = vmax.f32 %v650_v57, 0.0  ;;  %v876_v8 = vmax.f32 %v778_v58, 0.0 }
 0x116   : > { %v847_v5 = vmax.f32 %v661_v61, 0.0  ;;  %v879_v6 = vmax.f32 %v789_v62, 0.0 }
 0x117   : > { %v845_v9 = vmax.f32 %v653_v1, 0.0  ;;  %v877_v10 = vmax.f32 %v781_v2, 0.0 }
 0x118   : > { %v1530_v11 = vpack.c.bf16 %v847_v5, %v846_v3  ;;  %v1610_v12 = vpack.c.bf16 %v879_v6, %v878_v4 }
 0x119   : > { %v1525_v13 = vpack.c.bf16 %v845_v9, %v844_v7  ;;  %v1605_v14 = vpack.c.bf16 %v877_v10, %v876_v8  ;;  %v1733_v15 = vpop.f32.mrb[24].mxu0  ;;  %v1765_v16 = vpop.f32.mrb[24].mxu1 }
 0x11a   : > { %1642 = vst [vmem:[%s1963_s4 + $0x58] sm:$0xff] %v1530_v11   ;;  %1658 = vst [vmem:[%s1963_s4 + $0xd8] sm:$0xff] %v1610_v12   ;;  %v674_v17 = vadd.f32 %v1733_v15, %v1948_v36  ;;  %v802_v18 = vadd.f32 %v1765_v16, %v1948_v36  ;;  %v665_v19 = vpop.f32.mrb[25].mxu0  ;;  %v793_v20 = vpop.f32.mrb[25].mxu1 }
 0x11b   : > { %1641 = vst [vmem:[%s1963_s4 + $0x50] sm:$0xff] %v1525_v13   ;;  %1657 = vst [vmem:[%s1963_s4 + $0xd0] sm:$0xff] %v1605_v14   ;;  %v666_v21 = vadd.f32 %v1948_v36, %v665_v19  ;;  %v794_v22 = vadd.f32 %v1948_v36, %v793_v20  ;;  %v1734_v23 = vpop.f32.mrb[26].mxu0  ;;  %v1766_v24 = vpop.f32.mrb[26].mxu1 }
 0x11c   : > { %v677_v25 = vadd.f32 %v1734_v23, %v1948_v36  ;;  %v805_v26 = vadd.f32 %v1766_v24, %v1948_v36  ;;  %v668_v27 = vpop.f32.mrb[27].mxu0  ;;  %v796_v28 = vpop.f32.mrb[27].mxu1  ;;  %v850_v31 = vmax.f32 %v674_v17, 0.0  ;;  %v882_v32 = vmax.f32 %v802_v18, 0.0 }
 0x11d   : > { %v669_v29 = vadd.f32 %v1948_v36, %v668_v27  ;;  %v797_v30 = vadd.f32 %v1948_v36, %v796_v28  ;;  %v848_v35 = vmax.f32 %v666_v21, 0.0  ;;  %v880_v37 = vmax.f32 %v794_v22, 0.0 }
 0x11e   : > { %v851_v33 = vmax.f32 %v677_v25, 0.0  ;;  %v883_v34 = vmax.f32 %v805_v26, 0.0 }
 0x11f   : > { %v849_v38 = vmax.f32 %v669_v29, 0.0  ;;  %v881_v39 = vmax.f32 %v797_v30, 0.0 }
 0x120   : > { %v1540_v40 = vpack.c.bf16 %v851_v33, %v850_v31  ;;  %v1620_v41 = vpack.c.bf16 %v883_v34, %v882_v32 }
 0x121   : > { %v1535_v42 = vpack.c.bf16 %v849_v38, %v848_v35  ;;  %v1615_v43 = vpack.c.bf16 %v881_v39, %v880_v37  ;;  %v1737_v44 = vpop.f32.mrb[28].mxu0  ;;  %v1769_v45 = vpop.f32.mrb[28].mxu1 }
 0x122   : > { %1644 = vst [vmem:[%s1963_s4 + $0x68] sm:$0xff] %v1540_v40   ;;  %1660 = vst [vmem:[%s1963_s4 + $0xe8] sm:$0xff] %v1620_v41   ;;  %v690_v46 = vadd.f32 %v1737_v44, %v1948_v36  ;;  %v818_v47 = vadd.f32 %v1769_v45, %v1948_v36  ;;  %v681_v48 = vpop.f32.mrb[29].mxu0  ;;  %v809_v49 = vpop.f32.mrb[29].mxu1 }
 0x123   : > { %1643 = vst [vmem:[%s1963_s4 + $0x60] sm:$0xff] %v1535_v42   ;;  %1659 = vst [vmem:[%s1963_s4 + $0xe0] sm:$0xff] %v1615_v43   ;;  %v682_v50 = vadd.f32 %v1948_v36, %v681_v48  ;;  %v810_v51 = vadd.f32 %v1948_v36, %v809_v49  ;;  %v1738_v52 = vpop.f32.mrb[30].mxu0  ;;  %v1770_v53 = vpop.f32.mrb[30].mxu1 }
 0x124   : > { %v693_v54 = vadd.f32 %v1738_v52, %v1948_v36  ;;  %v821_v55 = vadd.f32 %v1770_v53, %v1948_v36  ;;  %v684_v56 = vpop.f32.mrb[31].mxu0  ;;  %v812_v57 = vpop.f32.mrb[31].mxu1  ;;  %v854_v60 = vmax.f32 %v690_v46, 0.0  ;;  %v886_v61 = vmax.f32 %v818_v47, 0.0 }
 0x125   : > { %v685_v58 = vadd.f32 %v1948_v36, %v684_v56  ;;  %v813_v59 = vadd.f32 %v1948_v36, %v812_v57  ;;  %v852_v0 = vmax.f32 %v682_v50, 0.0  ;;  %v884_v1 = vmax.f32 %v810_v51, 0.0 }
 0x126   : > { %v855_v62 = vmax.f32 %v693_v54, 0.0  ;;  %v887_v63 = vmax.f32 %v821_v55, 0.0 }
 0x127   : > { %v853_v2 = vmax.f32 %v685_v58, 0.0  ;;  %v885_v3 = vmax.f32 %v813_v59, 0.0 }
 0x128   : > { %v1550_v4 = vpack.c.bf16 %v855_v62, %v854_v60  ;;  %v1630_v5 = vpack.c.bf16 %v887_v63, %v886_v61 }
 0x129   : > { %v1545_v6 = vpack.c.bf16 %v853_v2, %v852_v0  ;;  %v1625_v7 = vpack.c.bf16 %v885_v3, %v884_v1 }
 0x12a   : > { %1646 = vst [vmem:[%s1963_s4 + $0x78] sm:$0xff] %v1550_v4   ;;  %1662 = vst [vmem:[%s1963_s4 + $0xf8] sm:$0xff] %v1630_v5  }
 0x12b   : > { %1645 = vst [vmem:[%s1963_s4 + $0x70] sm:$0xff] %v1545_v6   ;;  %1661 = vst [vmem:[%s1963_s4 + $0xf0] sm:$0xff] %v1625_v7  }
 0x12c PF: > { %s13_s12 = sadd.s32 1, %s1829_s12  }
 0x12d   : > { %p10_p4 = scmp.ge.s32.totalorder %s13_s12, 11  }
 0x12f   :  { %12 = sbr.rel (!%p10_p4) target bundleno = 1 (0x1), region = 62 }

// kernel: net_forward.6
= control target key start
LH: loop header
LB: loop body
LE: loop exit
PB: predicated region body
PF: predicated region fallthrough
CT: control target
= control target key end

     0   :  { %s1868_s12 = smov 0   ;;  %s2076_s0 = inlined_call_operand.vmem [shape: bf16[1536,72], index: 0, kind: input, shape index: {}]   ;;  %s2077_s1 = inlined_call_operand.vmem [shape: bf16[72,128], index: 1, kind: input, shape index: {}]   ;;  %s2078_s2 = inlined_call_operand.vmem [shape: f32[1,128], index: 2, kind: input, shape index: {}]   ;;  %s2079_s3 = inlined_call_operand.vmem [shape: bf16[1536,128], index: 3, kind: output, shape index: {}]  }
   0x1 LB: > { %s1272_s13 = sadd.s32 4294967295, %s1846_s12   ;;  %p1276_p0 = scmp.ge.s32.totalorder %s1846_s12, 1  ;;  %s1846_s12 = sphi %s1868_s12, %s13_s12  }
   0x2   : > { %p138_p1 = scmp.lt.s32.totalorder %s1846_s12, 4 }
   0x4   : > { %p139_p2 = pnand %p1276_p0, %p138_p1 }
   0x5   : > { %v1803_v0 = vld [vmem:[%s2077_s1] sm:$0xff] (!%p139_p2)   ;;  %v1804_v1 = vld [vmem:[%s2077_s1 + $0x8] sm:$0xff] (!%p139_p2)   ;;  %s1277_s18 = sshll.u32 (!%p139_p2), %s1272_s13, 6  ;;  %v1805_v2 = vld [vmem:[%s2077_s1 + $0x10] sm:$0xff] (!%p139_p2)   ;;  %vm442_vm0 = vcmask (!%p139_p2), 588800   ;;  %vm539_vm1 = vcmask (!%p139_p2), 1043456  }
   0x6   : > { %142 = sbr.rel (%p139_p2) target bundleno = 304 (0x130), region = 32  ;;  %1709 = vmatprep.subr.bf16.mxu0 (!%p139_p2), %v1803_v0  ;;  %1783 = vmatprep.subr.bf16.mxu1 (!%p139_p2), %v1803_v0  ;;  %p163_p3 = scmp.lt.s32.totalorder (!%p139_p2), %s1277_s18, 191  ;;  %v1806_v3 = vld [vmem:[%s2077_s1 + $0x18] sm:$0xff] (!%p139_p2)   ;;  %v1807_v6 = vld [vmem:[%s2077_s1 + $0x20] ss:$0 sps:$4 sm:$0xff] (!%p139_p2)  }
   0x7   : > { %1710 = vmatpush3.bf16.msra.mxu0 (!%p139_p2), %v1803_v0  ;;  %1788 = vmatpush3.bf16.msra.mxu1 (!%p139_p2), %v1803_v0  ;;  %v541_v7 = vsel (!%p139_p2), %vm539_vm1, %v1807_v6, 0  ;;  %v1968_v38 = vld [vmem:[%s2078_s2] ss:$0 sm:$0xff] (!%p139_p2) }
   0x8   : > { %1711 = vmatprep.subr.bf16.mxu0 (!%p139_p2), %v1804_v1  ;;  %1784 = vmatprep.subr.bf16.mxu1 (!%p139_p2), %v1804_v1 }
   0xb   : > { %1712 = vmatpush3.bf16.msra.mxu0 (!%p139_p2), %v1804_v1  ;;  %1789 = vmatpush3.bf16.msra.mxu1 (!%p139_p2), %v1804_v1 }
   0xc   : > { %1713 = vmatprep.subr.bf16.mxu0 (!%p139_p2), %v1805_v2  ;;  %1785 = vmatprep.subr.bf16.mxu1 (!%p139_p2), %v1805_v2 }
   0xd   : > { %s2081_s18 = smov (!%p163_p3, %s1277_s18), 191 }
   0xe   : > { %s1278_s21 = sshll.u32 %s2081_s18, 2 }
   0xf   : > { %s1896_s26 = scalar_lea.vmem %s2076_s0, %s1278_s21  ;;  %1714 = vmatpush3.bf16.msra.mxu0 %v1805_v2  ;;  %1790 = vmatpush3.bf16.msra.mxu1 %v1805_v2  ;;  %s1983_s6 = scalar_lea.vmem %s2079_s3, %s1278_s21 }
  0x10   : > { %v1808_v4 = vld [vmem:[%s1896_s26] sm:$0xff]   ;;  %1715 = vmatprep.subr.bf16.mxu0 %v1806_v3  ;;  %1786 = vmatprep.subr.bf16.mxu1 %v1806_v3  ;;  %v1810_v8 = vld [vmem:[%s1896_s26 + $0x8] sm:$0xff]   ;;  %v1812_v10 = vld [vmem:[%s1896_s26 + $0x10] sm:$0xff]  }
  0x11   : > { %v1809_v5 = vld [vmem:[%s1896_s26 + $0x80] sm:$0xff]   ;;  %1719 = vmatprep.mubr.msk.bf16.mxu0 %vm442_vm0, %v1808_v4  ;;  %v1811_v9 = vld [vmem:[%s1896_s26 + $0x88] sm:$0xff]   ;;  %v1813_v11 = vld [vmem:[%s1896_s26 + $0x90] sm:$0xff]  }
  0x12   : > { %1751 = vmatprep.mubr.msk.bf16.mxu1 %vm442_vm0, %v1809_v5  ;;  %v1814_v12 = vld [vmem:[%s1896_s26 + $0x18] sm:$0xff]   ;;  %v1816_v14 = vld [vmem:[%s1896_s26 + $0x20] sm:$0xff]   ;;  %v1818_v16 = vld [vmem:[%s1896_s26 + $0x28] sm:$0xff]  }
  0x13   : > { %1716 = vmatpush3.bf16.msra.mxu0 %v1806_v3  ;;  %1791 = vmatpush3.bf16.msra.mxu1 %v1806_v3  ;;  %v1815_v13 = vld [vmem:[%s1896_s26 + $0x98] sm:$0xff]   ;;  %v1817_v15 = vld [vmem:[%s1896_s26 + $0xa0] sm:$0xff]   ;;  %v1819_v17 = vld [vmem:[%s1896_s26 + $0xa8] sm:$0xff]  }
  0x14   : > { %1793 = vmatprep.subr.msk.bf16.mxu0 %vm539_vm1, %v1807_v6  ;;  %1794 = vmatprep.subr.msk.bf16.mxu1 %vm539_vm1, %v1807_v6  ;;  %v1820_v18 = vld [vmem:[%s1896_s26 + $0x30] sm:$0xff]   ;;  %v1822_v20 = vld [vmem:[%s1896_s26 + $0x38] sm:$0xff]   ;;  %v1824_v22 = vld [vmem:[%s1896_s26 + $0x40] sm:$0xff]  }
  0x15   : > { %v1821_v19 = vld [vmem:[%s1896_s26 + $0xb0] sm:$0xff]   ;;  %v1823_v21 = vld [vmem:[%s1896_s26 + $0xb8] sm:$0xff]   ;;  %v1825_v23 = vld [vmem:[%s1896_s26 + $0xc0] sm:$0xff]  }
  0x16   : > { %v1826_v24 = vld [vmem:[%s1896_s26 + $0x48] sm:$0xff]   ;;  %v1828_v26 = vld [vmem:[%s1896_s26 + $0x50] sm:$0xff]   ;;  %v1830_v28 = vld [vmem:[%s1896_s26 + $0x58] sm:$0xff]  }
  0x17   : > { %1718 = vmatpush3.bf16.msra.mxu0 %v541_v7  ;;  %1792 = vmatpush3.bf16.msra.mxu1 %v541_v7  ;;  %v1827_v25 = vld [vmem:[%s1896_s26 + $0xc8] sm:$0xff]   ;;  %v1829_v27 = vld [vmem:[%s1896_s26 + $0xd0] sm:$0xff]   ;;  %v1831_v29 = vld [vmem:[%s1896_s26 + $0xd8] sm:$0xff]  }
  0x18   : > { %v1832_v30 = vld [vmem:[%s1896_s26 + $0x60] sm:$0xff]   ;;  %v1834_v32 = vld [vmem:[%s1896_s26 + $0x68] sm:$0xff]   ;;  %v1836_v34 = vld [vmem:[%s1896_s26 + $0x70] sm:$0xff]  }
  0x19   : > { %v1833_v31 = vld [vmem:[%s1896_s26 + $0xe0] sm:$0xff]   ;;  %v1835_v33 = vld [vmem:[%s1896_s26 + $0xe8] sm:$0xff]   ;;  %v1837_v35 = vld [vmem:[%s1896_s26 + $0xf0] sm:$0xff]  }
  0x1a   : > { %1720 = vmatmul.mubr.msk.bf16.vlgmr.msra.gmra.mrb[0].mxu0 %vm442_vm0, %v1810_v8  ;;  %1752 = vmatmul.mubr.msk.bf16.vlgmr.msra.gmra.mrb[0].mxu1 %vm442_vm0, %v1811_v9  ;;  %v1838_v36 = vld [vmem:[%s1896_s26 + $0x78] sm:$0xff]  }
  0x1b   : > { %1723 = vmatprep.mubr.msk.bf16.mxu0 %vm442_vm0, %v1812_v10  ;;  %1755 = vmatprep.mubr.msk.bf16.mxu1 %vm442_vm0, %v1813_v11  ;;  %v1839_v37 = vld [vmem:[%s1896_s26 + $0xf8] sm:$0xff]  }
  0x22   : > { %1724 = vmatmul.mubr.msk.bf16.gmra.mrb[4].mxu0 %vm442_vm0, %v1814_v12  ;;  %1756 = vmatmul.mubr.msk.bf16.gmra.mrb[4].mxu1 %vm442_vm0, %v1815_v13 }
  0x23   : > { %1727 = vmatprep.mubr.msk.bf16.mxu0 %vm442_vm0, %v1816_v14  ;;  %1759 = vmatprep.mubr.msk.bf16.mxu1 %vm442_vm0, %v1817_v15 }
  0x2a   : > { %1728 = vmatmul.mubr.msk.bf16.gmra.mrb[8].mxu0 %vm442_vm0, %v1818_v16  ;;  %1760 = vmatmul.mubr.msk.bf16.gmra.mrb[8].mxu1 %vm442_vm0, %v1819_v17 }
  0x2b   : > { %1731 = vmatprep.mubr.msk.bf16.mxu0 %vm442_vm0, %v1820_v18  ;;  %1763 = vmatprep.mubr.msk.bf16.mxu1 %vm442_vm0, %v1821_v19 }
  0x32   : > { %1732 = vmatmul.mubr.msk.bf16.gmra.mrb[12].mxu0 %vm442_vm0, %v1822_v20  ;;  %1764 = vmatmul.mubr.msk.bf16.gmra.mrb[12].mxu1 %vm442_vm0, %v1823_v21 }
  0x33   : > { %1735 = vmatprep.mubr.msk.bf16.mxu0 %vm442_vm0, %v1824_v22  ;;  %1767 = vmatprep.mubr.msk.bf16.mxu1 %vm442_vm0, %v1825_v23 }
  0x3a   : > { %1736 = vmatmul.mubr.msk.bf16.gmra.mrb[16].mxu0 %vm442_vm0, %v1826_v24  ;;  %1768 = vmatmul.mubr.msk.bf16.gmra.mrb[16].mxu1 %vm442_vm0, %v1827_v25 }
  0x3b   : > { %1739 = vmatprep.mubr.msk.bf16.mxu0 %vm442_vm0, %v1828_v26  ;;  %1771 = vmatprep.mubr.msk.bf16.mxu1 %vm442_vm0, %v1829_v27 }
  0x42   : > { %1740 = vmatmul.mubr.msk.bf16.gmra.mrb[20].mxu0 %vm442_vm0, %v1830_v28  ;;  %1772 = vmatmul.mubr.msk.bf16.gmra.mrb[20].mxu1 %vm442_vm0, %v1831_v29 }
  0x43   : > { %1743 = vmatprep.mubr.msk.bf16.mxu0 %vm442_vm0, %v1832_v30  ;;  %1775 = vmatprep.mubr.msk.bf16.mxu1 %vm442_vm0, %v1833_v31 }
  0x4a   : > { %1744 = vmatmul.mubr.msk.bf16.gmra.mrb[24].mxu0 %vm442_vm0, %v1834_v32  ;;  %1776 = vmatmul.mubr.msk.bf16.gmra.mrb[24].mxu1 %vm442_vm0, %v1835_v33 }
  0x4b   : > { %1747 = vmatprep.mubr.msk.bf16.mxu0 %vm442_vm0, %v1836_v34  ;;  %1779 = vmatprep.mubr.msk.bf16.mxu1 %vm442_vm0, %v1837_v35 }
  0x52   : > { %1748 = vmatmul.mubr.msk.bf16.gmra.mrb[28].mxu0 %vm442_vm0, %v1838_v36  ;;  %1780 = vmatmul.mubr.msk.bf16.gmra.mrb[28].mxu1 %vm442_vm0, %v1839_v37 }
  0xed   : > { %v1721_v39 = vpop.f32.mrb[0].mxu0  ;;  %v1753_v40 = vpop.f32.mrb[0].mxu1 }
  0xee   : > { %v586_v41 = vadd.f32 %v1721_v39, %v1968_v38  ;;  %v714_v42 = vadd.f32 %v1753_v40, %v1968_v38  ;;  %v577_v43 = vpop.f32.mrb[1].mxu0  ;;  %v705_v44 = vpop.f32.mrb[1].mxu1 }
  0xef   : > { %v578_v45 = vadd.f32 %v1968_v38, %v577_v43  ;;  %v706_v46 = vadd.f32 %v1968_v38, %v705_v44  ;;  %v1722_v47 = vpop.f32.mrb[2].mxu0  ;;  %v1754_v48 = vpop.f32.mrb[2].mxu1 }
  0xf0   : > { %v589_v49 = vadd.f32 %v1722_v47, %v1968_v38  ;;  %v717_v50 = vadd.f32 %v1754_v48, %v1968_v38  ;;  %v580_v51 = vpop.f32.mrb[3].mxu0  ;;  %v708_v52 = vpop.f32.mrb[3].mxu1  ;;  %v834_v55 = vmax.f32 %v586_v41, 0.0  ;;  %v866_v56 = vmax.f32 %v714_v42, 0.0 }
  0xf1   : > { %v581_v53 = vadd.f32 %v1968_v38, %v580_v51  ;;  %v709_v54 = vadd.f32 %v1968_v38, %v708_v52  ;;  %v832_v59 = vmax.f32 %v578_v45, 0.0  ;;  %v864_v60 = vmax.f32 %v706_v46, 0.0 }
  0xf2   : > { %v835_v57 = vmax.f32 %v589_v49, 0.0  ;;  %v867_v58 = vmax.f32 %v717_v50, 0.0 }
  0xf3   : > { %v833_v61 = vmax.f32 %v581_v53, 0.0  ;;  %v865_v62 = vmax.f32 %v709_v54, 0.0 }
  0xf4   : > { %v1489_v63 = vpack.c.bf16 %v835_v57, %v834_v55  ;;  %v1569_v0 = vpack.c.bf16 %v867_v58, %v866_v56 }
  0xf5   : > { %v1484_v1 = vpack.c.bf16 %v833_v61, %v832_v59  ;;  %v1564_v2 = vpack.c.bf16 %v865_v62, %v864_v60  ;;  %v1725_v3 = vpop.f32.mrb[4].mxu0  ;;  %v1757_v4 = vpop.f32.mrb[4].mxu1 }
  0xf6   : > { %1641 = vst [vmem:[%s1983_s6 + $0x8] sm:$0xff] %v1489_v63   ;;  %1657 = vst [vmem:[%s1983_s6 + $0x88] sm:$0xff] %v1569_v0   ;;  %v602_v5 = vadd.f32 %v1725_v3, %v1968_v38  ;;  %v730_v6 = vadd.f32 %v1757_v4, %v1968_v38  ;;  %v593_v7 = vpop.f32.mrb[5].mxu0  ;;  %v721_v8 = vpop.f32.mrb[5].mxu1 }
  0xf7   : > { %1485 = vst [vmem:[%s1983_s6] sm:$0xff] %v1484_v1   ;;  %1656 = vst [vmem:[%s1983_s6 + $0x80] sm:$0xff] %v1564_v2   ;;  %v594_v9 = vadd.f32 %v1968_v38, %v593_v7  ;;  %v722_v10 = vadd.f32 %v1968_v38, %v721_v8  ;;  %v1726_v11 = vpop.f32.mrb[6].mxu0  ;;  %v1758_v12 = vpop.f32.mrb[6].mxu1 }
  0xf8   : > { %v605_v13 = vadd.f32 %v1726_v11, %v1968_v38  ;;  %v733_v14 = vadd.f32 %v1758_v12, %v1968_v38  ;;  %v596_v15 = vpop.f32.mrb[7].mxu0  ;;  %v724_v16 = vpop.f32.mrb[7].mxu1  ;;  %v838_v19 = vmax.f32 %v602_v5, 0.0  ;;  %v870_v20 = vmax.f32 %v730_v6, 0.0 }
  0xf9   : > { %v597_v17 = vadd.f32 %v1968_v38, %v596_v15  ;;  %v725_v18 = vadd.f32 %v1968_v38, %v724_v16  ;;  %v836_v23 = vmax.f32 %v594_v9, 0.0  ;;  %v868_v24 = vmax.f32 %v722_v10, 0.0 }
  0xfa   : > { %v839_v21 = vmax.f32 %v605_v13, 0.0  ;;  %v871_v22 = vmax.f32 %v733_v14, 0.0 }
  0xfb   : > { %v837_v25 = vmax.f32 %v597_v17, 0.0  ;;  %v869_v26 = vmax.f32 %v725_v18, 0.0 }
  0xfc   : > { %v1499_v27 = vpack.c.bf16 %v839_v21, %v838_v19  ;;  %v1579_v28 = vpack.c.bf16 %v871_v22, %v870_v20 }
  0xfd   : > { %v1494_v29 = vpack.c.bf16 %v837_v25, %v836_v23  ;;  %v1574_v30 = vpack.c.bf16 %v869_v26, %v868_v24  ;;  %v1729_v31 = vpop.f32.mrb[8].mxu0  ;;  %v1761_v32 = vpop.f32.mrb[8].mxu1 }
  0xfe   : > { %1643 = vst [vmem:[%s1983_s6 + $0x18] sm:$0xff] %v1499_v27   ;;  %1659 = vst [vmem:[%s1983_s6 + $0x98] sm:$0xff] %v1579_v28   ;;  %v618_v33 = vadd.f32 %v1729_v31, %v1968_v38  ;;  %v746_v34 = vadd.f32 %v1761_v32, %v1968_v38  ;;  %v609_v35 = vpop.f32.mrb[9].mxu0  ;;  %v737_v36 = vpop.f32.mrb[9].mxu1 }
  0xff   : > { %1642 = vst [vmem:[%s1983_s6 + $0x10] sm:$0xff] %v1494_v29   ;;  %1658 = vst [vmem:[%s1983_s6 + $0x90] sm:$0xff] %v1574_v30   ;;  %v610_v37 = vadd.f32 %v1968_v38, %v609_v35  ;;  %v738_v39 = vadd.f32 %v1968_v38, %v737_v36  ;;  %v1730_v40 = vpop.f32.mrb[10].mxu0  ;;  %v1762_v41 = vpop.f32.mrb[10].mxu1 }
 0x100   : > { %v621_v42 = vadd.f32 %v1730_v40, %v1968_v38  ;;  %v749_v43 = vadd.f32 %v1762_v41, %v1968_v38  ;;  %v612_v44 = vpop.f32.mrb[11].mxu0  ;;  %v740_v45 = vpop.f32.mrb[11].mxu1  ;;  %v842_v48 = vmax.f32 %v618_v33, 0.0  ;;  %v874_v49 = vmax.f32 %v746_v34, 0.0 }
 0x101   : > { %v613_v46 = vadd.f32 %v1968_v38, %v612_v44  ;;  %v741_v47 = vadd.f32 %v1968_v38, %v740_v45  ;;  %v840_v52 = vmax.f32 %v610_v37, 0.0  ;;  %v872_v53 = vmax.f32 %v738_v39, 0.0 }
 0x102   : > { %v843_v50 = vmax.f32 %v621_v42, 0.0  ;;  %v875_v51 = vmax.f32 %v749_v43, 0.0 }
 0x103   : > { %v841_v54 = vmax.f32 %v613_v46, 0.0  ;;  %v873_v55 = vmax.f32 %v741_v47, 0.0 }
 0x104   : > { %v1509_v56 = vpack.c.bf16 %v843_v50, %v842_v48  ;;  %v1589_v57 = vpack.c.bf16 %v875_v51, %v874_v49 }
 0x105   : > { %v1504_v58 = vpack.c.bf16 %v841_v54, %v840_v52  ;;  %v1584_v59 = vpack.c.bf16 %v873_v55, %v872_v53  ;;  %v1733_v60 = vpop.f32.mrb[12].mxu0  ;;  %v1765_v61 = vpop.f32.mrb[12].mxu1 }
 0x106   : > { %1645 = vst [vmem:[%s1983_s6 + $0x28] sm:$0xff] %v1509_v56   ;;  %1661 = vst [vmem:[%s1983_s6 + $0xa8] sm:$0xff] %v1589_v57   ;;  %v634_v62 = vadd.f32 %v1733_v60, %v1968_v38  ;;  %v762_v63 = vadd.f32 %v1765_v61, %v1968_v38  ;;  %v625_v0 = vpop.f32.mrb[13].mxu0  ;;  %v753_v1 = vpop.f32.mrb[13].mxu1 }
 0x107   : > { %1644 = vst [vmem:[%s1983_s6 + $0x20] sm:$0xff] %v1504_v58   ;;  %1660 = vst [vmem:[%s1983_s6 + $0xa0] sm:$0xff] %v1584_v59   ;;  %v626_v2 = vadd.f32 %v1968_v38, %v625_v0  ;;  %v754_v3 = vadd.f32 %v1968_v38, %v753_v1  ;;  %v1734_v4 = vpop.f32.mrb[14].mxu0  ;;  %v1766_v5 = vpop.f32.mrb[14].mxu1 }
 0x108   : > { %v637_v6 = vadd.f32 %v1734_v4, %v1968_v38  ;;  %v765_v7 = vadd.f32 %v1766_v5, %v1968_v38  ;;  %v628_v8 = vpop.f32.mrb[15].mxu0  ;;  %v756_v9 = vpop.f32.mrb[15].mxu1  ;;  %v846_v12 = vmax.f32 %v634_v62, 0.0  ;;  %v878_v13 = vmax.f32 %v762_v63, 0.0 }
 0x109   : > { %v629_v10 = vadd.f32 %v1968_v38, %v628_v8  ;;  %v757_v11 = vadd.f32 %v1968_v38, %v756_v9  ;;  %v844_v16 = vmax.f32 %v626_v2, 0.0  ;;  %v876_v17 = vmax.f32 %v754_v3, 0.0 }
 0x10a   : > { %v847_v14 = vmax.f32 %v637_v6, 0.0  ;;  %v879_v15 = vmax.f32 %v765_v7, 0.0 }
 0x10b   : > { %v845_v18 = vmax.f32 %v629_v10, 0.0  ;;  %v877_v19 = vmax.f32 %v757_v11, 0.0 }
 0x10c   : > { %v1519_v20 = vpack.c.bf16 %v847_v14, %v846_v12  ;;  %v1599_v21 = vpack.c.bf16 %v879_v15, %v878_v13 }
 0x10d   : > { %v1514_v22 = vpack.c.bf16 %v845_v18, %v844_v16  ;;  %v1594_v23 = vpack.c.bf16 %v877_v19, %v876_v17  ;;  %v1737_v24 = vpop.f32.mrb[16].mxu0  ;;  %v1769_v25 = vpop.f32.mrb[16].mxu1 }
 0x10e   : > { %1647 = vst [vmem:[%s1983_s6 + $0x38] sm:$0xff] %v1519_v20   ;;  %1663 = vst [vmem:[%s1983_s6 + $0xb8] sm:$0xff] %v1599_v21   ;;  %v650_v26 = vadd.f32 %v1737_v24, %v1968_v38  ;;  %v778_v27 = vadd.f32 %v1769_v25, %v1968_v38  ;;  %v641_v28 = vpop.f32.mrb[17].mxu0  ;;  %v769_v29 = vpop.f32.mrb[17].mxu1 }
 0x10f   : > { %1646 = vst [vmem:[%s1983_s6 + $0x30] sm:$0xff] %v1514_v22   ;;  %1662 = vst [vmem:[%s1983_s6 + $0xb0] sm:$0xff] %v1594_v23   ;;  %v642_v30 = vadd.f32 %v1968_v38, %v641_v28  ;;  %v770_v31 = vadd.f32 %v1968_v38, %v769_v29  ;;  %v1738_v32 = vpop.f32.mrb[18].mxu0  ;;  %v1770_v33 = vpop.f32.mrb[18].mxu1 }
 0x110   : > { %v653_v34 = vadd.f32 %v1738_v32, %v1968_v38  ;;  %v781_v35 = vadd.f32 %v1770_v33, %v1968_v38  ;;  %v644_v36 = vpop.f32.mrb[19].mxu0  ;;  %v772_v37 = vpop.f32.mrb[19].mxu1  ;;  %v850_v41 = vmax.f32 %v650_v26, 0.0  ;;  %v882_v42 = vmax.f32 %v778_v27, 0.0 }
 0x111   : > { %v645_v39 = vadd.f32 %v1968_v38, %v644_v36  ;;  %v773_v40 = vadd.f32 %v1968_v38, %v772_v37  ;;  %v848_v45 = vmax.f32 %v642_v30, 0.0  ;;  %v880_v46 = vmax.f32 %v770_v31, 0.0 }
 0x112   : > { %v851_v43 = vmax.f32 %v653_v34, 0.0  ;;  %v883_v44 = vmax.f32 %v781_v35, 0.0 }
 0x113   : > { %v849_v47 = vmax.f32 %v645_v39, 0.0  ;;  %v881_v48 = vmax.f32 %v773_v40, 0.0 }
 0x114   : > { %v1529_v49 = vpack.c.bf16 %v851_v43, %v850_v41  ;;  %v1609_v50 = vpack.c.bf16 %v883_v44, %v882_v42 }
 0x115   : > { %v1524_v51 = vpack.c.bf16 %v849_v47, %v848_v45  ;;  %v1604_v52 = vpack.c.bf16 %v881_v48, %v880_v46  ;;  %v1741_v53 = vpop.f32.mrb[20].mxu0  ;;  %v1773_v54 = vpop.f32.mrb[20].mxu1 }
 0x116   : > { %1649 = vst [vmem:[%s1983_s6 + $0x48] sm:$0xff] %v1529_v49   ;;  %1665 = vst [vmem:[%s1983_s6 + $0xc8] sm:$0xff] %v1609_v50   ;;  %v666_v55 = vadd.f32 %v1741_v53, %v1968_v38  ;;  %v794_v56 = vadd.f32 %v1773_v54, %v1968_v38  ;;  %v657_v57 = vpop.f32.mrb[21].mxu0  ;;  %v785_v58 = vpop.f32.mrb[21].mxu1 }
 0x117   : > { %1648 = vst [vmem:[%s1983_s6 + $0x40] sm:$0xff] %v1524_v51   ;;  %1664 = vst [vmem:[%s1983_s6 + $0xc0] sm:$0xff] %v1604_v52   ;;  %v658_v59 = vadd.f32 %v1968_v38, %v657_v57  ;;  %v786_v60 = vadd.f32 %v1968_v38, %v785_v58  ;;  %v1742_v61 = vpop.f32.mrb[22].mxu0  ;;  %v1774_v62 = vpop.f32.mrb[22].mxu1 }
 0x118   : > { %v669_v63 = vadd.f32 %v1742_v61, %v1968_v38  ;;  %v797_v0 = vadd.f32 %v1774_v62, %v1968_v38  ;;  %v660_v1 = vpop.f32.mrb[23].mxu0  ;;  %v788_v2 = vpop.f32.mrb[23].mxu1  ;;  %v854_v5 = vmax.f32 %v666_v55, 0.0  ;;  %v886_v6 = vmax.f32 %v794_v56, 0.0 }
 0x119   : > { %v661_v3 = vadd.f32 %v1968_v38, %v660_v1  ;;  %v789_v4 = vadd.f32 %v1968_v38, %v788_v2  ;;  %v852_v9 = vmax.f32 %v658_v59, 0.0  ;;  %v884_v10 = vmax.f32 %v786_v60, 0.0 }
 0x11a   : > { %v855_v7 = vmax.f32 %v669_v63, 0.0  ;;  %v887_v8 = vmax.f32 %v797_v0, 0.0 }
 0x11b   : > { %v853_v11 = vmax.f32 %v661_v3, 0.0  ;;  %v885_v12 = vmax.f32 %v789_v4, 0.0 }
 0x11c   : > { %v1539_v13 = vpack.c.bf16 %v855_v7, %v854_v5  ;;  %v1619_v14 = vpack.c.bf16 %v887_v8, %v886_v6 }
 0x11d   : > { %v1534_v15 = vpack.c.bf16 %v853_v11, %v852_v9  ;;  %v1614_v16 = vpack.c.bf16 %v885_v12, %v884_v10  ;;  %v1745_v17 = vpop.f32.mrb[24].mxu0  ;;  %v1777_v18 = vpop.f32.mrb[24].mxu1 }
 0x11e   : > { %1651 = vst [vmem:[%s1983_s6 + $0x58] sm:$0xff] %v1539_v13   ;;  %1667 = vst [vmem:[%s1983_s6 + $0xd8] sm:$0xff] %v1619_v14   ;;  %v682_v19 = vadd.f32 %v1745_v17, %v1968_v38  ;;  %v810_v20 = vadd.f32 %v1777_v18, %v1968_v38  ;;  %v673_v21 = vpop.f32.mrb[25].mxu0  ;;  %v801_v22 = vpop.f32.mrb[25].mxu1 }
 0x11f   : > { %1650 = vst [vmem:[%s1983_s6 + $0x50] sm:$0xff] %v1534_v15   ;;  %1666 = vst [vmem:[%s1983_s6 + $0xd0] sm:$0xff] %v1614_v16   ;;  %v674_v23 = vadd.f32 %v1968_v38, %v673_v21  ;;  %v802_v24 = vadd.f32 %v1968_v38, %v801_v22  ;;  %v1746_v25 = vpop.f32.mrb[26].mxu0  ;;  %v1778_v26 = vpop.f32.mrb[26].mxu1 }
 0x120   : > { %v685_v27 = vadd.f32 %v1746_v25, %v1968_v38  ;;  %v813_v28 = vadd.f32 %v1778_v26, %v1968_v38  ;;  %v676_v29 = vpop.f32.mrb[27].mxu0  ;;  %v804_v30 = vpop.f32.mrb[27].mxu1  ;;  %v858_v33 = vmax.f32 %v682_v19, 0.0  ;;  %v890_v34 = vmax.f32 %v810_v20, 0.0 }
 0x121   : > { %v677_v31 = vadd.f32 %v1968_v38, %v676_v29  ;;  %v805_v32 = vadd.f32 %v1968_v38, %v804_v30  ;;  %v856_v37 = vmax.f32 %v674_v23, 0.0  ;;  %v888_v39 = vmax.f32 %v802_v24, 0.0 }
 0x122   : > { %v859_v35 = vmax.f32 %v685_v27, 0.0  ;;  %v891_v36 = vmax.f32 %v813_v28, 0.0 }
 0x123   : > { %v857_v40 = vmax.f32 %v677_v31, 0.0  ;;  %v889_v41 = vmax.f32 %v805_v32, 0.0 }
 0x124   : > { %v1549_v42 = vpack.c.bf16 %v859_v35, %v858_v33  ;;  %v1629_v43 = vpack.c.bf16 %v891_v36, %v890_v34 }
 0x125   : > { %v1544_v44 = vpack.c.bf16 %v857_v40, %v856_v37  ;;  %v1624_v45 = vpack.c.bf16 %v889_v41, %v888_v39  ;;  %v1749_v46 = vpop.f32.mrb[28].mxu0  ;;  %v1781_v47 = vpop.f32.mrb[28].mxu1 }
 0x126   : > { %1653 = vst [vmem:[%s1983_s6 + $0x68] sm:$0xff] %v1549_v42   ;;  %1669 = vst [vmem:[%s1983_s6 + $0xe8] sm:$0xff] %v1629_v43   ;;  %v698_v48 = vadd.f32 %v1749_v46, %v1968_v38  ;;  %v826_v49 = vadd.f32 %v1781_v47, %v1968_v38  ;;  %v689_v50 = vpop.f32.mrb[29].mxu0  ;;  %v817_v51 = vpop.f32.mrb[29].mxu1 }
 0x127   : > { %1652 = vst [vmem:[%s1983_s6 + $0x60] sm:$0xff] %v1544_v44   ;;  %1668 = vst [vmem:[%s1983_s6 + $0xe0] sm:$0xff] %v1624_v45   ;;  %v690_v52 = vadd.f32 %v1968_v38, %v689_v50  ;;  %v818_v53 = vadd.f32 %v1968_v38, %v817_v51  ;;  %v1750_v54 = vpop.f32.mrb[30].mxu0  ;;  %v1782_v55 = vpop.f32.mrb[30].mxu1 }
 0x128   : > { %v701_v56 = vadd.f32 %v1750_v54, %v1968_v38  ;;  %v829_v57 = vadd.f32 %v1782_v55, %v1968_v38  ;;  %v692_v58 = vpop.f32.mrb[31].mxu0  ;;  %v820_v59 = vpop.f32.mrb[31].mxu1  ;;  %v862_v62 = vmax.f32 %v698_v48, 0.0  ;;  %v894_v63 = vmax.f32 %v826_v49, 0.0 }
 0x129   : > { %v693_v60 = vadd.f32 %v1968_v38, %v692_v58  ;;  %v821_v61 = vadd.f32 %v1968_v38, %v820_v59  ;;  %v860_v2 = vmax.f32 %v690_v52, 0.0  ;;  %v892_v3 = vmax.f32 %v818_v53, 0.0 }
 0x12a   : > { %v863_v0 = vmax.f32 %v701_v56, 0.0  ;;  %v895_v1 = vmax.f32 %v829_v57, 0.0 }
 0x12b   : > { %v861_v4 = vmax.f32 %v693_v60, 0.0  ;;  %v893_v5 = vmax.f32 %v821_v61, 0.0 }
 0x12c   : > { %v1559_v6 = vpack.c.bf16 %v863_v0, %v862_v62  ;;  %v1639_v7 = vpack.c.bf16 %v895_v1, %v894_v63 }
 0x12d   : > { %v1554_v8 = vpack.c.bf16 %v861_v4, %v860_v2  ;;  %v1634_v9 = vpack.c.bf16 %v893_v5, %v892_v3 }
 0x12e   : > { %1655 = vst [vmem:[%s1983_s6 + $0x78] sm:$0xff] %v1559_v6   ;;  %1671 = vst [vmem:[%s1983_s6 + $0xf8] sm:$0xff] %v1639_v7  }
 0x12f   : > { %1654 = vst [vmem:[%s1983_s6 + $0x70] sm:$0xff] %v1554_v8   ;;  %1670 = vst [vmem:[%s1983_s6 + $0xf0] sm:$0xff] %v1634_v9  }
 0x130 PF: > { %s13_s12 = sadd.s32 1, %s1846_s12  }
 0x131   : > { %p10_p4 = scmp.ge.s32.totalorder %s13_s12, 5  }
 0x133   :  { %12 = sbr.rel (!%p10_p4) target bundleno = 1 (0x1), region = 62 }

// kernel: net_forward.7
= control target key start
LH: loop header
LB: loop body
LE: loop exit
PB: predicated region body
PF: predicated region fallthrough
CT: control target
= control target key end

     0   :  { %v969_v0 = vmov 0   ;;  %vm270_vm0 = vcmask 130048   ;;  %s1214_s1 = inlined_call_operand.vmem [shape: bf16[144,128], index: 1, kind: input, shape index: {}]   ;;  %s1215_s0 = inlined_call_operand.vmem [shape: bf16[256,144], index: 0, kind: input, shape index: {}]   ;;  %s1216_s2 = inlined_call_operand.vmem [shape: f32[1,128], index: 2, kind: input, shape index: {}]   ;;  %s1217_s3 = inlined_call_operand.vmem [shape: bf16[256,128], index: 3, kind: output, shape index: {}]  }
   0x1   :  { %319 = vmatprep.subr.bf16.mxu0 %v969_v0  ;;  %893 = vmatprep.subr.bf16.mxu1 %v969_v0  ;;  %v912_v1 = vld [vmem:[%s1214_s1] sm:$0xff]   ;;  %v913_v2 = vld [vmem:[%s1214_s1 + $0x8] sm:$0xff]   ;;  %v914_v3 = vld [vmem:[%s1214_s1 + $0x10] sm:$0xff]  }
   0x2   :  { %320 = vmatpush1.bf16.msra.mxu0 %v912_v1  ;;  %902 = vmatpush1.bf16.msra.mxu1 %v912_v1  ;;  %v915_v4 = vld [vmem:[%s1214_s1 + $0x18] sm:$0xff]   ;;  %v923_v5 = vld [vmem:[%s1215_s0 + $0x4] ss:$8 sps:$4 sm:$0xff]   ;;  %v918_v9 = vld [vmem:[%s1214_s1 + $0x30] sm:$0xff]  }
   0x3   :  { %321 = vmatprep.subr.bf16.mxu0 %v969_v0  ;;  %894 = vmatprep.subr.bf16.mxu1 %v969_v0  ;;  %v926_v6 = vld [vmem:[%s1215_s0 + $0x84] ss:$8 sps:$4 sm:$0xff]   ;;  %v919_v10 = vld [vmem:[%s1214_s1 + $0x38] sm:$0xff]   ;;  %v921_v12 = vld [vmem:[%s1215_s0] ss:$8 sps:$4 sm:$0xff]  }
   0x4   :  { %718 = vmatprep.mubr.msk.bf16.mxu0 %vm270_vm0, %v923_v5  ;;  %726 = vmatprep.mubr.msk.bf16.mxu1 %vm270_vm0, %v926_v6  ;;  %v916_v7 = vld [vmem:[%s1214_s1 + $0x20] sm:$0xff]   ;;  %v917_v8 = vld [vmem:[%s1214_s1 + $0x28] sm:$0xff]   ;;  %v927_v14 = vld [vmem:[%s1215_s0 + $0x14] ss:$8 sps:$4 sm:$0xff]  }
   0x5   :  { %v920_v11 = vld [vmem:[%s1214_s1 + $0x40] sm:$0xff]   ;;  %v929_v15 = vld [vmem:[%s1215_s0 + $0x94] ss:$8 sps:$4 sm:$0xff]   ;;  %v931_v16 = vld [vmem:[%s1215_s0 + $0x10] ss:$8 sps:$4 sm:$0xff]  }
   0x6   :  { %322 = vmatpush1.bf16.msra.mxu0 %v913_v2  ;;  %903 = vmatpush1.bf16.msra.mxu1 %v913_v2  ;;  %v924_v13 = vld [vmem:[%s1215_s0 + $0x80] ss:$8 sps:$4 sm:$0xff]   ;;  %v932_v17 = vld [vmem:[%s1215_s0 + $0x90] ss:$8 sps:$4 sm:$0xff]   ;;  %v933_v18 = vld [vmem:[%s1215_s0 + $0x24] ss:$8 sps:$4 sm:$0xff]  }
   0x7   :  { %323 = vmatprep.subr.bf16.mxu0 %v969_v0  ;;  %895 = vmatprep.subr.bf16.mxu1 %v969_v0  ;;  %v935_v19 = vld [vmem:[%s1215_s0 + $0xa4] ss:$8 sps:$4 sm:$0xff]   ;;  %v937_v20 = vld [vmem:[%s1215_s0 + $0x20] ss:$8 sps:$4 sm:$0xff]   ;;  %v939_v22 = vld [vmem:[%s1215_s0 + $0x34] ss:$8 sps:$4 sm:$0xff]  }
   0x8   :  { %v938_v21 = vld [vmem:[%s1215_s0 + $0xa0] ss:$8 sps:$4 sm:$0xff]   ;;  %v941_v23 = vld [vmem:[%s1215_s0 + $0xb4] ss:$8 sps:$4 sm:$0xff]   ;;  %v943_v24 = vld [vmem:[%s1215_s0 + $0x30] ss:$8 sps:$4 sm:$0xff]  }
   0x9   :  { %v944_v25 = vld [vmem:[%s1215_s0 + $0xb0] ss:$8 sps:$4 sm:$0xff]   ;;  %v945_v26 = vld [vmem:[%s1215_s0 + $0x44] ss:$8 sps:$4 sm:$0xff]   ;;  %v949_v28 = vld [vmem:[%s1215_s0 + $0x40] ss:$8 sps:$4 sm:$0xff]  }
   0xa   :  { %324 = vmatpush1.bf16.msra.mxu0 %v914_v3  ;;  %904 = vmatpush1.bf16.msra.mxu1 %v914_v3  ;;  %v947_v27 = vld [vmem:[%s1215_s0 + $0xc4] ss:$8 sps:$4 sm:$0xff]   ;;  %v950_v29 = vld [vmem:[%s1215_s0 + $0xc0] ss:$8 sps:$4 sm:$0xff]   ;;  %v951_v30 = vld [vmem:[%s1215_s0 + $0x54] ss:$8 sps:$4 sm:$0xff]  }
   0xb   :  { %325 = vmatprep.subr.bf16.mxu0 %v969_v0  ;;  %896 = vmatprep.subr.bf16.mxu1 %v969_v0  ;;  %v953_v31 = vld [vmem:[%s1215_s0 + $0xd4] ss:$8 sps:$4 sm:$0xff]   ;;  %v955_v32 = vld [vmem:[%s1215_s0 + $0x50] ss:$8 sps:$4 sm:$0xff]   ;;  %v957_v34 = vld [vmem:[%s1215_s0 + $0x64] ss:$8 sps:$4 sm:$0xff]  }
   0xc   :  { %v956_v33 = vld [vmem:[%s1215_s0 + $0xd0] ss:$8 sps:$4 sm:$0xff]   ;;  %v959_v35 = vld [vmem:[%s1215_s0 + $0xe4] ss:$8 sps:$4 sm:$0xff]   ;;  %v961_v36 = vld [vmem:[%s1215_s0 + $0x60] ss:$8 sps:$4 sm:$0xff]  }
   0xd   :  { %v962_v37 = vld [vmem:[%s1215_s0 + $0xe0] ss:$8 sps:$4 sm:$0xff]   ;;  %v963_v38 = vld [vmem:[%s1215_s0 + $0x74] ss:$8 sps:$4 sm:$0xff]   ;;  %v967_v40 = vld [vmem:[%s1215_s0 + $0x70] ss:$8 sps:$4 sm:$0xff]  }
   0xe   :  { %326 = vmatpush1.bf16.msra.mxu0 %v915_v4  ;;  %905 = vmatpush1.bf16.msra.mxu1 %v915_v4  ;;  %v965_v39 = vld [vmem:[%s1215_s0 + $0xf4] ss:$8 sps:$4 sm:$0xff]   ;;  %v968_v41 = vld [vmem:[%s1215_s0 + $0xf0] ss:$8 sps:$4 sm:$0xff]   ;;  %v1132_v42 = vld [vmem:[%s1216_s2] ss:$0 sm:$0xff] }
   0xf   :  { %327 = vmatprep.subr.bf16.mxu0 %v969_v0  ;;  %897 = vmatprep.subr.bf16.mxu1 %v969_v0 }
  0x12   :  { %328 = vmatpush1.bf16.msra.mxu0 %v916_v7  ;;  %906 = vmatpush1.bf16.msra.mxu1 %v916_v7 }
  0x13   :  { %329 = vmatprep.subr.bf16.mxu0 %v969_v0  ;;  %898 = vmatprep.subr.bf16.mxu1 %v969_v0 }
  0x16   :  { %330 = vmatpush1.bf16.msra.mxu0 %v917_v8  ;;  %907 = vmatpush1.bf16.msra.mxu1 %v917_v8 }
  0x17   :  { %331 = vmatprep.subr.bf16.mxu0 %v969_v0  ;;  %899 = vmatprep.subr.bf16.mxu1 %v969_v0 }
  0x1a   :  { %332 = vmatpush1.bf16.msra.mxu0 %v918_v9  ;;  %908 = vmatpush1.bf16.msra.mxu1 %v918_v9 }
  0x1b   :  { %333 = vmatprep.subr.bf16.mxu0 %v969_v0  ;;  %900 = vmatprep.subr.bf16.mxu1 %v969_v0 }
  0x1e   :  { %334 = vmatpush1.bf16.msra.mxu0 %v919_v10  ;;  %909 = vmatpush1.bf16.msra.mxu1 %v919_v10 }
  0x1f   :  { %335 = vmatprep.subr.bf16.mxu0 %v969_v0  ;;  %901 = vmatprep.subr.bf16.mxu1 %v969_v0 }
  0x22   :  { %336 = vmatpush1.bf16.msra.mxu0 %v920_v11  ;;  %910 = vmatpush1.bf16.msra.mxu1 %v920_v11 }
  0x25   :  { %352 = vmatmul.mubr.bf16.vlgmr.msra.gmra.mrb[0].mxu0 %v921_v12  ;;  %416 = vmatmul.mubr.bf16.vlgmr.msra.gmra.mrb[0].mxu1 %v924_v13 }
  0x26   :  { %719 = vmatprep.mubr.msk.bf16.mxu0 %vm270_vm0, %v927_v14  ;;  %727 = vmatprep.mubr.msk.bf16.mxu1 %vm270_vm0, %v929_v15 }
  0x2d   :  { %360 = vmatmul.mubr.bf16.gmra.mrb[4].mxu0 %v931_v16  ;;  %424 = vmatmul.mubr.bf16.gmra.mrb[4].mxu1 %v932_v17 }
  0x2e   :  { %720 = vmatprep.mubr.msk.bf16.mxu0 %vm270_vm0, %v933_v18  ;;  %728 = vmatprep.mubr.msk.bf16.mxu1 %vm270_vm0, %v935_v19 }
  0x35   :  { %368 = vmatmul.mubr.bf16.gmra.mrb[8].mxu0 %v937_v20  ;;  %432 = vmatmul.mubr.bf16.gmra.mrb[8].mxu1 %v938_v21 }
  0x36   :  { %721 = vmatprep.mubr.msk.bf16.mxu0 %vm270_vm0, %v939_v22  ;;  %729 = vmatprep.mubr.msk.bf16.mxu1 %vm270_vm0, %v941_v23 }
  0x3d   :  { %376 = vmatmul.mubr.bf16.gmra.mrb[12].mxu0 %v943_v24  ;;  %440 = vmatmul.mubr.bf16.gmra.mrb[12].mxu1 %v944_v25 }
  0x3e   :  { %722 = vmatprep.mubr.msk.bf16.mxu0 %vm270_vm0, %v945_v26  ;;  %730 = vmatprep.mubr.msk.bf16.mxu1 %vm270_vm0, %v947_v27 }
  0x45   :  { %384 = vmatmul.mubr.bf16.gmra.mrb[16].mxu0 %v949_v28  ;;  %448 = vmatmul.mubr.bf16.gmra.mrb[16].mxu1 %v950_v29 }
  0x46   :  { %723 = vmatprep.mubr.msk.bf16.mxu0 %vm270_vm0, %v951_v30  ;;  %731 = vmatprep.mubr.msk.bf16.mxu1 %vm270_vm0, %v953_v31 }
  0x4d   :  { %392 = vmatmul.mubr.bf16.gmra.mrb[20].mxu0 %v955_v32  ;;  %456 = vmatmul.mubr.bf16.gmra.mrb[20].mxu1 %v956_v33 }
  0x4e   :  { %724 = vmatprep.mubr.msk.bf16.mxu0 %vm270_vm0, %v957_v34  ;;  %732 = vmatprep.mubr.msk.bf16.mxu1 %vm270_vm0, %v959_v35 }
  0x55   :  { %400 = vmatmul.mubr.bf16.gmra.mrb[24].mxu0 %v961_v36  ;;  %464 = vmatmul.mubr.bf16.gmra.mrb[24].mxu1 %v962_v37 }
  0x56   :  { %725 = vmatprep.mubr.msk.bf16.mxu0 %vm270_vm0, %v963_v38  ;;  %733 = vmatprep.mubr.msk.bf16.mxu1 %vm270_vm0, %v965_v39 }
  0x5d   :  { %408 = vmatmul.mubr.bf16.gmra.mrb[28].mxu0 %v967_v40  ;;  %472 = vmatmul.mubr.bf16.gmra.mrb[28].mxu1 %v968_v41 }
  0xf8   :  { %v353_v43 = vpop.f32.mrb[0].mxu0  ;;  %v417_v44 = vpop.f32.mrb[0].mxu1 }
  0xf9   :  { %v354_v45 = vadd.f32 %v1132_v42, %v353_v43  ;;  %v418_v46 = vadd.f32 %v1132_v42, %v417_v44  ;;  %v355_v47 = vpop.f32.mrb[1].mxu0  ;;  %v419_v48 = vpop.f32.mrb[1].mxu1 }
  0xfa   :  { %v356_v49 = vpop.f32.mrb[2].mxu0  ;;  %v420_v50 = vpop.f32.mrb[2].mxu1 }
  0xfb   :  { %v357_v51 = vadd.f32 %v1132_v42, %v356_v49  ;;  %v421_v52 = vadd.f32 %v1132_v42, %v420_v50  ;;  %v358_v53 = vpop.f32.mrb[3].mxu0  ;;  %v422_v54 = vpop.f32.mrb[3].mxu1  ;;  %v480_v55 = vmax.f32 %v354_v45, 0.0  ;;  %v496_v56 = vmax.f32 %v418_v46, 0.0 }
  0xfd   :  { %v481_v57 = vmax.f32 %v357_v51, 0.0  ;;  %v497_v58 = vmax.f32 %v421_v52, 0.0 }
  0xff   :  { %v801_v59 = vpack.c.bf16 %v481_v57, %v480_v55  ;;  %v841_v60 = vpack.c.bf16 %v497_v58, %v496_v56 }
 0x100   :  { %v361_v61 = vpop.f32.mrb[4].mxu0  ;;  %v425_v62 = vpop.f32.mrb[4].mxu1 }
 0x101   :  { %802 = vst [vmem:[%s1217_s3] sm:$0xff] %v801_v59   ;;  %885 = vst [vmem:[%s1217_s3 + $0x40] sm:$0xff] %v841_v60   ;;  %v362_v63 = vadd.f32 %v1132_v42, %v361_v61  ;;  %v426_v0 = vadd.f32 %v1132_v42, %v425_v62  ;;  %v363_v1 = vpop.f32.mrb[5].mxu0  ;;  %v427_v2 = vpop.f32.mrb[5].mxu1 }
 0x102   :  { %v364_v3 = vpop.f32.mrb[6].mxu0  ;;  %v428_v4 = vpop.f32.mrb[6].mxu1 }
 0x103   :  { %v365_v5 = vadd.f32 %v1132_v42, %v364_v3  ;;  %v429_v6 = vadd.f32 %v1132_v42, %v428_v4  ;;  %v366_v7 = vpop.f32.mrb[7].mxu0  ;;  %v430_v8 = vpop.f32.mrb[7].mxu1  ;;  %v482_v9 = vmax.f32 %v362_v63, 0.0  ;;  %v498_v10 = vmax.f32 %v426_v0, 0.0 }
 0x105   :  { %v483_v11 = vmax.f32 %v365_v5, 0.0  ;;  %v499_v12 = vmax.f32 %v429_v6, 0.0 }
 0x107   :  { %v806_v13 = vpack.c.bf16 %v483_v11, %v482_v9  ;;  %v846_v14 = vpack.c.bf16 %v499_v12, %v498_v10 }
 0x108   :  { %v369_v15 = vpop.f32.mrb[8].mxu0  ;;  %v433_v16 = vpop.f32.mrb[8].mxu1 }
 0x109   :  { %878 = vst [vmem:[%s1217_s3 + $0x8] sm:$0xff] %v806_v13   ;;  %886 = vst [vmem:[%s1217_s3 + $0x48] sm:$0xff] %v846_v14   ;;  %v370_v17 = vadd.f32 %v1132_v42, %v369_v15  ;;  %v434_v18 = vadd.f32 %v1132_v42, %v433_v16  ;;  %v371_v19 = vpop.f32.mrb[9].mxu0  ;;  %v435_v20 = vpop.f32.mrb[9].mxu1 }
 0x10a   :  { %v372_v21 = vpop.f32.mrb[10].mxu0  ;;  %v436_v22 = vpop.f32.mrb[10].mxu1 }
 0x10b   :  { %v373_v23 = vadd.f32 %v1132_v42, %v372_v21  ;;  %v437_v24 = vadd.f32 %v1132_v42, %v436_v22  ;;  %v374_v25 = vpop.f32.mrb[11].mxu0  ;;  %v438_v26 = vpop.f32.mrb[11].mxu1  ;;  %v484_v27 = vmax.f32 %v370_v17, 0.0  ;;  %v500_v28 = vmax.f32 %v434_v18, 0.0 }
 0x10d   :  { %v485_v29 = vmax.f32 %v373_v23, 0.0  ;;  %v501_v30 = vmax.f32 %v437_v24, 0.0 }
 0x10f   :  { %v811_v31 = vpack.c.bf16 %v485_v29, %v484_v27  ;;  %v851_v32 = vpack.c.bf16 %v501_v30, %v500_v28 }
 0x110   :  { %v377_v33 = vpop.f32.mrb[12].mxu0  ;;  %v441_v34 = vpop.f32.mrb[12].mxu1 }
 0x111   :  { %879 = vst [vmem:[%s1217_s3 + $0x10] sm:$0xff] %v811_v31   ;;  %887 = vst [vmem:[%s1217_s3 + $0x50] sm:$0xff] %v851_v32   ;;  %v378_v35 = vadd.f32 %v1132_v42, %v377_v33  ;;  %v442_v36 = vadd.f32 %v1132_v42, %v441_v34  ;;  %v379_v37 = vpop.f32.mrb[13].mxu0  ;;  %v443_v38 = vpop.f32.mrb[13].mxu1 }
 0x112   :  { %v380_v39 = vpop.f32.mrb[14].mxu0  ;;  %v444_v40 = vpop.f32.mrb[14].mxu1 }
 0x113   :  { %v381_v41 = vadd.f32 %v1132_v42, %v380_v39  ;;  %v445_v43 = vadd.f32 %v1132_v42, %v444_v40  ;;  %v382_v44 = vpop.f32.mrb[15].mxu0  ;;  %v446_v45 = vpop.f32.mrb[15].mxu1  ;;  %v486_v46 = vmax.f32 %v378_v35, 0.0  ;;  %v502_v47 = vmax.f32 %v442_v36, 0.0 }
 0x115   :  { %v487_v48 = vmax.f32 %v381_v41, 0.0  ;;  %v503_v49 = vmax.f32 %v445_v43, 0.0 }
 0x117   :  { %v816_v50 = vpack.c.bf16 %v487_v48, %v486_v46  ;;  %v856_v51 = vpack.c.bf16 %v503_v49, %v502_v47 }
 0x118   :  { %v385_v52 = vpop.f32.mrb[16].mxu0  ;;  %v449_v53 = vpop.f32.mrb[16].mxu1 }
 0x119   :  { %880 = vst [vmem:[%s1217_s3 + $0x18] sm:$0xff] %v816_v50   ;;  %888 = vst [vmem:[%s1217_s3 + $0x58] sm:$0xff] %v856_v51   ;;  %v386_v54 = vadd.f32 %v1132_v42, %v385_v52  ;;  %v450_v55 = vadd.f32 %v1132_v42, %v449_v53  ;;  %v387_v56 = vpop.f32.mrb[17].mxu0  ;;  %v451_v57 = vpop.f32.mrb[17].mxu1 }
 0x11a   :  { %v388_v58 = vpop.f32.mrb[18].mxu0  ;;  %v452_v59 = vpop.f32.mrb[18].mxu1 }
 0x11b   :  { %v389_v60 = vadd.f32 %v1132_v42, %v388_v58  ;;  %v453_v61 = vadd.f32 %v1132_v42, %v452_v59  ;;  %v390_v62 = vpop.f32.mrb[19].mxu0  ;;  %v454_v63 = vpop.f32.mrb[19].mxu1  ;;  %v488_v0 = vmax.f32 %v386_v54, 0.0  ;;  %v504_v1 = vmax.f32 %v450_v55, 0.0 }
 0x11d   :  { %v489_v2 = vmax.f32 %v389_v60, 0.0  ;;  %v505_v3 = vmax.f32 %v453_v61, 0.0 }
 0x11f   :  { %v821_v4 = vpack.c.bf16 %v489_v2, %v488_v0  ;;  %v861_v5 = vpack.c.bf16 %v505_v3, %v504_v1 }
 0x120   :  { %v393_v6 = vpop.f32.mrb[20].mxu0  ;;  %v457_v7 = vpop.f32.mrb[20].mxu1 }
 0x121   :  { %881 = vst [vmem:[%s1217_s3 + $0x20] sm:$0xff] %v821_v4   ;;  %889 = vst [vmem:[%s1217_s3 + $0x60] sm:$0xff] %v861_v5   ;;  %v394_v8 = vadd.f32 %v1132_v42, %v393_v6  ;;  %v458_v9 = vadd.f32 %v1132_v42, %v457_v7  ;;  %v395_v10 = vpop.f32.mrb[21].mxu0  ;;  %v459_v11 = vpop.f32.mrb[21].mxu1 }
 0x122   :  { %v396_v12 = vpop.f32.mrb[22].mxu0  ;;  %v460_v13 = vpop.f32.mrb[22].mxu1 }
 0x123   :  { %v397_v14 = vadd.f32 %v1132_v42, %v396_v12  ;;  %v461_v15 = vadd.f32 %v1132_v42, %v460_v13  ;;  %v398_v16 = vpop.f32.mrb[23].mxu0  ;;  %v462_v17 = vpop.f32.mrb[23].mxu1  ;;  %v490_v18 = vmax.f32 %v394_v8, 0.0  ;;  %v506_v19 = vmax.f32 %v458_v9, 0.0 }
 0x125   :  { %v491_v20 = vmax.f32 %v397_v14, 0.0  ;;  %v507_v21 = vmax.f32 %v461_v15, 0.0 }
 0x127   :  { %v826_v22 = vpack.c.bf16 %v491_v20, %v490_v18  ;;  %v866_v23 = vpack.c.bf16 %v507_v21, %v506_v19 }
 0x128   :  { %v401_v24 = vpop.f32.mrb[24].mxu0  ;;  %v465_v25 = vpop.f32.mrb[24].mxu1 }
 0x129   :  { %882 = vst [vmem:[%s1217_s3 + $0x28] sm:$0xff] %v826_v22   ;;  %890 = vst [vmem:[%s1217_s3 + $0x68] sm:$0xff] %v866_v23   ;;  %v402_v26 = vadd.f32 %v1132_v42, %v401_v24  ;;  %v466_v27 = vadd.f32 %v1132_v42, %v465_v25  ;;  %v403_v28 = vpop.f32.mrb[25].mxu0  ;;  %v467_v29 = vpop.f32.mrb[25].mxu1 }
 0x12a   :  { %v404_v30 = vpop.f32.mrb[26].mxu0  ;;  %v468_v31 = vpop.f32.mrb[26].mxu1 }
 0x12b   :  { %v405_v32 = vadd.f32 %v1132_v42, %v404_v30  ;;  %v469_v33 = vadd.f32 %v1132_v42, %v468_v31  ;;  %v406_v34 = vpop.f32.mrb[27].mxu0  ;;  %v470_v35 = vpop.f32.mrb[27].mxu1  ;;  %v492_v36 = vmax.f32 %v402_v26, 0.0  ;;  %v508_v37 = vmax.f32 %v466_v27, 0.0 }
 0x12d   :  { %v493_v38 = vmax.f32 %v405_v32, 0.0  ;;  %v509_v39 = vmax.f32 %v469_v33, 0.0 }
 0x12f   :  { %v831_v40 = vpack.c.bf16 %v493_v38, %v492_v36  ;;  %v871_v41 = vpack.c.bf16 %v509_v39, %v508_v37 }
 0x130   :  { %v409_v43 = vpop.f32.mrb[28].mxu0  ;;  %v473_v44 = vpop.f32.mrb[28].mxu1 }
 0x131   :  { %883 = vst [vmem:[%s1217_s3 + $0x30] sm:$0xff] %v831_v40   ;;  %891 = vst [vmem:[%s1217_s3 + $0x70] sm:$0xff] %v871_v41   ;;  %v410_v45 = vadd.f32 %v1132_v42, %v409_v43  ;;  %v474_v46 = vadd.f32 %v1132_v42, %v473_v44  ;;  %v411_v47 = vpop.f32.mrb[29].mxu0  ;;  %v475_v48 = vpop.f32.mrb[29].mxu1 }
 0x132   :  { %v412_v49 = vpop.f32.mrb[30].mxu0  ;;  %v476_v50 = vpop.f32.mrb[30].mxu1 }
 0x133   :  { %v413_v51 = vadd.f32 %v1132_v42, %v412_v49  ;;  %v477_v52 = vadd.f32 %v1132_v42, %v476_v50  ;;  %v414_v53 = vpop.f32.mrb[31].mxu0  ;;  %v478_v54 = vpop.f32.mrb[31].mxu1  ;;  %v494_v55 = vmax.f32 %v410_v45, 0.0  ;;  %v510_v56 = vmax.f32 %v474_v46, 0.0 }
 0x135   :  { %v495_v57 = vmax.f32 %v413_v51, 0.0  ;;  %v511_v58 = vmax.f32 %v477_v52, 0.0 }
 0x137   :  { %v836_v59 = vpack.c.bf16 %v495_v57, %v494_v55  ;;  %v876_v60 = vpack.c.bf16 %v511_v58, %v510_v56 }
 0x139   :  { %884 = vst [vmem:[%s1217_s3 + $0x38] sm:$0xff] %v836_v59   ;;  %892 = vst [vmem:[%s1217_s3 + $0x78] sm:$0xff] %v876_v60  }

// kernel: net_forward.8
= control target key start
LH: loop header
LB: loop body
LE: loop exit
PB: predicated region body
PF: predicated region fallthrough
CT: control target
= control target key end

     0   :  { %vm242_vm0 = vcmask 261120   ;;  %s748_s1 = inlined_call_operand.vmem [shape: bf16[288,128], index: 1, kind: input, shape index: {}]   ;;  %s749_s0 = inlined_call_operand.vmem [shape: bf16[64,288], index: 0, kind: input, shape index: {}]   ;;  %s750_s2 = inlined_call_operand.vmem [shape: f32[1,128], index: 2, kind: input, shape index: {}]   ;;  %s751_s3 = inlined_call_operand.vmem [shape: bf16[64,128], index: 3, kind: output, shape index: {}]  }
   0x1   :  { %v585_v0 = vld [vmem:[%s748_s1 + $0x40] sm:$0xff]   ;;  %v587_v2 = vld [vmem:[%s748_s1 + $0x48] sm:$0xff]   ;;  %v589_v4 = vld [vmem:[%s748_s1 + $0x50] sm:$0xff]  }
   0x2   :  { %v586_v1 = vld [vmem:[%s748_s1] sm:$0xff]   ;;  %511 = vmatprep.subr.bf16.mxu0 %v585_v0  ;;  %569 = vmatprep.subr.bf16.mxu1 %v585_v0  ;;  %v588_v3 = vld [vmem:[%s748_s1 + $0x8] sm:$0xff]   ;;  %v590_v5 = vld [vmem:[%s748_s1 + $0x10] sm:$0xff]  }
   0x3   :  { %512 = vmatpush3.bf16.msra.mxu0 %v586_v1  ;;  %577 = vmatpush3.bf16.msra.mxu1 %v586_v1  ;;  %v591_v6 = vld [vmem:[%s748_s1 + $0x58] sm:$0xff]   ;;  %v593_v8 = vld [vmem:[%s748_s1 + $0x60] sm:$0xff]   ;;  %v595_v10 = vld [vmem:[%s748_s1 + $0x68] sm:$0xff]  }
   0x4   :  { %513 = vmatprep.subr.bf16.mxu0 %v587_v2  ;;  %570 = vmatprep.subr.bf16.mxu1 %v587_v2  ;;  %v592_v7 = vld [vmem:[%s748_s1 + $0x18] sm:$0xff]   ;;  %v594_v9 = vld [vmem:[%s748_s1 + $0x20] sm:$0xff]   ;;  %v596_v13 = vld [vmem:[%s748_s1 + $0x28] sm:$0xff]  }
   0x5   :  { %v603_v11 = vld [vmem:[%s749_s0 + $0x4] ss:$12 sps:$4 sm:$0xff]   ;;  %v606_v12 = vld [vmem:[%s749_s0 + $0x4c] ss:$12 sps:$4 sm:$0xff]   ;;  %v604_v20 = vld [vmem:[%s749_s0 + $0x48] ss:$12 sps:$4 sm:$0xff]  }
   0x6   :  { %v597_v14 = vld [vmem:[%s748_s1 + $0x70] sm:$0xff]   ;;  %287 = vmatprep.mubr.bf16.mxu0 %v603_v11  ;;  %311 = vmatprep.mubr.bf16.mxu1 %v606_v12  ;;  %v599_v16 = vld [vmem:[%s748_s1 + $0x78] sm:$0xff]   ;;  %v607_v18 = vld [vmem:[%s748_s1 + $0x80] sm:$0xff]  }
   0x7   :  { %514 = vmatpush3.bf16.msra.mxu0 %v588_v3  ;;  %578 = vmatpush3.bf16.msra.mxu1 %v588_v3  ;;  %v598_v15 = vld [vmem:[%s748_s1 + $0x30] sm:$0xff]   ;;  %v600_v17 = vld [vmem:[%s748_s1 + $0x38] sm:$0xff]   ;;  %v601_v19 = vld [vmem:[%s749_s0] ss:$12 sps:$4 sm:$0xff]  }
   0x8   :  { %515 = vmatprep.subr.bf16.mxu0 %v589_v4  ;;  %571 = vmatprep.subr.bf16.mxu1 %v589_v4  ;;  %v609_v21 = vld [vmem:[%s749_s0 + $0x1c] ss:$12 sps:$4 sm:$0xff]   ;;  %v612_v24 = vld [vmem:[%s749_s0 + $0x18] ss:$12 sps:$4 sm:$0xff]   ;;  %v613_v25 = vld [vmem:[%s749_s0 + $0x20] ss:$12 sps:$4 sm:$0xff]  }
   0x9   :  { %v608_v22 = vld [vmem:[%s748_s1 + $0x88] sm:$0xff]   ;;  %v614_v26 = vld [vmem:[%s749_s0 + $0x34] ss:$12 sps:$4 sm:$0xff]   ;;  %v616_v27 = vld [vmem:[%s749_s0 + $0x38] ss:$12 sps:$4 sm:$0xff]  }
   0xa   :  { %v611_v23 = vld [vmem:[%s749_s0 + $0x8] ss:$12 sps:$4 sm:$0xff]   ;;  %v617_v28 = vld [vmem:[%s749_s0 + $0x30] ss:$12 sps:$4 sm:$0xff]   ;;  %v437_v42 = vld [vmem:[%s750_s2] ss:$0 sm:$0xff] }
   0xb   :  { %516 = vmatpush3.bf16.msra.mxu0 %v590_v5  ;;  %579 = vmatpush3.bf16.msra.mxu1 %v590_v5  ;;  %v618_v29 = vld [vmem:[%s749_s0 + $0x50] ss:$12 sps:$4 sm:$0xff]  }
   0xc   :  { %517 = vmatprep.subr.bf16.mxu0 %v591_v6  ;;  %572 = vmatprep.subr.bf16.mxu1 %v591_v6 }
   0xf   :  { %518 = vmatpush3.bf16.msra.mxu0 %v592_v7  ;;  %580 = vmatpush3.bf16.msra.mxu1 %v592_v7 }
  0x10   :  { %519 = vmatprep.subr.bf16.mxu0 %v593_v8  ;;  %573 = vmatprep.subr.bf16.mxu1 %v593_v8 }
  0x13   :  { %520 = vmatpush3.bf16.msra.mxu0 %v594_v9  ;;  %581 = vmatpush3.bf16.msra.mxu1 %v594_v9 }
  0x14   :  { %521 = vmatprep.subr.bf16.mxu0 %v595_v10  ;;  %574 = vmatprep.subr.bf16.mxu1 %v595_v10 }
  0x17   :  { %522 = vmatpush3.bf16.msra.mxu0 %v596_v13  ;;  %582 = vmatpush3.bf16.msra.mxu1 %v596_v13 }
  0x18   :  { %523 = vmatprep.subr.bf16.mxu0 %v597_v14  ;;  %575 = vmatprep.subr.bf16.mxu1 %v597_v14 }
  0x1b   :  { %524 = vmatpush3.bf16.msra.mxu0 %v598_v15  ;;  %583 = vmatpush3.bf16.msra.mxu1 %v598_v15 }
  0x1c   :  { %525 = vmatprep.subr.bf16.mxu0 %v599_v16  ;;  %576 = vmatprep.subr.bf16.mxu1 %v599_v16 }
  0x1f   :  { %526 = vmatpush3.bf16.msra.mxu0 %v600_v17  ;;  %584 = vmatpush3.bf16.msra.mxu1 %v600_v17 }
  0x20   :  { %557 = vmatprep.subr.bf16.mxu1 %v607_v18 }
  0x22   :  { %288 = vmatmul.mubr.bf16.vlgmr.msra.gmra.mrb[0].mxu0 %v601_v19  ;;  %312 = vmatmul.mubr.bf16.vlgmr.msra.gmra.mrb[0].mxu1 %v604_v20 }
  0x23   :  { %558 = vmatpush3.bf16.msra.mxu1 %v607_v18  ;;  %295 = vmatprep.mubr.bf16.mxu0 %v609_v21 }
  0x24   :  { %559 = vmatprep.subr.bf16.mxu1 %v608_v22  ;;  %561 = vmatprep.mubr.msk.bf16.mxu1 %vm242_vm0, %v611_v23 }
  0x27   :  { %560 = vmatpush3.bf16.msra.mxu1 %v608_v22 }
  0x2a   :  { %296 = vmatmul.mubr.bf16.gmra.mrb[4].mxu0 %v612_v24  ;;  %562 = vmatmul.mubr.msk.bf16.vlgmr.msra.gmra.mrb[4].mxu1 %vm242_vm0, %v613_v25 }
  0x2b   :  { %303 = vmatprep.mubr.bf16.mxu0 %v614_v26  ;;  %565 = vmatprep.mubr.msk.bf16.mxu1 %vm242_vm0, %v616_v27 }
  0x32   :  { %304 = vmatmul.mubr.bf16.gmra.mrb[8].mxu0 %v617_v28  ;;  %566 = vmatmul.mubr.msk.bf16.gmra.mrb[8].mxu1 %vm242_vm0, %v618_v29 }
  0xf5   :  { %v527_v30 = vpop.f32.mrb[0].mxu0  ;;  %v545_v31 = vpop.f32.mrb[0].mxu1 }
  0xf6   :  { %v528_v32 = vpop.f32.mrb[1].mxu0  ;;  %v546_v33 = vpop.f32.mrb[1].mxu1 }
  0xf7   :  { %v529_v34 = vadd.f32 %v528_v32, %v527_v30  ;;  %v530_v35 = vpop.f32.mrb[2].mxu0  ;;  %v547_v36 = vadd.f32 %v546_v33, %v545_v31  ;;  %v548_v37 = vpop.f32.mrb[2].mxu1 }
  0xf8   :  { %v531_v38 = vpop.f32.mrb[3].mxu0  ;;  %v549_v39 = vpop.f32.mrb[3].mxu1 }
  0xf9   :  { %v532_v40 = vadd.f32 %v531_v38, %v530_v35  ;;  %v550_v41 = vadd.f32 %v549_v39, %v548_v37  ;;  %v290_v45 = vadd.f32 %v529_v34, %v437_v42  ;;  %v314_v62 = vadd.f32 %v547_v36, %v437_v42 }
  0xfb   :  { %v293_v52 = vadd.f32 %v532_v40, %v437_v42  ;;  %v317_v6 = vadd.f32 %v550_v41, %v437_v42 }
  0xfd   :  { %v533_v43 = vpop.f32.mrb[4].mxu0  ;;  %v563_v44 = vpop.f32.mrb[4].mxu1 }
  0xfe   :  { %v534_v46 = vpop.f32.mrb[5].mxu0  ;;  %v354_v47 = vpop.f32.mrb[5].mxu1 }
  0xff   :  { %v535_v48 = vadd.f32 %v534_v46, %v533_v43  ;;  %v355_v49 = vadd.f32 %v354_v47, %v290_v45  ;;  %v536_v50 = vpop.f32.mrb[6].mxu0  ;;  %v564_v51 = vpop.f32.mrb[6].mxu1 }
 0x100   :  { %v537_v53 = vpop.f32.mrb[7].mxu0  ;;  %v357_v54 = vpop.f32.mrb[7].mxu1 }
 0x101   :  { %v298_v55 = vadd.f32 %v535_v48, %v437_v42  ;;  %v538_v56 = vadd.f32 %v537_v53, %v536_v50  ;;  %v358_v57 = vadd.f32 %v357_v54, %v293_v52  ;;  %v385_v59 = vmax.f32 %v355_v49, 0.0 }
 0x103   :  { %v363_v58 = vadd.f32 %v563_v44, %v298_v55  ;;  %v301_v60 = vadd.f32 %v538_v56, %v437_v42  ;;  %v386_v61 = vmax.f32 %v358_v57, 0.0 }
 0x105   :  { %v366_v63 = vadd.f32 %v564_v51, %v301_v60  ;;  %v491_v0 = vpack.c.bf16 %v386_v61, %v385_v59  ;;  %v539_v1 = vpop.f32.mrb[8].mxu0  ;;  %v567_v2 = vpop.f32.mrb[8].mxu1  ;;  %v387_v7 = vmax.f32 %v363_v58, 0.0 }
 0x106   :  { %v379_v3 = vadd.f32 %v567_v2, %v314_v62  ;;  %v540_v4 = vpop.f32.mrb[9].mxu0  ;;  %v370_v5 = vpop.f32.mrb[9].mxu1 }
 0x107   :  { %v388_v8 = vmax.f32 %v366_v63, 0.0  ;;  %492 = vst [vmem:[%s751_s3] sm:$0xff] %v491_v0   ;;  %v541_v9 = vadd.f32 %v540_v4, %v539_v1  ;;  %v542_v10 = vpop.f32.mrb[10].mxu0  ;;  %v568_v11 = vpop.f32.mrb[10].mxu1 }
 0x108   :  { %v382_v12 = vadd.f32 %v568_v11, %v317_v6  ;;  %v543_v13 = vpop.f32.mrb[11].mxu0  ;;  %v373_v14 = vpop.f32.mrb[11].mxu1  ;;  %v391_v18 = vmax.f32 %v379_v3, 0.0 }
 0x109   :  { %v496_v15 = vpack.c.bf16 %v388_v8, %v387_v7  ;;  %v306_v16 = vadd.f32 %v541_v9, %v437_v42  ;;  %v544_v17 = vadd.f32 %v543_v13, %v542_v10 }
 0x10a   :  { %v392_v19 = vmax.f32 %v382_v12, 0.0 }
 0x10b   :  { %508 = vst [vmem:[%s751_s3 + $0x8] sm:$0xff] %v496_v15   ;;  %v371_v20 = vadd.f32 %v370_v5, %v306_v16  ;;  %v309_v21 = vadd.f32 %v544_v17, %v437_v42 }
 0x10c   :  { %v506_v22 = vpack.c.bf16 %v392_v19, %v391_v18 }
 0x10d   :  { %v374_v23 = vadd.f32 %v373_v14, %v309_v21  ;;  %v389_v24 = vmax.f32 %v371_v20, 0.0 }
 0x10e   :  { %510 = vst [vmem:[%s751_s3 + $0x18] sm:$0xff] %v506_v22  }
 0x10f   :  { %v390_v25 = vmax.f32 %v374_v23, 0.0 }
 0x111   :  { %v501_v26 = vpack.c.bf16 %v390_v25, %v389_v24 }
 0x113   :  { %509 = vst [vmem:[%s751_s3 + $0x10] sm:$0xff] %v501_v26  }

// kernel: net_forward.9
= control target key start
LH: loop header
LB: loop body
LE: loop exit
PB: predicated region body
PF: predicated region fallthrough
CT: control target
= control target key end

     0   :  { %vm89_vm0 = vcmask 523264   ;;  %vm2607_vm1 = vcmask 1043456   ;;  %vm2603_vm2 = vcmask 588800   ;;  %vm2670_vm6 = vcmask 50176   ;;  %s4502_s1 = inlined_call_operand.vmem [shape: bf16[9,64,128], index: 1, kind: input, shape index: {}]   ;;  %s4503_s0 = inlined_call_operand.vmem [shape: bf16[9,18,64], index: 0, kind: input, shape index: {}]   ;;  %s4504_s3 = inlined_call_operand.vmem [shape: bf16[9,128,256], index: 3, kind: input, shape index: {}]   ;;  %s4505_s2 = inlined_call_operand.vmem [shape: f32[1,128], index: 2, kind: input, shape index: {}]   ;;  %s4506_s5 = inlined_call_operand.vmem [shape: bf16[256,200], index: 5, kind: input, shape index: {}]   ;;  %s4507_s7 = inlined_call_operand.vmem [shape: bf16[200,7], index: 7, kind: input, shape index: {}]   ;;  %s4508_s4 = inlined_call_operand.vmem [shape: f32[1,256], index: 4, kind: input, shape index: {}]   ;;  %s4509_s6 = inlined_call_operand.vmem [shape: f32[1,200], index: 6, kind: input, shape index: {}]   ;;  %s4510_s8 = inlined_call_operand.vmem [shape: f32[1,7], index: 8, kind: input, shape index: {}]   ;;  %s4511_s9 = inlined_call_operand.vmem [shape: f32[2,7], index: 9, kind: output, shape index: {}]  }
   0x1   :  { %v3319_v0 = vld [vmem:[%s4502_s1 + $0x20] sm:$0xff]   ;;  %v3321_v2 = vld [vmem:[%s4502_s1 + $0x28] sm:$0xff]   ;;  %v3323_v4 = vld [vmem:[%s4502_s1 + $0x30] sm:$0xff]  }
   0x2   :  { %v3320_v1 = vld [vmem:[%s4502_s1] sm:$0xff]   ;;  %3210 = vmatprep.subr.bf16.mxu0 %v3319_v0  ;;  %v3322_v3 = vld [vmem:[%s4502_s1 + $0x8] sm:$0xff]   ;;  %v3324_v5 = vld [vmem:[%s4502_s1 + $0x10] sm:$0xff]  }
   0x3   :  { %3222 = vmatprep.subr.bf16.mxu1 %v3320_v1  ;;  %3211 = vmatpush3.bf16.msra.mxu0 %v3319_v0  ;;  %v3325_v6 = vld [vmem:[%s4502_s1 + $0x38] sm:$0xff]   ;;  %v3327_v8 = vld [vmem:[%s4503_s0 + $0xc] sm:$0xff]   ;;  %v3328_v9 = vld [vmem:[%s4503_s0] sm:$0xff]  }
   0x4   :  { %3223 = vmatpush3.bf16.msra.mxu1 %v3320_v1  ;;  %3212 = vmatprep.subr.bf16.mxu0 %v3321_v2  ;;  %v3326_v7 = vld [vmem:[%s4502_s1 + $0x18] sm:$0xff]   ;;  %v3331_v10 = vld [vmem:[%s4502_s1 + $0x40] sm:$0xff]   ;;  %v3329_v12 = vld [vmem:[%s4503_s0 + $0x14] ss:$0 sps:$4 sm:$0x11]  }
   0x5   :  { %3224 = vmatprep.subr.bf16.mxu1 %v3322_v3  ;;  %3218 = vmatprep.mubr.msk.bf16.mxu0 %vm89_vm0, %v3327_v8  ;;  %v3332_v11 = vld [vmem:[%s4502_s1 + $0x60] sm:$0xff]   ;;  %v3330_v13 = vld [vmem:[%s4503_s0 + $0x8] ss:$0 sps:$4 sm:$0x11]   ;;  %v3335_v16 = vld [vmem:[%s4502_s1 + $0x50] sm:$0xff]  }
   0x6   :  { %3230 = vmatprep.mubr.msk.bf16.mxu1 %vm89_vm0, %v3328_v9  ;;  %v3333_v14 = vld [vmem:[%s4502_s1 + $0x48] sm:$0xff]   ;;  %v3339_v17 = vld [vmem:[%s4503_s0 + $0x18] sm:$0xff]   ;;  %v3336_v18 = vld [vmem:[%s4502_s1 + $0x70] sm:$0xff]  }
   0x7   :  { %3213 = vmatpush3.bf16.msra.mxu0 %v3321_v2  ;;  %v3334_v15 = vld [vmem:[%s4502_s1 + $0x68] sm:$0xff]   ;;  %v3337_v20 = vld [vmem:[%s4502_s1 + $0x58] sm:$0xff]   ;;  %v3340_v22 = vld [vmem:[%s4503_s0 + $0x20] ss:$0 sps:$4 sm:$0x11]  }
   0x8   :  { %3225 = vmatpush3.bf16.msra.mxu1 %v3322_v3  ;;  %3214 = vmatprep.subr.bf16.mxu0 %v3323_v4  ;;  %v3342_v19 = vld [vmem:[%s4503_s0 + $0x24] sm:$0xff]   ;;  %v3338_v21 = vld [vmem:[%s4502_s1 + $0x78] sm:$0xff]   ;;  %v3343_v24 = vld [vmem:[%s4503_s0 + $0x2c] ss:$0 sps:$4 sm:$0x11]  }
   0x9   :  { %3226 = vmatprep.subr.bf16.mxu1 %v3324_v5  ;;  %v3341_v23 = vld [vmem:[%s4502_s1 + $0x80] sm:$0xff]   ;;  %v3345_v26 = vld [vmem:[%s4502_s1 + $0x88] sm:$0xff]   ;;  %v3351_v28 = vld [vmem:[%s4503_s0 + $0x30] sm:$0xff]  }
   0xa   :  { %v3344_v25 = vld [vmem:[%s4502_s1 + $0xa0] sm:$0xff]   ;;  %v3346_v27 = vld [vmem:[%s4502_s1 + $0xa8] sm:$0xff]   ;;  %v3347_v30 = vld [vmem:[%s4502_s1 + $0x90] sm:$0xff]  }
   0xb   :  { %3215 = vmatpush3.bf16.msra.mxu0 %v3323_v4  ;;  %v3354_v29 = vld [vmem:[%s4503_s0 + $0x3c] sm:$0xff]   ;;  %v3348_v31 = vld [vmem:[%s4502_s1 + $0xb0] sm:$0xff]   ;;  %v3352_v35 = vld [vmem:[%s4503_s0 + $0x38] ss:$0 sps:$4 sm:$0x11]  }
   0xc   :  { %3227 = vmatpush3.bf16.msra.mxu1 %v3324_v5  ;;  %3216 = vmatprep.subr.bf16.mxu0 %v3325_v6  ;;  %v3349_v32 = vld [vmem:[%s4502_s1 + $0x98] sm:$0xff]   ;;  %v3353_v34 = vld [vmem:[%s4502_s1 + $0xc0] sm:$0xff]   ;;  %v3357_v38 = vld [vmem:[%s4502_s1 + $0xc8] sm:$0xff]  }
   0xd   :  { %3228 = vmatprep.subr.bf16.mxu1 %v3326_v7  ;;  %v3350_v33 = vld [vmem:[%s4502_s1 + $0xb8] sm:$0xff]   ;;  %v3356_v36 = vld [vmem:[%s4502_s1 + $0xe0] sm:$0xff]   ;;  %v3358_v39 = vld [vmem:[%s4502_s1 + $0xe8] sm:$0xff]  }
   0xe   :  { %v3355_v37 = vld [vmem:[%s4503_s0 + $0x44] ss:$0 sps:$4 sm:$0x11]   ;;  %v3363_v40 = vld [vmem:[%s4503_s0 + $0x48] sm:$0xff]   ;;  %v3366_v41 = vld [vmem:[%s4503_s0 + $0x54] sm:$0xff]  }
   0xf   :  { %3217 = vmatpush3.bf16.msra.mxu0 %v3325_v6  ;;  %v3359_v42 = vld [vmem:[%s4502_s1 + $0xd0] sm:$0xff]   ;;  %v3361_v44 = vld [vmem:[%s4502_s1 + $0xd8] sm:$0xff]   ;;  %v3365_v46 = vld [vmem:[%s4502_s1 + $0x100] sm:$0xff]  }
  0x10   :  { %3229 = vmatpush3.bf16.msra.mxu1 %v3326_v7  ;;  %3234 = vmatprep.subr.bf16.mxu0 %v3331_v10  ;;  %v3360_v43 = vld [vmem:[%s4502_s1 + $0xf0] sm:$0xff]   ;;  %v3362_v45 = vld [vmem:[%s4502_s1 + $0xf8] sm:$0xff]   ;;  %v3368_v49 = vld [vmem:[%s4502_s1 + $0x108] sm:$0xff]  }
  0x11   :  { %3246 = vmatprep.subr.bf16.mxu1 %v3332_v11  ;;  %v3364_v47 = vld [vmem:[%s4503_s0 + $0x50] ss:$0 sps:$4 sm:$0x11]   ;;  %v3367_v48 = vld [vmem:[%s4503_s0 + $0x5c] ss:$0 sps:$4 sm:$0x11]  }
  0x12   :  { %3219 = vmatmul.mubr.msk.bf16.vlgmr.msra.gmra.mrb[0].mxu0 %vm89_vm0, %v3329_v12  ;;  %v3371_v50 = vld [vmem:[%s4503_s0 + $0x60] sm:$0xff]   ;;  %v3369_v51 = vld [vmem:[%s4502_s1 + $0x110] sm:$0xff]   ;;  %v3370_v52 = vld [vmem:[%s4502_s1 + $0x118] sm:$0xff]  }
  0x13   :  { %3231 = vmatmul.mubr.msk.bf16.vlgmr.msra.gmra.mrb[0].mxu1 %vm89_vm0, %v3330_v13  ;;  %3235 = vmatpush3.bf16.msra.mxu0 %v3331_v10  ;;  %v3372_v53 = vld [vmem:[%s4503_s0 + $0x68] ss:$0 sps:$4 sm:$0x11]   ;;  %v3375_v55 = vld [vmem:[%s4504_s3 + $0x4] ss:$8 sps:$4 sm:$0xff]  }
  0x14   :  { %3247 = vmatpush3.bf16.msra.mxu1 %v3332_v11  ;;  %3236 = vmatprep.subr.bf16.mxu0 %v3333_v14  ;;  %v3373_v54 = vld [vmem:[%s4504_s3] ss:$8 sps:$4 sm:$0xff]   ;;  %v3378_v57 = vld [vmem:[%s4504_s3 + $0x84] ss:$8 sps:$4 sm:$0xff]   ;;  %v3379_v58 = vld [vmem:[%s4504_s3 + $0x10] ss:$8 sps:$4 sm:$0xff]  }
  0x15   :  { %3248 = vmatprep.subr.bf16.mxu1 %v3334_v15  ;;  %3242 = vmatprep.mubr.msk.bf16.mxu0 %vm89_vm0, %v3339_v17  ;;  %v3376_v56 = vld [vmem:[%s4504_s3 + $0x80] ss:$8 sps:$4 sm:$0xff]   ;;  %v3381_v59 = vld [vmem:[%s4504_s3 + $0x14] ss:$8 sps:$4 sm:$0xff]   ;;  %v3382_v61 = vld [vmem:[%s4504_s3 + $0x90] ss:$8 sps:$4 sm:$0xff]  }
  0x16   :  { %3254 = vmatprep.mubr.msk.bf16.mxu1 %vm89_vm0, %v3342_v19  ;;  %v3384_v60 = vld [vmem:[%s4504_s3 + $0x94] ss:$8 sps:$4 sm:$0xff]   ;;  %v3387_v62 = vld [vmem:[%s4504_s3 + $0x24] ss:$8 sps:$4 sm:$0xff]   ;;  %v3385_v63 = vld [vmem:[%s4504_s3 + $0x20] ss:$8 sps:$4 sm:$0xff]  }
  0x17   :  { %3237 = vmatpush3.bf16.msra.mxu0 %v3333_v14  ;;  %v3390_v0 = vld [vmem:[%s4504_s3 + $0xa4] ss:$8 sps:$4 sm:$0xff]   ;;  %v3388_v1 = vld [vmem:[%s4504_s3 + $0xa0] ss:$8 sps:$4 sm:$0xff]   ;;  %v3391_v2 = vld [vmem:[%s4504_s3 + $0x30] ss:$8 sps:$4 sm:$0xff]  }
  0x18   :  { %3249 = vmatpush3.bf16.msra.mxu1 %v3334_v15  ;;  %3238 = vmatprep.subr.bf16.mxu0 %v3335_v16  ;;  %v3393_v3 = vld [vmem:[%s4504_s3 + $0x34] ss:$8 sps:$4 sm:$0xff]   ;;  %v3394_v4 = vld [vmem:[%s4504_s3 + $0xb0] ss:$8 sps:$4 sm:$0xff]   ;;  %v3399_v6 = vld [vmem:[%s4504_s3 + $0x44] ss:$8 sps:$4 sm:$0xff]  }
  0x19   :  { %3250 = vmatprep.subr.bf16.mxu1 %v3336_v18  ;;  %v3396_v5 = vld [vmem:[%s4504_s3 + $0xb4] ss:$8 sps:$4 sm:$0xff]   ;;  %v3397_v7 = vld [vmem:[%s4504_s3 + $0x40] ss:$8 sps:$4 sm:$0xff]   ;;  %v3402_v8 = vld [vmem:[%s4504_s3 + $0xc4] ss:$8 sps:$4 sm:$0xff]  }
  0x1a   :  { %v3400_v9 = vld [vmem:[%s4504_s3 + $0xc0] ss:$8 sps:$4 sm:$0xff]   ;;  %v3405_v10 = vld [vmem:[%s4504_s3 + $0x54] ss:$8 sps:$4 sm:$0xff]   ;;  %v3403_v11 = vld [vmem:[%s4504_s3 + $0x50] ss:$8 sps:$4 sm:$0xff]  }
  0x1b   :  { %3239 = vmatpush3.bf16.msra.mxu0 %v3335_v16  ;;  %v3408_v12 = vld [vmem:[%s4504_s3 + $0xd4] ss:$8 sps:$4 sm:$0xff]   ;;  %v3406_v13 = vld [vmem:[%s4504_s3 + $0xd0] ss:$8 sps:$4 sm:$0xff]   ;;  %v3411_v14 = vld [vmem:[%s4504_s3 + $0x64] ss:$8 sps:$4 sm:$0xff]  }
  0x1c   :  { %3251 = vmatpush3.bf16.msra.mxu1 %v3336_v18  ;;  %3240 = vmatprep.subr.bf16.mxu0 %v3337_v20  ;;  %v3409_v15 = vld [vmem:[%s4504_s3 + $0x60] ss:$8 sps:$4 sm:$0xff]   ;;  %v3414_v16 = vld [vmem:[%s4504_s3 + $0xe4] ss:$8 sps:$4 sm:$0xff]   ;;  %v3417_v18 = vld [vmem:[%s4504_s3 + $0x74] ss:$8 sps:$4 sm:$0xff]  }
  0x1d   :  { %3252 = vmatprep.subr.bf16.mxu1 %v3338_v21  ;;  %v3412_v17 = vld [vmem:[%s4504_s3 + $0xe0] ss:$8 sps:$4 sm:$0xff]   ;;  %v3415_v19 = vld [vmem:[%s4504_s3 + $0x70] ss:$8 sps:$4 sm:$0xff]  }
  0x1f   :  { %3241 = vmatpush3.bf16.msra.mxu0 %v3337_v20  ;;  %v3420_v20 = vld [vmem:[%s4504_s3 + $0xf4] ss:$8 sps:$4 sm:$0xff]  }
  0x20   :  { %3253 = vmatpush3.bf16.msra.mxu1 %v3338_v21  ;;  %3258 = vmatprep.subr.bf16.mxu0 %v3341_v23  ;;  %v3418_v21 = vld [vmem:[%s4504_s3 + $0xf0] ss:$8 sps:$4 sm:$0xff]  }
  0x21   :  { %3270 = vmatprep.subr.bf16.mxu1 %v3344_v25 }
  0x22   :  { %3243 = vmatmul.mubr.msk.bf16.vlgmr.msra.gmra.mrb[4].mxu0 %vm89_vm0, %v3340_v22  ;;  %v3423_v22 = vld [vmem:[%s4504_s3 + $0x184] ss:$8 sps:$4 sm:$0xff]  }
  0x23   :  { %3259 = vmatpush3.bf16.msra.mxu0 %v3341_v23  ;;  %3255 = vmatmul.mubr.msk.bf16.vlgmr.msra.gmra.mrb[4].mxu1 %vm89_vm0, %v3343_v24  ;;  %v3654_v23 = vmov 0   ;;  %v3426_v24 = vld [vmem:[%s4504_s3 + $0x104] ss:$8 sps:$4 sm:$0xff]  }
  0x24   :  { %3271 = vmatpush3.bf16.msra.mxu1 %v3344_v25  ;;  %3260 = vmatprep.subr.bf16.mxu0 %v3345_v26 }
  0x25   :  { %3272 = vmatprep.subr.bf16.mxu1 %v3346_v27  ;;  %3266 = vmatprep.mubr.msk.bf16.mxu0 %vm89_vm0, %v3351_v28 }
  0x26   :  { %3278 = vmatprep.mubr.msk.bf16.mxu1 %vm89_vm0, %v3354_v29 }
  0x27   :  { %3261 = vmatpush3.bf16.msra.mxu0 %v3345_v26 }
  0x28   :  { %3273 = vmatpush3.bf16.msra.mxu1 %v3346_v27  ;;  %3262 = vmatprep.subr.bf16.mxu0 %v3347_v30 }
  0x29   :  { %3274 = vmatprep.subr.bf16.mxu1 %v3348_v31 }
  0x2b   :  { %3263 = vmatpush3.bf16.msra.mxu0 %v3347_v30 }
  0x2c   :  { %3275 = vmatpush3.bf16.msra.mxu1 %v3348_v31  ;;  %3264 = vmatprep.subr.bf16.mxu0 %v3349_v32 }
  0x2d   :  { %3276 = vmatprep.subr.bf16.mxu1 %v3350_v33 }
  0x2f   :  { %3265 = vmatpush3.bf16.msra.mxu0 %v3349_v32 }
  0x30   :  { %3277 = vmatpush3.bf16.msra.mxu1 %v3350_v33  ;;  %3282 = vmatprep.subr.bf16.mxu0 %v3353_v34 }
  0x31   :  { %3294 = vmatprep.subr.bf16.mxu1 %v3356_v36 }
  0x32   :  { %3267 = vmatmul.mubr.msk.bf16.vlgmr.msra.gmra.mrb[8].mxu0 %vm89_vm0, %v3352_v35 }
  0x33   :  { %3283 = vmatpush3.bf16.msra.mxu0 %v3353_v34  ;;  %3279 = vmatmul.mubr.msk.bf16.vlgmr.msra.gmra.mrb[8].mxu1 %vm89_vm0, %v3355_v37 }
  0x34   :  { %3295 = vmatpush3.bf16.msra.mxu1 %v3356_v36  ;;  %3284 = vmatprep.subr.bf16.mxu0 %v3357_v38 }
  0x35   :  { %3296 = vmatprep.subr.bf16.mxu1 %v3358_v39  ;;  %3290 = vmatprep.mubr.msk.bf16.mxu0 %vm89_vm0, %v3363_v40 }
  0x36   :  { %3302 = vmatprep.mubr.msk.bf16.mxu1 %vm89_vm0, %v3366_v41 }
  0x37   :  { %3285 = vmatpush3.bf16.msra.mxu0 %v3357_v38 }
  0x38   :  { %3297 = vmatpush3.bf16.msra.mxu1 %v3358_v39  ;;  %3286 = vmatprep.subr.bf16.mxu0 %v3359_v42 }
  0x39   :  { %3298 = vmatprep.subr.bf16.mxu1 %v3360_v43 }
  0x3b   :  { %3287 = vmatpush3.bf16.msra.mxu0 %v3359_v42 }
  0x3c   :  { %3299 = vmatpush3.bf16.msra.mxu1 %v3360_v43  ;;  %3288 = vmatprep.subr.bf16.mxu0 %v3361_v44 }
  0x3d   :  { %3300 = vmatprep.subr.bf16.mxu1 %v3362_v45 }
  0x3f   :  { %3289 = vmatpush3.bf16.msra.mxu0 %v3361_v44 }
  0x40   :  { %3301 = vmatpush3.bf16.msra.mxu1 %v3362_v45  ;;  %3306 = vmatprep.subr.bf16.mxu0 %v3365_v46 }
  0x41   :  { %1075 = vmatprep.subr.bf16.mxu1 %v3378_v57 }
  0x42   :  { %3291 = vmatmul.mubr.msk.bf16.vlgmr.msra.gmra.mrb[12].mxu0 %vm89_vm0, %v3364_v47 }
  0x43   :  { %3307 = vmatpush3.bf16.msra.mxu0 %v3365_v46  ;;  %3303 = vmatmul.mubr.msk.bf16.vlgmr.msra.gmra.mrb[12].mxu1 %vm89_vm0, %v3367_v48 }
  0x44   :  { %3308 = vmatprep.subr.bf16.mxu0 %v3368_v49  ;;  %3314 = vmatprep.mubr.msk.bf16.mxu0 %vm89_vm0, %v3371_v50 }
  0x45   :  { %1076 = vmatpush1.bf16.msra.mxu1 %v3376_v56  ;;  %1107 = vmatprep.mubr.bf16.mxu1 %v3654_v23 }
  0x46   :  { %1077 = vmatprep.subr.bf16.mxu1 %v3384_v60 }
  0x47   :  { %3309 = vmatpush3.bf16.msra.mxu0 %v3368_v49 }
  0x48   :  { %3310 = vmatprep.subr.bf16.mxu0 %v3369_v51 }
  0x49   :  { %1078 = vmatpush1.bf16.msra.mxu1 %v3382_v61 }
  0x4a   :  { %1079 = vmatprep.subr.bf16.mxu1 %v3390_v0 }
  0x4b   :  { %3311 = vmatpush3.bf16.msra.mxu0 %v3369_v51 }
  0x4c   :  { %3312 = vmatprep.subr.bf16.mxu0 %v3370_v52 }
  0x4d   :  { %1080 = vmatpush1.bf16.msra.mxu1 %v3388_v1 }
  0x4e   :  { %1081 = vmatprep.subr.bf16.mxu1 %v3396_v5 }
  0x4f   :  { %3313 = vmatpush3.bf16.msra.mxu0 %v3370_v52 }
  0x50   :  { %1196 = vmatprep.subr.bf16.mxu0 %v3375_v55 }
  0x51   :  { %1082 = vmatpush1.bf16.msra.mxu1 %v3394_v4 }
  0x52   :  { %3315 = vmatmul.mubr.msk.bf16.vlgmr.msra.gmra.mrb[16].mxu0 %vm89_vm0, %v3372_v53  ;;  %1083 = vmatprep.subr.bf16.mxu1 %v3402_v8 }
  0x53   :  { %1197 = vmatpush1.bf16.msra.mxu0 %v3373_v54  ;;  %1228 = vmatprep.mubr.bf16.mxu0 %v3654_v23 }
  0x54   :  { %1198 = vmatprep.subr.bf16.mxu0 %v3381_v59 }
  0x55   :  { %1084 = vmatpush1.bf16.msra.mxu1 %v3400_v9 }
  0x56   :  { %1085 = vmatprep.subr.bf16.mxu1 %v3408_v12 }
  0x57   :  { %1199 = vmatpush1.bf16.msra.mxu0 %v3379_v58 }
  0x58   :  { %1200 = vmatprep.subr.bf16.mxu0 %v3387_v62 }
  0x59   :  { %1086 = vmatpush1.bf16.msra.mxu1 %v3406_v13 }
  0x5a   :  { %1087 = vmatprep.subr.bf16.mxu1 %v3414_v16 }
  0x5b   :  { %1201 = vmatpush1.bf16.msra.mxu0 %v3385_v63 }
  0x5c   :  { %1202 = vmatprep.subr.bf16.mxu0 %v3393_v3 }
  0x5d   :  { %1088 = vmatpush1.bf16.msra.mxu1 %v3412_v17 }
  0x5e   :  { %1089 = vmatprep.subr.bf16.mxu1 %v3420_v20 }
  0x5f   :  { %1203 = vmatpush1.bf16.msra.mxu0 %v3391_v2 }
  0x60   :  { %1204 = vmatprep.subr.bf16.mxu0 %v3399_v6 }
  0x61   :  { %1090 = vmatpush1.bf16.msra.mxu1 %v3418_v21 }
  0x62   :  { %1336 = vmatprep.subr.bf16.mxu1 %v3426_v24 }
  0x63   :  { %1205 = vmatpush1.bf16.msra.mxu0 %v3397_v7 }
  0x64   :  { %1206 = vmatprep.subr.bf16.mxu0 %v3405_v10 }
  0x67   :  { %1207 = vmatpush1.bf16.msra.mxu0 %v3403_v11 }
  0x68   :  { %1208 = vmatprep.subr.bf16.mxu0 %v3411_v14 }
  0x6b   :  { %1209 = vmatpush1.bf16.msra.mxu0 %v3409_v15  ;;  %v2836_v15 = vld [vmem:[%s4505_s2] ss:$0 sm:$0xff] }
  0x6c   :  { %1210 = vmatprep.subr.bf16.mxu0 %v3417_v18 }
  0x6f   :  { %1211 = vmatpush1.bf16.msra.mxu0 %v3415_v19 }
  0x70   :  { %1478 = vmatprep.subr.bf16.mxu0 %v3423_v22 }
  0xe5   :  { %v3220_v25 = vpop.f32.mrb[0].mxu0 }
  0xe6   :  { %v3232_v26 = vpop.f32.mrb[0].mxu1  ;;  %v130_v27 = vpop.f32.mrb[1].mxu0 }
  0xe7   :  { %v225_v28 = vadd.f32 %v3232_v26, %v3220_v25  ;;  %v216_v29 = vpop.f32.mrb[1].mxu1  ;;  %v3221_v30 = vpop.f32.mrb[2].mxu0 }
  0xe8   :  { %v217_v31 = vadd.f32 %v216_v29, %v130_v27  ;;  %v3233_v32 = vpop.f32.mrb[2].mxu1  ;;  %v133_v33 = vpop.f32.mrb[3].mxu0  ;;  %v3429_v30 = vld [vmem:[%s4504_s3 + $0x194] ss:$8 sps:$4 sm:$0xff]  }
  0xe9   :  { %v219_v34 = vpop.f32.mrb[3].mxu1 }
  0xea   :  { %v220_v35 = vadd.f32 %v219_v34, %v133_v33  ;;  %v3432_v33 = vld [vmem:[%s4504_s3 + $0x114] ss:$8 sps:$4 sm:$0xff]   ;;  %v3427_v34 = vld [vmem:[%s4504_s3 + $0x190] ss:$8 sps:$4 sm:$0xff]  }
  0xf5   :  { %v3244_v36 = vpop.f32.mrb[4].mxu0 }
  0xf6   :  { %v331_v37 = vadd.f32 %v3244_v36, %v225_v28  ;;  %v315_v38 = vpop.f32.mrb[5].mxu0  ;;  %v3256_v39 = vpop.f32.mrb[4].mxu1  ;;  %v3421_v28 = vld [vmem:[%s4504_s3 + $0x180] ss:$8 sps:$4 sm:$0xff]   ;;  %v3430_v36 = vld [vmem:[%s4504_s3 + $0x110] ss:$8 sps:$4 sm:$0xff]  }
  0xf7   :  { %v329_v40 = vadd.f32 %v315_v38, %v217_v31  ;;  %v3245_v41 = vpop.f32.mrb[6].mxu0  ;;  %v417_v42 = vpop.f32.mrb[5].mxu1  ;;  %v3424_v31 = vld [vmem:[%s4504_s3 + $0x100] ss:$8 sps:$4 sm:$0xff]  }
  0xf8   :  { %v433_v43 = vadd.f32 %v3256_v39, %v331_v37  ;;  %v318_v44 = vpop.f32.mrb[7].mxu0  ;;  %v3257_v45 = vpop.f32.mrb[6].mxu1  ;;  %v3438_v37 = vld [vmem:[%s4504_s3 + $0x124] ss:$8 sps:$4 sm:$0xff]   ;;  %v3433_v38 = vld [vmem:[%s4504_s3 + $0x1a0] ss:$8 sps:$4 sm:$0xff]  }
  0xf9   :  { %v330_v46 = vadd.f32 %v318_v44, %v220_v35  ;;  %v431_v47 = vadd.f32 %v417_v42, %v329_v40  ;;  %v420_v48 = vpop.f32.mrb[7].mxu1  ;;  %v3435_v35 = vld [vmem:[%s4504_s3 + $0x1a4] ss:$8 sps:$4 sm:$0xff]   ;;  %v3441_v39 = vld [vmem:[%s4504_s3 + $0x1b4] ss:$8 sps:$4 sm:$0xff]  }
  0xfa   :  { %v3436_v40 = vld [vmem:[%s4504_s3 + $0x120] ss:$8 sps:$4 sm:$0xff]   ;;  %v3444_v41 = vld [vmem:[%s4504_s3 + $0x134] ss:$8 sps:$4 sm:$0xff]   ;;  %v3439_v42 = vld [vmem:[%s4504_s3 + $0x1b0] ss:$8 sps:$4 sm:$0xff]  }
  0xfb   :  { %v432_v49 = vadd.f32 %v420_v48, %v330_v46  ;;  %v3442_v44 = vld [vmem:[%s4504_s3 + $0x130] ss:$8 sps:$4 sm:$0xff]   ;;  %v3450_v45 = vld [vmem:[%s4504_s3 + $0x144] ss:$8 sps:$4 sm:$0xff]   ;;  %v3445_v46 = vld [vmem:[%s4504_s3 + $0x1c0] ss:$8 sps:$4 sm:$0xff]  }
  0xfc   :  { %v3448_v48 = vld [vmem:[%s4504_s3 + $0x140] ss:$8 sps:$4 sm:$0xff]  }
 0x105   :  { %v3268_v50 = vpop.f32.mrb[8].mxu0 }
 0x106   :  { %v535_v51 = vadd.f32 %v3268_v50, %v433_v43  ;;  %v519_v52 = vpop.f32.mrb[9].mxu0  ;;  %v3280_v53 = vpop.f32.mrb[8].mxu1  ;;  %v3447_v43 = vld [vmem:[%s4504_s3 + $0x1c4] ss:$8 sps:$4 sm:$0xff]   ;;  %v3451_v50 = vld [vmem:[%s4504_s3 + $0x1d0] ss:$8 sps:$4 sm:$0xff]  }
 0x107   :  { %v533_v54 = vadd.f32 %v519_v52, %v431_v47  ;;  %v3269_v55 = vpop.f32.mrb[10].mxu0  ;;  %v621_v56 = vpop.f32.mrb[9].mxu1  ;;  %v3453_v47 = vld [vmem:[%s4504_s3 + $0x1d4] ss:$8 sps:$4 sm:$0xff]   ;;  %v3454_v52 = vld [vmem:[%s4504_s3 + $0x150] ss:$8 sps:$4 sm:$0xff]  }
 0x108   :  { %v637_v57 = vadd.f32 %v3280_v53, %v535_v51  ;;  %v522_v58 = vpop.f32.mrb[11].mxu0  ;;  %v3281_v59 = vpop.f32.mrb[10].mxu1  ;;  %v3459_v51 = vld [vmem:[%s4504_s3 + $0x1e4] ss:$8 sps:$4 sm:$0xff]   ;;  %v3465_v55 = vld [vmem:[%s4504_s3 + $0x1f4] ss:$8 sps:$4 sm:$0xff]  }
 0x109   :  { %v534_v60 = vadd.f32 %v522_v58, %v432_v49  ;;  %v635_v61 = vadd.f32 %v621_v56, %v533_v54  ;;  %v624_v62 = vpop.f32.mrb[11].mxu1  ;;  %v3456_v49 = vld [vmem:[%s4504_s3 + $0x154] ss:$8 sps:$4 sm:$0xff]   ;;  %v3462_v53 = vld [vmem:[%s4504_s3 + $0x164] ss:$8 sps:$4 sm:$0xff]  }
 0x10a   :  { %v3457_v54 = vld [vmem:[%s4504_s3 + $0x1e0] ss:$8 sps:$4 sm:$0xff]   ;;  %v3463_v58 = vld [vmem:[%s4504_s3 + $0x1f0] ss:$8 sps:$4 sm:$0xff]   ;;  %v3471_v59 = vld [vmem:[%s4504_s3 + $0x284] ss:$8 sps:$4 sm:$0xff]  }
 0x10b   :  { %v636_v63 = vadd.f32 %v624_v62, %v534_v60  ;;  %v3460_v56 = vld [vmem:[%s4504_s3 + $0x160] ss:$8 sps:$4 sm:$0xff]   ;;  %v3466_v60 = vld [vmem:[%s4504_s3 + $0x170] ss:$8 sps:$4 sm:$0xff]  }
 0x10c   :  { %v3469_v62 = vld [vmem:[%s4504_s3 + $0x280] ss:$8 sps:$4 sm:$0xff]  }
 0x115   :  { %v3292_v0 = vpop.f32.mrb[12].mxu0 }
 0x116   :  { %v739_v1 = vadd.f32 %v3292_v0, %v637_v57  ;;  %v723_v2 = vpop.f32.mrb[13].mxu0  ;;  %v3304_v3 = vpop.f32.mrb[12].mxu1  ;;  %v3468_v57 = vld [vmem:[%s4504_s3 + $0x174] ss:$8 sps:$4 sm:$0xff]  }
 0x117   :  { %v737_v4 = vadd.f32 %v723_v2, %v635_v61  ;;  %v3293_v5 = vpop.f32.mrb[14].mxu0  ;;  %v825_v6 = vpop.f32.mrb[13].mxu1  ;;  %v3474_v61 = vld [vmem:[%s4504_s3 + $0x204] ss:$8 sps:$4 sm:$0xff]   ;;  %v3477_v0 = vld [vmem:[%s4504_s3 + $0x294] ss:$8 sps:$4 sm:$0xff]  }
 0x118   :  { %v841_v7 = vadd.f32 %v3304_v3, %v739_v1  ;;  %v726_v8 = vpop.f32.mrb[15].mxu0  ;;  %v3305_v9 = vpop.f32.mrb[14].mxu1  ;;  %v3472_v1 = vld [vmem:[%s4504_s3 + $0x200] ss:$8 sps:$4 sm:$0xff]   ;;  %v3480_v3 = vld [vmem:[%s4504_s3 + $0x214] ss:$8 sps:$4 sm:$0xff]  }
 0x119   :  { %v738_v10 = vadd.f32 %v726_v8, %v636_v63  ;;  %v839_v11 = vadd.f32 %v825_v6, %v737_v4  ;;  %v828_v12 = vpop.f32.mrb[15].mxu1  ;;  %v3475_v4 = vld [vmem:[%s4504_s3 + $0x290] ss:$8 sps:$4 sm:$0xff]   ;;  %v3483_v5 = vld [vmem:[%s4504_s3 + $0x2a4] ss:$8 sps:$4 sm:$0xff]  }
 0x11a   :  { %v3478_v6 = vld [vmem:[%s4504_s3 + $0x210] ss:$8 sps:$4 sm:$0xff]   ;;  %v3481_v8 = vld [vmem:[%s4504_s3 + $0x2a0] ss:$8 sps:$4 sm:$0xff]   ;;  %v3489_v9 = vld [vmem:[%s4504_s3 + $0x2b4] ss:$8 sps:$4 sm:$0xff]  }
 0x11b   :  { %v840_v13 = vadd.f32 %v828_v12, %v738_v10  ;;  %v3484_v10 = vld [vmem:[%s4504_s3 + $0x220] ss:$8 sps:$4 sm:$0xff]   ;;  %v3487_v12 = vld [vmem:[%s4504_s3 + $0x2b0] ss:$8 sps:$4 sm:$0xff]  }
 0x125   :  { %v3316_v14 = vpop.f32.mrb[16].mxu0 }
 0x126   :  { %v943_v16 = vadd.f32 %v3316_v14, %v841_v7  ;;  %v927_v17 = vpop.f32.mrb[17].mxu0  ;;  %v3486_v7 = vld [vmem:[%s4504_s3 + $0x224] ss:$8 sps:$4 sm:$0xff]   ;;  %v3490_v14 = vld [vmem:[%s4504_s3 + $0x230] ss:$8 sps:$4 sm:$0xff]  }
 0x127   :  { %v941_v18 = vadd.f32 %v927_v17, %v839_v11  ;;  %v3317_v19 = vpop.f32.mrb[18].mxu0  ;;  %v3492_v11 = vld [vmem:[%s4504_s3 + $0x234] ss:$8 sps:$4 sm:$0xff]  }
 0x128   :  { %v3992_v20 = vadd.f32 %v2836_v15, %v943_v16  ;;  %v930_v21 = vpop.f32.mrb[19].mxu0  ;;  %v3493_v16 = vld [vmem:[%s4504_s3 + $0x2c0] ss:$8 sps:$4 sm:$0xff]   ;;  %v3501_v17 = vld [vmem:[%s4504_s3 + $0x2d4] ss:$8 sps:$4 sm:$0xff]  }
 0x129   :  { %v951_v22 = vadd.f32 %v2836_v15, %v941_v18  ;;  %v942_v24 = vadd.f32 %v930_v21, %v840_v13  ;;  %v3495_v13 = vld [vmem:[%s4504_s3 + $0x2c4] ss:$8 sps:$4 sm:$0xff]   ;;  %v3496_v18 = vld [vmem:[%s4504_s3 + $0x240] ss:$8 sps:$4 sm:$0xff]   ;;  %v3504_v19 = vld [vmem:[%s4504_s3 + $0x254] ss:$8 sps:$4 sm:$0xff]  }
 0x12a   :  { %v3499_v21 = vld [vmem:[%s4504_s3 + $0x2d0] ss:$8 sps:$4 sm:$0xff]  }
 0x12b   :  { %v952_v25 = vadd.f32 %v2836_v15, %v942_v24  ;;  %v954_v26 = vmax.f32 %v951_v22, 0.0  ;;  %v3498_v15 = vld [vmem:[%s4504_s3 + $0x244] ss:$8 sps:$4 sm:$0xff]   ;;  %v3502_v24 = vld [vmem:[%s4504_s3 + $0x250] ss:$8 sps:$4 sm:$0xff]  }
 0x12c   :  { %v3507_v22 = vld [vmem:[%s4504_s3 + $0x2e4] ss:$8 sps:$4 sm:$0xff]  }
 0x12d   :  { %v955_v27 = vmax.f32 %v952_v25, 0.0  ;;  %v3510_v25 = vld [vmem:[%s4504_s3 + $0x264] ss:$8 sps:$4 sm:$0xff]  }
 0x12f   :  { %v3997_v29 = vpack.c.bf16 %v955_v27, %v954_v26  ;;  %v3505_v26 = vld [vmem:[%s4504_s3 + $0x2e0] ss:$8 sps:$4 sm:$0xff]   ;;  %v3513_v27 = vld [vmem:[%s4504_s3 + $0x2f4] ss:$8 sps:$4 sm:$0xff]  }
 0x131   :  { %1229 = vmatmul.mubr.bf16.vlgmr.msra.gmra.mrb[20].mxu0 %v3997_v29  ;;  %v993_v32 = vrot.slane %v3997_v29, 1  ;;  %v1396_v63 = vrot.slane %v3997_v29, 3  ;;  %v1254_v2 = vrot.slane %v3997_v29, 2 }
 0x132   :  { %1479 = vmatpush1.bf16.msra.mxu0 %v3421_v28  ;;  %1510 = vmatprep.mubr.bf16.mxu0 %v3654_v23  ;;  %v3508_v28 = vld [vmem:[%s4504_s3 + $0x260] ss:$8 sps:$4 sm:$0xff]  }
 0x133   :  { %1108 = vmatmul.mubr.bf16.vlgmr.msra.gmra.mrb[16].mxu1 %v993_v32  ;;  %1480 = vmatprep.subr.bf16.mxu0 %v3429_v30  ;;  %v3516_v30 = vld [vmem:[%s4504_s3 + $0x274] ss:$8 sps:$4 sm:$0xff]   ;;  %v3519_v32 = vld [vmem:[%s4504_s3 + $0x384] ss:$8 sps:$4 sm:$0xff]  }
 0x134   :  { %1337 = vmatpush1.bf16.msra.mxu1 %v3424_v31  ;;  %1368 = vmatprep.mubr.bf16.mxu1 %v3654_v23  ;;  %v3511_v31 = vld [vmem:[%s4504_s3 + $0x2f0] ss:$8 sps:$4 sm:$0xff]  }
 0x135   :  { %1338 = vmatprep.subr.bf16.mxu1 %v3432_v33  ;;  %v3514_v33 = vld [vmem:[%s4504_s3 + $0x270] ss:$8 sps:$4 sm:$0xff]  }
 0x136   :  { %1481 = vmatpush1.bf16.msra.mxu0 %v3427_v34  ;;  %v3522_v34 = vld [vmem:[%s4504_s3 + $0x304] ss:$8 sps:$4 sm:$0xff]  }
 0x137   :  { %1482 = vmatprep.subr.bf16.mxu0 %v3435_v35  ;;  %v3517_v35 = vld [vmem:[%s4504_s3 + $0x380] ss:$8 sps:$4 sm:$0xff]  }
 0x138   :  { %1339 = vmatpush1.bf16.msra.mxu1 %v3430_v36  ;;  %v1680_v36 = vrot.slane %v3997_v29, 5 }
 0x139   :  { %1340 = vmatprep.subr.bf16.mxu1 %v3438_v37  ;;  %v3525_v37 = vld [vmem:[%s4504_s3 + $0x394] ss:$8 sps:$4 sm:$0xff]  }
 0x13a   :  { %1483 = vmatpush1.bf16.msra.mxu0 %v3433_v38  ;;  %v3520_v38 = vld [vmem:[%s4504_s3 + $0x300] ss:$8 sps:$4 sm:$0xff]  }
 0x13b   :  { %1484 = vmatprep.subr.bf16.mxu0 %v3441_v39  ;;  %v1538_v39 = vrot.slane %v3997_v29, 4 }
 0x13c   :  { %1341 = vmatpush1.bf16.msra.mxu1 %v3436_v40  ;;  %v3528_v40 = vld [vmem:[%s4504_s3 + $0x314] ss:$8 sps:$4 sm:$0xff]  }
 0x13d   :  { %1342 = vmatprep.subr.bf16.mxu1 %v3444_v41  ;;  %v3523_v41 = vld [vmem:[%s4504_s3 + $0x390] ss:$8 sps:$4 sm:$0xff]  }
 0x13e   :  { %1485 = vmatpush1.bf16.msra.mxu0 %v3439_v42  ;;  %v3531_v42 = vld [vmem:[%s4504_s3 + $0x3a4] ss:$8 sps:$4 sm:$0xff]  }
 0x13f   :  { %1486 = vmatprep.subr.bf16.mxu0 %v3447_v43  ;;  %v3526_v43 = vld [vmem:[%s4504_s3 + $0x310] ss:$8 sps:$4 sm:$0xff]  }
 0x140   :  { %1343 = vmatpush1.bf16.msra.mxu1 %v3442_v44  ;;  %v3534_v44 = vld [vmem:[%s4504_s3 + $0x324] ss:$8 sps:$4 sm:$0xff]  }
 0x141   :  { %1344 = vmatprep.subr.bf16.mxu1 %v3450_v45  ;;  %v3529_v45 = vld [vmem:[%s4504_s3 + $0x3a0] ss:$8 sps:$4 sm:$0xff]  }
 0x142   :  { %1487 = vmatpush1.bf16.msra.mxu0 %v3445_v46  ;;  %v3537_v46 = vld [vmem:[%s4504_s3 + $0x3b4] ss:$8 sps:$4 sm:$0xff]  }
 0x143   :  { %1488 = vmatprep.subr.bf16.mxu0 %v3453_v47  ;;  %v3532_v47 = vld [vmem:[%s4504_s3 + $0x320] ss:$8 sps:$4 sm:$0xff]  }
 0x144   :  { %1345 = vmatpush1.bf16.msra.mxu1 %v3448_v48  ;;  %v3540_v48 = vld [vmem:[%s4504_s3 + $0x334] ss:$8 sps:$4 sm:$0xff]  }
 0x145   :  { %1346 = vmatprep.subr.bf16.mxu1 %v3456_v49  ;;  %v3535_v49 = vld [vmem:[%s4504_s3 + $0x3b0] ss:$8 sps:$4 sm:$0xff]  }
 0x146   :  { %1489 = vmatpush1.bf16.msra.mxu0 %v3451_v50  ;;  %v3543_v50 = vld [vmem:[%s4504_s3 + $0x3c4] ss:$8 sps:$4 sm:$0xff]  }
 0x147   :  { %1490 = vmatprep.subr.bf16.mxu0 %v3459_v51  ;;  %v3538_v51 = vld [vmem:[%s4504_s3 + $0x330] ss:$8 sps:$4 sm:$0xff]  }
 0x148   :  { %1347 = vmatpush1.bf16.msra.mxu1 %v3454_v52  ;;  %v3546_v52 = vld [vmem:[%s4504_s3 + $0x344] ss:$8 sps:$4 sm:$0xff]  }
 0x149   :  { %1348 = vmatprep.subr.bf16.mxu1 %v3462_v53  ;;  %v3541_v53 = vld [vmem:[%s4504_s3 + $0x3c0] ss:$8 sps:$4 sm:$0xff]  }
 0x14a   :  { %1491 = vmatpush1.bf16.msra.mxu0 %v3457_v54  ;;  %v3549_v54 = vld [vmem:[%s4504_s3 + $0x3d4] ss:$8 sps:$4 sm:$0xff]  }
 0x14b   :  { %1492 = vmatprep.subr.bf16.mxu0 %v3465_v55  ;;  %v3544_v55 = vld [vmem:[%s4504_s3 + $0x340] ss:$8 sps:$4 sm:$0xff]  }
 0x14c   :  { %1349 = vmatpush1.bf16.msra.mxu1 %v3460_v56  ;;  %v3552_v56 = vld [vmem:[%s4504_s3 + $0x354] ss:$8 sps:$4 sm:$0xff]  }
 0x14d   :  { %1350 = vmatprep.subr.bf16.mxu1 %v3468_v57  ;;  %v3547_v57 = vld [vmem:[%s4504_s3 + $0x3d0] ss:$8 sps:$4 sm:$0xff]  }
 0x14e   :  { %1493 = vmatpush1.bf16.msra.mxu0 %v3463_v58  ;;  %v3555_v58 = vld [vmem:[%s4504_s3 + $0x3e4] ss:$8 sps:$4 sm:$0xff]  }
 0x14f   :  { %1762 = vmatprep.subr.bf16.mxu0 %v3471_v59  ;;  %v3550_v59 = vld [vmem:[%s4504_s3 + $0x350] ss:$8 sps:$4 sm:$0xff]  }
 0x150   :  { %1351 = vmatpush1.bf16.msra.mxu1 %v3466_v60  ;;  %v3558_v60 = vld [vmem:[%s4504_s3 + $0x364] ss:$8 sps:$4 sm:$0xff]  }
 0x151   :  { %1511 = vmatmul.mubr.bf16.vlgmr.msra.gmra.mrb[24].mxu0 %v1396_v63  ;;  %1620 = vmatprep.subr.bf16.mxu1 %v3474_v61  ;;  %v3553_v61 = vld [vmem:[%s4504_s3 + $0x3e0] ss:$8 sps:$4 sm:$0xff]  }
 0x152   :  { %1763 = vmatpush1.bf16.msra.mxu0 %v3469_v62  ;;  %1794 = vmatprep.mubr.bf16.mxu0 %v3654_v23  ;;  %v3561_v62 = vld [vmem:[%s4504_s3 + $0x3f4] ss:$8 sps:$4 sm:$0xff]   ;;  %v3556_v63 = vld [vmem:[%s4504_s3 + $0x360] ss:$8 sps:$4 sm:$0xff]  }
 0x153   :  { %1369 = vmatmul.mubr.bf16.vlgmr.msra.gmra.mrb[20].mxu1 %v1254_v2  ;;  %1764 = vmatprep.subr.bf16.mxu0 %v3477_v0  ;;  %v3564_v0 = vld [vmem:[%s4504_s3 + $0x374] ss:$8 sps:$4 sm:$0xff]   ;;  %v3562_v2 = vld [vmem:[%s4504_s3 + $0x370] ss:$8 sps:$4 sm:$0xff]  }
 0x154   :  { %1621 = vmatpush1.bf16.msra.mxu1 %v3472_v1  ;;  %1652 = vmatprep.mubr.bf16.mxu1 %v3654_v23  ;;  %v3559_v1 = vld [vmem:[%s4504_s3 + $0x3f0] ss:$8 sps:$4 sm:$0xff]  }
 0x155   :  { %1622 = vmatprep.subr.bf16.mxu1 %v3480_v3  ;;  %v3567_v3 = vld [vmem:[%s4504_s3 + $0x404] ss:$8 sps:$4 sm:$0xff]  }
 0x156   :  { %1765 = vmatpush1.bf16.msra.mxu0 %v3475_v4  ;;  %v1964_v4 = vrot.slane %v3997_v29, 7 }
 0x157   :  { %1766 = vmatprep.subr.bf16.mxu0 %v3483_v5  ;;  %v3565_v5 = vld [vmem:[%s4504_s3 + $0x400] ss:$8 sps:$4 sm:$0xff]  }
 0x158   :  { %1623 = vmatpush1.bf16.msra.mxu1 %v3478_v6  ;;  %v1822_v6 = vrot.slane %v3997_v29, 6  ;;  %v3571_v29 = vld [vmem:[%s4504_s3 + $0x420] ss:$8 sps:$4 sm:$0xff]  }
 0x159   :  { %1624 = vmatprep.subr.bf16.mxu1 %v3486_v7  ;;  %v3570_v7 = vld [vmem:[%s4504_s3 + $0x414] ss:$8 sps:$4 sm:$0xff]  }
 0x15a   :  { %1767 = vmatpush1.bf16.msra.mxu0 %v3481_v8  ;;  %v3568_v8 = vld [vmem:[%s4504_s3 + $0x410] ss:$8 sps:$4 sm:$0xff]  }
 0x15b   :  { %1768 = vmatprep.subr.bf16.mxu0 %v3489_v9  ;;  %v3573_v9 = vld [vmem:[%s4504_s3 + $0x424] ss:$8 sps:$4 sm:$0xff]  }
 0x15c   :  { %1625 = vmatpush1.bf16.msra.mxu1 %v3484_v10  ;;  %v3576_v10 = vld [vmem:[%s4504_s3 + $0x434] ss:$8 sps:$4 sm:$0xff]  }
 0x15d   :  { %1626 = vmatprep.subr.bf16.mxu1 %v3492_v11  ;;  %v3574_v11 = vld [vmem:[%s4504_s3 + $0x430] ss:$8 sps:$4 sm:$0xff]  }
 0x15e   :  { %1769 = vmatpush1.bf16.msra.mxu0 %v3487_v12  ;;  %v3579_v12 = vld [vmem:[%s4504_s3 + $0x444] ss:$8 sps:$4 sm:$0xff]  }
 0x15f   :  { %1770 = vmatprep.subr.bf16.mxu0 %v3495_v13  ;;  %v3577_v13 = vld [vmem:[%s4504_s3 + $0x440] ss:$8 sps:$4 sm:$0xff]  }
 0x160   :  { %1627 = vmatpush1.bf16.msra.mxu1 %v3490_v14  ;;  %v3582_v14 = vld [vmem:[%s4504_s3 + $0x454] ss:$8 sps:$4 sm:$0xff]  }
 0x161   :  { %1628 = vmatprep.subr.bf16.mxu1 %v3498_v15  ;;  %v3580_v15 = vld [vmem:[%s4504_s3 + $0x450] ss:$8 sps:$4 sm:$0xff]  }
 0x162   :  { %1771 = vmatpush1.bf16.msra.mxu0 %v3493_v16  ;;  %v3585_v16 = vld [vmem:[%s4504_s3 + $0x464] ss:$8 sps:$4 sm:$0xff]  }
 0x163   :  { %1772 = vmatprep.subr.bf16.mxu0 %v3501_v17  ;;  %v3583_v17 = vld [vmem:[%s4504_s3 + $0x460] ss:$8 sps:$4 sm:$0xff]  }
 0x164   :  { %1629 = vmatpush1.bf16.msra.mxu1 %v3496_v18  ;;  %v3588_v18 = vld [vmem:[%s4504_s3 + $0x474] ss:$8 sps:$4 sm:$0xff]  }
 0x165   :  { %1630 = vmatprep.subr.bf16.mxu1 %v3504_v19  ;;  %v3586_v19 = vld [vmem:[%s4504_s3 + $0x470] ss:$8 sps:$4 sm:$0xff]  }
 0x166   :  { %1773 = vmatpush1.bf16.msra.mxu0 %v3499_v21  ;;  %v956_v21 = vmax.f32 %v3992_v20, 0.0  ;;  %v3592_v20 = vld [vmem:[%s4506_s5 + $0x10] ss:$8 sps:$4 sm:$0xff]  }
 0x167   :  { %1774 = vmatprep.subr.bf16.mxu0 %v3507_v22 }
 0x168   :  { %1631 = vmatpush1.bf16.msra.mxu1 %v3502_v24  ;;  %v958_v22 = vpack.c.bf16 %v956_v21, %v956_v21  ;;  %v3589_v24 = vld [vmem:[%s4506_s5] ss:$8 sps:$4 sm:$0xff]   ;;  %v3644_v21 = vld [vmem:[%s4507_s7 + $0x38] sm:$0xff]  }
 0x169   :  { %1632 = vmatprep.subr.bf16.mxu1 %v3510_v25  ;;  %v3591_v25 = vld [vmem:[%s4506_s5 + $0x4] ss:$8 sps:$4 sm:$0xff]  }
 0x16a   :  { %1775 = vmatpush1.bf16.msra.mxu0 %v3505_v26  ;;  %v3594_v26 = vld [vmem:[%s4506_s5 + $0x14] ss:$8 sps:$4 sm:$0xff]  }
 0x16b   :  { %1776 = vmatprep.subr.bf16.mxu0 %v3513_v27  ;;  %v3597_v27 = vld [vmem:[%s4506_s5 + $0x24] ss:$8 sps:$4 sm:$0xff]  }
 0x16c   :  { %1633 = vmatpush1.bf16.msra.mxu1 %v3508_v28  ;;  %v3595_v28 = vld [vmem:[%s4506_s5 + $0x20] ss:$8 sps:$4 sm:$0xff]  }
 0x16d   :  { %1634 = vmatprep.subr.bf16.mxu1 %v3516_v30  ;;  %v3600_v30 = vld [vmem:[%s4506_s5 + $0x34] ss:$8 sps:$4 sm:$0xff]  }
 0x16e   :  { %1777 = vmatpush1.bf16.msra.mxu0 %v3511_v31  ;;  %v3598_v31 = vld [vmem:[%s4506_s5 + $0x30] ss:$8 sps:$4 sm:$0xff]  }
 0x16f   :  { %2046 = vmatprep.subr.bf16.mxu0 %v3519_v32  ;;  %v3603_v32 = vld [vmem:[%s4506_s5 + $0x44] ss:$8 sps:$4 sm:$0xff]  }
 0x170   :  { %1635 = vmatpush1.bf16.msra.mxu1 %v3514_v33  ;;  %v3601_v33 = vld [vmem:[%s4506_s5 + $0x40] ss:$8 sps:$4 sm:$0xff]  }
 0x171   :  { %1795 = vmatmul.mubr.bf16.vlgmr.msra.gmra.mrb[28].mxu0 %v1680_v36  ;;  %1904 = vmatprep.subr.bf16.mxu1 %v3522_v34  ;;  %v3606_v34 = vld [vmem:[%s4506_s5 + $0x54] ss:$8 sps:$4 sm:$0xff]   ;;  %v3609_v36 = vld [vmem:[%s4506_s5 + $0x64] ss:$8 sps:$4 sm:$0xff]  }
 0x172   :  { %2047 = vmatpush1.bf16.msra.mxu0 %v3517_v35  ;;  %2078 = vmatprep.mubr.bf16.mxu0 %v3654_v23  ;;  %v3604_v35 = vld [vmem:[%s4506_s5 + $0x50] ss:$8 sps:$4 sm:$0xff]  }
 0x173   :  { %1653 = vmatmul.mubr.bf16.vlgmr.msra.gmra.mrb[24].mxu1 %v1538_v39  ;;  %2048 = vmatprep.subr.bf16.mxu0 %v3525_v37  ;;  %v3607_v37 = vld [vmem:[%s4506_s5 + $0x60] ss:$8 sps:$4 sm:$0xff]   ;;  %v3610_v39 = vld [vmem:[%s4506_s5 + $0x70] ss:$8 sps:$4 sm:$0xff]  }
 0x174   :  { %1905 = vmatpush1.bf16.msra.mxu1 %v3520_v38  ;;  %1936 = vmatprep.mubr.bf16.mxu1 %v3654_v23  ;;  %v3612_v38 = vld [vmem:[%s4506_s5 + $0x74] ss:$8 sps:$4 sm:$0xff]  }
 0x175   :  { %1906 = vmatprep.subr.bf16.mxu1 %v3528_v40  ;;  %v3615_v40 = vld [vmem:[%s4506_s5 + $0x84] ss:$8 sps:$4 sm:$0xff]  }
 0x176   :  { %2049 = vmatpush1.bf16.msra.mxu0 %v3523_v41  ;;  %v3613_v41 = vld [vmem:[%s4506_s5 + $0x80] ss:$8 sps:$4 sm:$0xff]  }
 0x177   :  { %2050 = vmatprep.subr.bf16.mxu0 %v3531_v42  ;;  %v3618_v42 = vld [vmem:[%s4506_s5 + $0x94] ss:$8 sps:$4 sm:$0xff]  }
 0x178   :  { %1907 = vmatpush1.bf16.msra.mxu1 %v3526_v43  ;;  %v3616_v43 = vld [vmem:[%s4506_s5 + $0x90] ss:$8 sps:$4 sm:$0xff]  }
 0x179   :  { %1908 = vmatprep.subr.bf16.mxu1 %v3534_v44  ;;  %v3621_v44 = vld [vmem:[%s4506_s5 + $0xa4] ss:$8 sps:$4 sm:$0xff]  }
 0x17a   :  { %2051 = vmatpush1.bf16.msra.mxu0 %v3529_v45  ;;  %v3619_v45 = vld [vmem:[%s4506_s5 + $0xa0] ss:$8 sps:$4 sm:$0xff]  }
 0x17b   :  { %2052 = vmatprep.subr.bf16.mxu0 %v3537_v46  ;;  %v3624_v46 = vld [vmem:[%s4506_s5 + $0xb4] ss:$8 sps:$4 sm:$0xff]  }
 0x17c   :  { %1909 = vmatpush1.bf16.msra.mxu1 %v3532_v47  ;;  %v3622_v47 = vld [vmem:[%s4506_s5 + $0xb0] ss:$8 sps:$4 sm:$0xff]  }
 0x17d   :  { %1910 = vmatprep.subr.bf16.mxu1 %v3540_v48  ;;  %v3627_v48 = vld [vmem:[%s4506_s5 + $0xc4] ss:$8 sps:$4 sm:$0xff]  }
 0x17e   :  { %2053 = vmatpush1.bf16.msra.mxu0 %v3535_v49  ;;  %v3625_v49 = vld [vmem:[%s4506_s5 + $0xc0] ss:$8 sps:$4 sm:$0xff]  }
 0x17f   :  { %2054 = vmatprep.subr.bf16.mxu0 %v3543_v50  ;;  %v3630_v50 = vld [vmem:[%s4506_s5 + $0xd4] ss:$8 sps:$4 sm:$0xff]  }
 0x180   :  { %1911 = vmatpush1.bf16.msra.mxu1 %v3538_v51  ;;  %v3628_v51 = vld [vmem:[%s4506_s5 + $0xd0] ss:$8 sps:$4 sm:$0xff]  }
 0x181   :  { %1912 = vmatprep.subr.bf16.mxu1 %v3546_v52 }
 0x182   :  { %2055 = vmatpush1.bf16.msra.mxu0 %v3541_v53 }
 0x183   :  { %2056 = vmatprep.subr.bf16.mxu0 %v3549_v54 }
 0x184   :  { %1913 = vmatpush1.bf16.msra.mxu1 %v3544_v55 }
 0x185   :  { %1914 = vmatprep.subr.bf16.mxu1 %v3552_v56 }
 0x186   :  { %2057 = vmatpush1.bf16.msra.mxu0 %v3547_v57 }
 0x187   :  { %2058 = vmatprep.subr.bf16.mxu0 %v3555_v58 }
 0x188   :  { %1915 = vmatpush1.bf16.msra.mxu1 %v3550_v59  ;;  %v3633_v59 = vld [vmem:[%s4506_s5 + $0xe4] ss:$8 sps:$4 sm:$0xff]  }
 0x189   :  { %1916 = vmatprep.subr.bf16.mxu1 %v3558_v60 }
 0x18a   :  { %2059 = vmatpush1.bf16.msra.mxu0 %v3553_v61 }
 0x18b   :  { %2060 = vmatprep.subr.bf16.mxu0 %v3561_v62  ;;  %v3631_v62 = vld [vmem:[%s4506_s5 + $0xe0] ss:$8 sps:$4 sm:$0xff]  }
 0x18c   :  { %1917 = vmatpush1.bf16.msra.mxu1 %v3556_v63 }
 0x18d   :  { %1918 = vmatprep.subr.bf16.mxu1 %v3564_v0  ;;  %v3636_v0 = vld [vmem:[%s4506_s5 + $0xf4] ss:$8 sps:$4 sm:$0xff]  }
 0x18e   :  { %2061 = vmatpush1.bf16.msra.mxu0 %v3559_v1  ;;  %v3634_v1 = vld [vmem:[%s4506_s5 + $0xf0] ss:$8 sps:$4 sm:$0xff]  }
 0x18f   :  { %2451 = vmatprep.subr.bf16.mxu0 %v3591_v25  ;;  %v3647_v25 = vld [vmem:[%s4507_s7 + $0x50] sm:$0xff]  }
 0x190   :  { %1919 = vmatpush1.bf16.msra.mxu1 %v3562_v2  ;;  %v3637_v2 = vld [vmem:[%s4507_s7] sm:$0xff]  }
 0x191   :  { %2079 = vmatmul.mubr.bf16.vlgmr.msra.gmra.mrb[32].mxu0 %v1964_v4  ;;  %2186 = vmatprep.subr.bf16.mxu1 %v3567_v3  ;;  %v3638_v3 = vld [vmem:[%s4507_s7 + $0x8] sm:$0xff]   ;;  %v3639_v4 = vld [vmem:[%s4507_s7 + $0x10] sm:$0xff]  }
 0x192   :  { %2452 = vmatpush1.bf16.msra.mxu0 %v3589_v24  ;;  %v3646_v24 = vld [vmem:[%s4507_s7 + $0x48] sm:$0xff]  }
 0x193   :  { %1937 = vmatmul.mubr.bf16.vlgmr.msra.gmra.mrb[28].mxu1 %v1822_v6  ;;  %2453 = vmatprep.subr.bf16.mxu0 %v3594_v26  ;;  %v3641_v6 = vld [vmem:[%s4507_s7 + $0x20] sm:$0xff]  }
 0x194   :  { %2187 = vmatpush1.bf16.msra.mxu1 %v3565_v5  ;;  %2218 = vmatprep.mubr.bf16.mxu1 %v3654_v23  ;;  %v3640_v5 = vld [vmem:[%s4507_s7 + $0x18] sm:$0xff]  }
 0x195   :  { %2188 = vmatprep.subr.bf16.mxu1 %v3570_v7 }
 0x196   :  { %2454 = vmatpush1.bf16.msra.mxu0 %v3592_v20 }
 0x197   :  { %2455 = vmatprep.subr.bf16.mxu0 %v3597_v27 }
 0x198   :  { %2189 = vmatpush1.bf16.msra.mxu1 %v3568_v8  ;;  %v3642_v8 = vld [vmem:[%s4507_s7 + $0x28] sm:$0xff]  }
 0x199   :  { %2190 = vmatprep.subr.bf16.mxu1 %v3573_v9 }
 0x19a   :  { %2456 = vmatpush1.bf16.msra.mxu0 %v3595_v28 }
 0x19b   :  { %2457 = vmatprep.subr.bf16.mxu0 %v3600_v30 }
 0x19c   :  { %2191 = vmatpush1.bf16.msra.mxu1 %v3571_v29 }
 0x19d   :  { %2192 = vmatprep.subr.bf16.mxu1 %v3576_v10 }
 0x19e   :  { %2458 = vmatpush1.bf16.msra.mxu0 %v3598_v31 }
 0x19f   :  { %2459 = vmatprep.subr.bf16.mxu0 %v3603_v32 }
 0x1a0   :  { %2193 = vmatpush1.bf16.msra.mxu1 %v3574_v11 }
 0x1a1   :  { %2194 = vmatprep.subr.bf16.mxu1 %v3579_v12 }
 0x1a2   :  { %2460 = vmatpush1.bf16.msra.mxu0 %v3601_v33 }
 0x1a3   :  { %2461 = vmatprep.subr.bf16.mxu0 %v3606_v34 }
 0x1a4   :  { %2195 = vmatpush1.bf16.msra.mxu1 %v3577_v13 }
 0x1a5   :  { %2196 = vmatprep.subr.bf16.mxu1 %v3582_v14 }
 0x1a6   :  { %2462 = vmatpush1.bf16.msra.mxu0 %v3604_v35 }
 0x1a7   :  { %2463 = vmatprep.subr.bf16.mxu0 %v3609_v36 }
 0x1a8   :  { %2197 = vmatpush1.bf16.msra.mxu1 %v3580_v15 }
 0x1a9   :  { %2198 = vmatprep.subr.bf16.mxu1 %v3585_v16  ;;  %v3643_v16 = vld [vmem:[%s4507_s7 + $0x30] sm:$0xff]  }
 0x1aa   :  { %2464 = vmatpush1.bf16.msra.mxu0 %v3607_v37 }
 0x1ab   :  { %2465 = vmatprep.subr.bf16.mxu0 %v3612_v38 }
 0x1ac   :  { %2199 = vmatpush1.bf16.msra.mxu1 %v3583_v17 }
 0x1ad   :  { %2200 = vmatprep.subr.bf16.mxu1 %v3588_v18 }
 0x1ae   :  { %2466 = vmatpush1.bf16.msra.mxu0 %v3610_v39 }
 0x1af   :  { %2467 = vmatprep.subr.bf16.mxu0 %v3615_v40 }
 0x1b0   :  { %2201 = vmatpush1.bf16.msra.mxu1 %v3586_v19 }
 0x1b1   :  { %2611 = vmatprep.subr.bf16.mxu1 %v3654_v23 }
 0x1b2   :  { %2468 = vmatpush1.bf16.msra.mxu0 %v3613_v41 }
 0x1b3   :  { %2219 = vmatmul.mubr.bf16.vlgmr.msra.gmra.mrb[32].mxu1 %v958_v22  ;;  %2469 = vmatprep.subr.bf16.mxu0 %v3618_v42  ;;  %v3645_v22 = vld [vmem:[%s4507_s7 + $0x40] sm:$0xff]  }
 0x1b4   :  { %2612 = vmatpush1.bf16.msra.mxu1 %v3637_v2 }
 0x1b5   :  { %2613 = vmatprep.subr.bf16.mxu1 %v3654_v23 }
 0x1b6   :  { %2470 = vmatpush1.bf16.msra.mxu0 %v3616_v43 }
 0x1b7   :  { %2471 = vmatprep.subr.bf16.mxu0 %v3621_v44 }
 0x1b8   :  { %2614 = vmatpush1.bf16.msra.mxu1 %v3638_v3 }
 0x1b9   :  { %2615 = vmatprep.subr.bf16.mxu1 %v3654_v23 }
 0x1ba   :  { %2472 = vmatpush1.bf16.msra.mxu0 %v3619_v45 }
 0x1bb   :  { %2473 = vmatprep.subr.bf16.mxu0 %v3624_v46 }
 0x1bc   :  { %2616 = vmatpush1.bf16.msra.mxu1 %v3639_v4 }
 0x1bd   :  { %2617 = vmatprep.subr.bf16.mxu1 %v3654_v23 }
 0x1be   :  { %2474 = vmatpush1.bf16.msra.mxu0 %v3622_v47 }
 0x1bf   :  { %2475 = vmatprep.subr.bf16.mxu0 %v3627_v48 }
 0x1c0   :  { %2618 = vmatpush1.bf16.msra.mxu1 %v3640_v5  ;;  %v3648_v5 = vld [vmem:[%s4507_s7 + $0x58] sm:$0xff]  }
 0x1c1   :  { %2619 = vmatprep.subr.bf16.mxu1 %v3654_v23 }
 0x1c2   :  { %2476 = vmatpush1.bf16.msra.mxu0 %v3625_v49 }
 0x1c3   :  { %2477 = vmatprep.subr.bf16.mxu0 %v3630_v50  ;;  %v2231_v50 = vlaneseq }
 0x1c4   :  { %2620 = vmatpush1.bf16.msra.mxu1 %v3641_v6  ;;  %v3649_v6 = vld [vmem:[%s4507_s7 + $0x60] ss:$0 sps:$4 sm:$0xff]  }
 0x1c5   :  { %2621 = vmatprep.subr.bf16.mxu1 %v3654_v23 }
 0x1c6   :  { %2478 = vmatpush1.bf16.msra.mxu0 %v3628_v51  ;;  %v2232_v51 = vshrl.u32 %v2231_v50, 7 }
 0x1c7   :  { %2479 = vmatprep.subr.bf16.mxu0 %v3633_v59 }
 0x1c8   :  { %2622 = vmatpush1.bf16.msra.mxu1 %v3642_v8  ;;  %v2279_v8 = vld [vmem:[%s4509_s6] sm:$0x3] }
 0x1c9   :  { %2623 = vmatprep.subr.bf16.mxu1 %v3654_v23 }
 0x1ca   :  { %2480 = vmatpush1.bf16.msra.mxu0 %v3631_v62 }
 0x1cb   :  { %2481 = vmatprep.subr.bf16.mxu0 %v3636_v0 }
 0x1cc   :  { %2624 = vmatpush1.bf16.msra.mxu1 %v3643_v16 }
 0x1cd   :  { %2625 = vmatprep.subr.bf16.mxu1 %v3654_v23 }
 0x1ce   :  { %2482 = vmatpush1.bf16.msra.mxu0 %v3634_v1 }
 0x1d0   :  { %2626 = vmatpush1.bf16.msra.mxu1 %v3644_v21 }
 0x1d1   :  { %2627 = vmatprep.subr.bf16.mxu1 %v3654_v23 }
 0x1d4   :  { %2628 = vmatpush1.bf16.msra.mxu1 %v3645_v22 }
 0x1d5   :  { %2629 = vmatprep.subr.bf16.mxu1 %v3654_v23 }
 0x1d8   :  { %2630 = vmatpush1.bf16.msra.mxu1 %v3646_v24 }
 0x1d9   :  { %2631 = vmatprep.subr.bf16.mxu1 %v3654_v23 }
 0x1dc   :  { %2632 = vmatpush1.bf16.msra.mxu1 %v3647_v25 }
 0x1dd   :  { %2633 = vmatprep.subr.bf16.mxu1 %v3654_v23 }
 0x1e0   :  { %2634 = vmatpush1.bf16.msra.mxu1 %v3648_v5 }
 0x1e1   :  { %2635 = vmatprep.subr.bf16.mxu1 %v3654_v23 }
 0x204   :  { %v1230_v52 = vpop.f32.mrb[20].mxu0 }
 0x205   :  { %v1232_v53 = vpop.f32.mrb[21].mxu0 }
 0x206   :  { %v1109_v54 = vpop.f32.mrb[16].mxu1  ;;  %v1234_v55 = vpop.f32.mrb[22].mxu0 }
 0x207   :  { %v1231_v56 = vadd.f32 %v1230_v52, %v1109_v54  ;;  %v1111_v57 = vpop.f32.mrb[17].mxu1  ;;  %v1235_v58 = vpop.f32.mrb[23].mxu0  ;;  %v2233_v52 = vsub.s32 0, %v2232_v51  ;;  %v2237_v54 = vsub.s32 1, %v2232_v51 }
 0x208   :  { %v1233_v60 = vadd.f32 %v1232_v53, %v1111_v57  ;;  %v1113_v61 = vpop.f32.mrb[18].mxu1  ;;  %v2229_v53 = vld [vmem:[%s4508_s4] sm:$0x3] }
 0x209   :  { %v1114_v63 = vpop.f32.mrb[19].mxu1  ;;  %v2234_v55 = vrot.slane %v2229_v53, %v2233_v52  ;;  %v2238_v57 = vrot.slane %v2229_v53, %v2237_v54 }
 0x224   :  { %v1512_v7 = vpop.f32.mrb[24].mxu0 }
 0x225   :  { %v1514_v9 = vpop.f32.mrb[25].mxu0 }
 0x226   :  { %v1370_v29 = vpop.f32.mrb[20].mxu1  ;;  %v1516_v10 = vpop.f32.mrb[26].mxu0 }
 0x227   :  { %v1377_v11 = vadd.f32 %v1370_v29, %v1231_v56  ;;  %v1372_v12 = vpop.f32.mrb[21].mxu1  ;;  %v1517_v13 = vpop.f32.mrb[27].mxu0  ;;  %v2288_v29 = vrot.slane %v2279_v8, %v2237_v54 }
 0x228   :  { %v1378_v14 = vadd.f32 %v1372_v12, %v1233_v60  ;;  %v1374_v15 = vpop.f32.mrb[22].mxu1 }
 0x229   :  { %v1375_v17 = vpop.f32.mrb[23].mxu1  ;;  %v1519_v18 = vadd.f32 %v1512_v7, %v1377_v11  ;;  %v2609_v7 = vsel %vm2607_vm1, %v3649_v6, 0 }
 0x22a   :  { %v1520_v19 = vadd.f32 %v1514_v9, %v1378_v14  ;;  %2636 = vmatpush1.bf16.msra.mxu1 %v2609_v7  ;;  %v2284_v9 = vrot.slane %v2279_v8, %v2233_v52 }
 0x244   :  { %v1796_v26 = vpop.f32.mrb[28].mxu0 }
 0x245   :  { %v1798_v20 = vpop.f32.mrb[29].mxu0 }
 0x246   :  { %v1654_v27 = vpop.f32.mrb[24].mxu1  ;;  %v1800_v28 = vpop.f32.mrb[30].mxu0 }
 0x247   :  { %v1661_v30 = vadd.f32 %v1654_v27, %v1519_v18  ;;  %v1656_v31 = vpop.f32.mrb[25].mxu1  ;;  %v1801_v32 = vpop.f32.mrb[31].mxu0 }
 0x248   :  { %v1662_v33 = vadd.f32 %v1656_v31, %v1520_v19  ;;  %v1658_v34 = vpop.f32.mrb[26].mxu1  ;;  %v3141_v19 = vld [vmem:[%s4510_s8] ss:$0 sm:$0xff] }
 0x249   :  { %v1659_v35 = vpop.f32.mrb[27].mxu1  ;;  %v1803_v36 = vadd.f32 %v1796_v26, %v1661_v30 }
 0x24a   :  { %v1804_v37 = vadd.f32 %v1798_v20, %v1662_v33  ;;  %v2652_v35 = vand.u32 127, %v2231_v50 }
 0x24c   :  { %vm2668_vm5 = vcmp.eq.s32.totalorder %v2652_v35, 0 }
 0x264   :  { %v2080_v38 = vpop.f32.mrb[32].mxu0 }
 0x265   :  { %v2082_v39 = vpop.f32.mrb[33].mxu0 }
 0x266   :  { %v1938_v40 = vpop.f32.mrb[28].mxu1  ;;  %v2084_v41 = vpop.f32.mrb[34].mxu0 }
 0x267   :  { %v1945_v42 = vadd.f32 %v1938_v40, %v1803_v36  ;;  %v1940_v43 = vpop.f32.mrb[29].mxu1  ;;  %v2085_v44 = vpop.f32.mrb[35].mxu0 }
 0x268   :  { %v1946_v45 = vadd.f32 %v1940_v43, %v1804_v37  ;;  %v1942_v46 = vpop.f32.mrb[30].mxu1 }
 0x269   :  { %v1943_v47 = vpop.f32.mrb[31].mxu1  ;;  %v2087_v48 = vadd.f32 %v2080_v38, %v1945_v42 }
 0x26a   :  { %v2088_v49 = vadd.f32 %v2082_v39, %v1946_v45 }
 0x286   :  { %v2220_v56 = vpop.f32.mrb[32].mxu1 }
 0x287   :  { %v2227_v58 = vadd.f32 %v2220_v56, %v2087_v48  ;;  %v2222_v59 = vpop.f32.mrb[33].mxu1 }
 0x288   :  { %v2228_v60 = vadd.f32 %v2222_v59, %v2088_v49  ;;  %v2224_v61 = vpop.f32.mrb[34].mxu1 }
 0x289   :  { %v2241_v62 = vadd.f32 %v2234_v55, %v2227_v58  ;;  %v2225_v63 = vpop.f32.mrb[35].mxu1 }
 0x28a   :  { %v2242_v0 = vadd.f32 %v2238_v57, %v2228_v60 }
 0x28b   :  { %v2243_v1 = vmax.f32 %v2241_v62, 0.0 }
 0x28c   :  { %v2244_v2 = vmax.f32 %v2242_v0, 0.0 }
 0x28d   :  { %v2245_v4 = vpack.c.bf16 %v2243_v1, %v2243_v1 }
 0x28e   :  { %v2246_v3 = vpack.c.bf16 %v2244_v2, %v2244_v2 }
 0x290   :  { %2483 = vmatprep.mubr.bf16.mxu0 %v2246_v3 }
 0x291   :  { %2484 = vmatmul.mubr.bf16.vlgmr.msra.gmra.mrb[36].mxu0 %v2245_v4 }
 0x364   :  { %v2485_v10 = vpop.f32.mrb[36].mxu0 }
 0x365   :  { %v2486_v11 = vadd.f32 %v2485_v10, %v2284_v9  ;;  %v2487_v12 = vpop.f32.mrb[37].mxu0 }
 0x366   :  { %v2488_v13 = vadd.f32 %v2487_v12, %v2288_v29  ;;  %v2489_v14 = vpop.f32.mrb[38].mxu0 }
 0x367   :  { %v2492_v15 = vmax.f32 %v2486_v11, 0.0  ;;  %v2490_v23 = vpop.f32.mrb[39].mxu0 }
 0x368   :  { %v2493_v16 = vmax.f32 %v2488_v13, 0.0 }
 0x369   :  { %v2494_v18 = vpack.c.bf16 %v2492_v15, %v2492_v15 }
 0x36a   :  { %v2495_v17 = vpack.c.bf16 %v2493_v16, %v2493_v16 }
 0x36c   :  { %3155 = vmatprep.mubr.msk.bf16.mxu1 %vm2603_vm2, %v2495_v17 }
 0x36d   :  { %2644 = vmatmul.mubr.bf16.vlgmr.msra.gmra.mrb[36].mxu1 %v2494_v18 }
 0x440   :  { %v2645_v21 = vpop.f32.mrb[36].mxu1 }
 0x441   :  { %v2646_v22 = vadd.f32 %v3141_v19, %v2645_v21  ;;  %v2647_v24 = vpop.f32.mrb[37].mxu1 }
 0x442   :  { %v2648_v25 = vpop.f32.mrb[38].mxu1 }
 0x443   :  { %v2654_v26 = vmin.f32 %v2646_v22, 20.0  ;;  %v2649_v20 = vpop.f32.mrb[39].mxu1  ;;  %vm2653_vm4 = vcmp.gt.f32.partialorder %v2646_v22, 20.0 }
 0x445   :  { %v2655_v27 = vmul.f32 1.442695, %v2654_v26 }
 0x447   :  { %3650 = vpow2.f32 %v2655_v27 }
 0x451   :  { %v3651_v28 = vpop.eup %3650 }
 0x452   :  { %v2657_v30 = vadd.f32 1.0, %v3651_v28  ;;  %v2660_v31 = vmul.f32 -0.5, %v3651_v28  ;;  %v2663_v33 = vand.u32 2147483647, %v3651_v28 }
 0x454   :  { %3652 = vlog2.f32 %v2657_v30  ;;  %v2661_v32 = vadd.f32 1.0, %v2660_v31  ;;  %vm2664_vm3 = vcmp.lt.f32.partialorder %v2663_v33, 0.0004427343 }
 0x456   :  { %v2662_v37 = vmul.f32 %v3651_v28, %v2661_v32 }
 0x45e   :  { %v3653_v34 = vpop.eup %3652 }
 0x45f   :  { %v2659_v36 = vmul.f32 0.6931472, %v3653_v34 }
 0x461   :  { %v2665_v38 = vsel %vm2664_vm3, %v2662_v37, %v2659_v36 }
 0x462   :  { %v2666_v39 = vsel %vm2653_vm4, %v2646_v22, %v2665_v38 }
 0x463   :  { %v2667_v40 = vadd.f32 1.0, %v2666_v39 }
 0x465   :  { %v2669_v41 = vsel %vm2668_vm5, %v2646_v22, %v2667_v40 }
 0x466   :  { %2671 = vst.msk [vmem:[%s4511_s9] sm:$0x3] %vm2670_vm6, %v2669_v41 }

</bundles_post_ra>
